<compile_context>
chip_gen: v5e
topology: v5e:2x2
jax: 0.10.0
libtpu: 0.0.40
codegen_flags: <defaults>
</compile_context>

<pallas_src>
import functools

import jax
import jax.numpy as jnp
from jax.experimental import pallas as pl
from jax.experimental.pallas import tpu as pltpu

STATE_FRAMES = 4
C1_OUT = 20
C2_OUT = 40
OC_PAD = 128                 # conv output channels padded to one lane group
MB = 1024 * 1024


def _round_up(x, m):
    return (x + m - 1) // m * m


def _pick_fc1_tk():
    # Generation-aware K tile for fc1: bigger weight tiles on 128 MiB-VMEM
    # parts (v5e/v6e), 1024 on v7x (64 MiB physical VMEM).
    try:
        if pltpu.get_tpu_info().vmem_capacity_bytes >= 100 * MB:
            return 2048
    except Exception:
        pass
    return 1024


FC1_TK = _pick_fc1_tk()


def _fc1_padded_k(k):
    return _round_up(k, 128) if k <= FC1_TK else _round_up(k, FC1_TK)


def _buf_bytes(shape, dtype):
    """VMEM bytes of one block after (sublane, lane) padding."""
    s = list(shape)
    s[-1] = _round_up(s[-1], 128)
    if len(s) >= 2:
        s[-2] = _round_up(s[-2], 8)
    n = 1
    for d in s:
        n *= d
    return n * jnp.dtype(dtype).itemsize


def _vmem_limit(pipelined, scratch=(), slack=8 * MB, floor=16 * MB, cap=48 * MB):
    """Right-size vmem_limit_bytes from actual block math: double-buffered
    pipelined blocks + single-buffered scratch + slack for relayout temps."""
    total = sum(2 * _buf_bytes(s, d) for s, d in pipelined)
    total += sum(_buf_bytes(s, d) for s, d in scratch)
    return int(min(max(_round_up(total + slack, MB), floor), cap))


# ----------------------------------------------------------------------------
# conv1: im2col'd single GEMM (K = 9*STATE_FRAMES) + bias + ReLU + 2x2/s2 pool.
# ----------------------------------------------------------------------------
def _conv1_gemm_relu_pool_kernel(x_ref, w_ref, b_ref, o_ref, acc_ref,
                                 *, OW, PH, PW):
    # One MXU pass per image; f32 epilogue; accumulator written exactly once.
    acc_ref[...] = jnp.maximum(
        jnp.dot(x_ref[0], w_ref[...], preferred_element_type=jnp.float32)
        + b_ref[...], 0.0)
    # Fused 2x2/s2 max-pool via stride-2 sublane loads; one dense store.
    rows = []
    for ph in range(PH):
        r0 = 2 * ph * OW
        r1 = r0 + OW
        rows.append(jnp.maximum(
            jnp.maximum(acc_ref[pl.ds(r0, PW, stride=2), :],
                        acc_ref[pl.ds(r0 + 1, PW, stride=2), :]),
            jnp.maximum(acc_ref[pl.ds(r1, PW, stride=2), :],
                        acc_ref[pl.ds(r1 + 1, PW, stride=2), :])))
    o_ref[0, :, :] = jnp.concatenate(rows, axis=0).astype(o_ref.dtype)


def conv1_relu_pool(x_nhwc, wk, bk):
    """x_nhwc: (N,H,W,C) f32 -> (N, PH*PW, OC_PAD) bf16 (20 real channels)."""
    n, H, W, C = x_nhwc.shape
    OH, OW = H - 2, W - 2
    PH, PW = OH // 2, OW // 2
    Kc = 9 * C
    # Host-side im2col in (kh, kw, ic) order — matches the weight row order.
    cols = [x_nhwc[:, i:i + OH, j:j + OW, :] for i in range(3) for j in range(3)]
    xi = jnp.concatenate(cols, axis=-1).reshape(n, OH * OW, Kc).astype(jnp.bfloat16)

    kernel = functools.partial(_conv1_gemm_relu_pool_kernel, OW=OW, PH=PH, PW=PW)
    vmem = _vmem_limit(
        pipelined=[((1, OH * OW, Kc), jnp.bfloat16),
                   ((Kc, OC_PAD), jnp.bfloat16),
                   ((1, OC_PAD), jnp.float32),
                   ((1, PH * PW, OC_PAD), jnp.bfloat16)],
        scratch=[((OH * OW, OC_PAD), jnp.float32)])
    out = pl.pallas_call(
        kernel,
        out_shape=jax.ShapeDtypeStruct((n, PH * PW, OC_PAD), jnp.bfloat16),
        grid=(n,),
        in_specs=[
            pl.BlockSpec((1, OH * OW, Kc), lambda b: (b, 0, 0)),
            pl.BlockSpec((Kc, OC_PAD), lambda b: (0, 0)),
            pl.BlockSpec((1, OC_PAD), lambda b: (0, 0)),
        ],
        out_specs=pl.BlockSpec((1, PH * PW, OC_PAD), lambda b: (b, 0, 0)),
        scratch_shapes=[pltpu.VMEM((OH * OW, OC_PAD), jnp.float32)],
        compiler_params=pltpu.CompilerParams(
            dimension_semantics=("parallel",),
            vmem_limit_bytes=vmem),
    )(xi, wk, bk)
    return out, PH, PW


# ----------------------------------------------------------------------------
# conv2: 3x3 valid conv as 9 shifted GEMMs (C=128) + bias + ReLU + 2x2/s2 pool.
# ----------------------------------------------------------------------------
def _conv3x3_relu_pool_kernel(x_ref, w_ref, b_ref, o_ref, acc_ref,
                              *, W, C, L, PH, PW):
    # Valid-conv outputs live at rows r = oh*W + ow (ow < OW); the extra
    # columns are in-bounds junk never read by the pooling indices below.
    acc = None
    for i in range(3):
        for j in range(3):
            lhs = x_ref[0, pl.ds(i * W + j, L), :]          # (L, C)   bf16
            rhs = w_ref[pl.ds((i * 3 + j) * C, C), :]       # (C, 128) bf16
            d = jnp.dot(lhs, rhs, preferred_element_type=jnp.float32)
            acc = d if acc is None else acc + d
    # Single accumulator write (no zero-init sweep, no 9x VMEM RMW traffic).
    acc_ref[...] = jnp.maximum(acc + b_ref[...], 0.0)
    rows = []
    for ph in range(PH):
        r0 = 2 * ph * W
        r1 = r0 + W
        rows.append(jnp.maximum(
            jnp.maximum(acc_ref[pl.ds(r0, PW, stride=2), :],
                        acc_ref[pl.ds(r0 + 1, PW, stride=2), :]),
            jnp.maximum(acc_ref[pl.ds(r1, PW, stride=2), :],
                        acc_ref[pl.ds(r1 + 1, PW, stride=2), :])))
    o_ref[0, :, :] = jnp.concatenate(rows, axis=0).astype(o_ref.dtype)


def conv3x3_relu_pool(x_flat, H, W, wk, bk):
    """x_flat: (N, H*W, C) bf16 -> (N, PH*PW, OC_PAD) bf16."""
    n, HW, C = x_flat.shape
    assert HW == H * W
    OH, OW = H - 2, W - 2
    PH, PW = OH // 2, OW // 2
    L = (OH - 1) * W + OW
    kernel = functools.partial(_conv3x3_relu_pool_kernel,
                               W=W, C=C, L=L, PH=PH, PW=PW)
    vmem = _vmem_limit(
        pipelined=[((1, H * W, C), jnp.bfloat16),
                   ((9 * C, OC_PAD), jnp.bfloat16),
                   ((1, OC_PAD), jnp.float32),
                   ((1, PH * PW, OC_PAD), jnp.bfloat16)],
        scratch=[((L, OC_PAD), jnp.float32)])
    out = pl.pallas_call(
        kernel,
        out_shape=jax.ShapeDtypeStruct((n, PH * PW, OC_PAD), jnp.bfloat16),
        grid=(n,),
        in_specs=[
            pl.BlockSpec((1, H * W, C), lambda b: (b, 0, 0)),
            pl.BlockSpec((9 * C, OC_PAD), lambda b: (0, 0)),
            pl.BlockSpec((1, OC_PAD), lambda b: (0, 0)),
        ],
        out_specs=pl.BlockSpec((1, PH * PW, OC_PAD), lambda b: (b, 0, 0)),
        scratch_shapes=[pltpu.VMEM((L, OC_PAD), jnp.float32)],
        compiler_params=pltpu.CompilerParams(
            dimension_semantics=("parallel",),
            vmem_limit_bytes=vmem),
    )(x_flat, wk, bk)
    return out, PH, PW


# ----------------------------------------------------------------------------
# fc1: tiled GEMM + bias + ReLU (bf16 MXU, f32 VMEM accumulator, K innermost).
# ----------------------------------------------------------------------------
def _gemm_bias_kernel(x_ref, w_ref, b_ref, o_ref, acc_ref, *, apply_relu):
    @pl.when(pl.program_id(2) == 0)
    def _():
        acc_ref[...] = jnp.zeros_like(acc_ref)

    acc_ref[...] += jnp.dot(x_ref[...], w_ref[...],
                            preferred_element_type=jnp.float32)

    @pl.when(pl.program_id(2) == pl.num_programs(2) - 1)
    def _():
        r = acc_ref[...] + b_ref[...]
        if apply_relu:
            r = jnp.maximum(r, 0.0)
        o_ref[...] = r.astype(o_ref.dtype)


def gemm_bias(x, w, b2d, *, n_real, relu, out_dtype, tm=128, tk=1024, tn=256):
    """x: (M, K); w: (Kp, Np) pre-padded/pre-transposed; b2d: (1, Np)."""
    M, K = x.shape
    Kp, Np = w.shape
    assert K <= Kp and n_real <= Np and b2d.shape == (1, Np)
    tk = min(tk, Kp)
    tn = min(tn, Np)
    assert Kp % tk == 0 and Np % tn == 0
    Mp = _round_up(M, tm)
    xp = jnp.pad(x.astype(jnp.bfloat16), ((0, Mp - M), (0, Kp - K)))
    vmem = _vmem_limit(
        pipelined=[((tm, tk), jnp.bfloat16), ((tk, tn), jnp.bfloat16),
                   ((1, tn), jnp.float32), ((tm, tn), out_dtype)],
        scratch=[((tm, tn), jnp.float32)])
    # TODO(synk): if DMA gaps remain on the weight stream at full size, add
    #   pipeline_mode=pl.Buffered(3) on the weight BlockSpec.
    out = pl.pallas_call(
        functools.partial(_gemm_bias_kernel, apply_relu=relu),
        out_shape=jax.ShapeDtypeStruct((Mp, Np), out_dtype),
        grid=(Mp // tm, Np // tn, Kp // tk),
        in_specs=[
            pl.BlockSpec((tm, tk), lambda m, n, k: (m, k)),
            pl.BlockSpec((tk, tn), lambda m, n, k: (k, n)),
            pl.BlockSpec((1, tn), lambda m, n, k: (0, n)),
        ],
        out_specs=pl.BlockSpec((tm, tn), lambda m, n, k: (m, n)),
        scratch_shapes=[pltpu.VMEM((tm, tn), jnp.float32)],
        compiler_params=pltpu.CompilerParams(
            dimension_semantics=("parallel", "parallel", "arbitrary"),
            vmem_limit_bytes=vmem),
    )(xp, w, b2d)
    return out[:M, :n_real]


# ----------------------------------------------------------------------------
# Fused FC tail (fc2..fc5): activation stays in VMEM, weights loaded once.
# ----------------------------------------------------------------------------
def _fc_tail_kernel(h_ref, w2_ref, b2_ref, w3_ref, b3_ref, w4_ref, b4_ref,
                    w5_ref, b5_ref, o_ref):
    def layer(a, w_ref, b_ref, relu):
        y = jnp.dot(a.astype(jnp.bfloat16), w_ref[...],
                    preferred_element_type=jnp.float32) + b_ref[...]
        return jnp.maximum(y, 0.0) if relu else y

    a = layer(h_ref[...], w2_ref, b2_ref, True)    # 512 -> 128
    a = layer(a, w3_ref, b3_ref, True)             # 128 -> 128
    a = layer(a, w4_ref, b4_ref, True)             # 128 -> 64 (padded 128)
    a = layer(a, w5_ref, b5_ref, False)            # 64  -> 22 (padded 128)
    o_ref[...] = a.astype(o_ref.dtype)


def fc_tail(h, kp, tm=128):
    M, K = h.shape                                 # K == 512
    Mp = _round_up(M, tm)
    hp = jnp.pad(h.astype(jnp.bfloat16), ((0, Mp - M), (0, 0)))

    def full(shape):
        return pl.BlockSpec(shape, lambda m: (0, 0))

    vmem = _vmem_limit(
        pipelined=[((tm, K), jnp.bfloat16),
                   ((K, 128), jnp.bfloat16), ((1, 128), jnp.float32),
                   ((128, 128), jnp.bfloat16), ((1, 128), jnp.float32),
                   ((128, 128), jnp.bfloat16), ((1, 128), jnp.float32),
                   ((128, 128), jnp.bfloat16), ((1, 128), jnp.float32),
                   ((tm, 128), jnp.float32)])
    out = pl.pallas_call(
        _fc_tail_kernel,
        out_shape=jax.ShapeDtypeStruct((Mp, 128), jnp.float32),
        grid=(Mp // tm,),
        in_specs=[
            pl.BlockSpec((tm, K), lambda m: (m, 0)),
            full((K, 128)), full((1, 128)),
            full((128, 128)), full((1, 128)),
            full((128, 128)), full((1, 128)),
            full((128, 128)), full((1, 128)),
        ],
        out_specs=pl.BlockSpec((tm, 128), lambda m: (m, 0)),
        compiler_params=pltpu.CompilerParams(
            dimension_semantics=("parallel",),
            vmem_limit_bytes=vmem),
    )(hp, kp["fc2_w"], kp["fc2_b"], kp["fc3_w"], kp["fc3_b"],
      kp["fc4_w"], kp["fc4_b"], kp["fc5_w"], kp["fc5_b"])
    return out[:M, :22]


# ----------------------------------------------------------------------------
# Parameters: generated in PyTorch layouts, converted to kernel layouts ONCE.
# ----------------------------------------------------------------------------
def init_torch_params(key, flat_dim):
    def dense(k, fan_in, fan_out):
        kw, kb = jax.random.split(k)
        s = 1.0 / jnp.sqrt(jnp.float32(fan_in))
        return (jax.random.normal(kw, (fan_out, fan_in), jnp.float32) * s,
                jax.random.normal(kb, (fan_out,), jnp.float32) * s)

    def conv(k, ic, oc):
        kw, kb = jax.random.split(k)
        s = 1.0 / jnp.sqrt(jnp.float32(ic * 9))
        return (jax.random.normal(kw, (oc, ic, 3, 3), jnp.float32) * s,
                jax.random.normal(kb, (oc,), jnp.float32) * s)

    ks = jax.random.split(key, 7)
    return {
        "conv1": conv(ks[0], STATE_FRAMES, C1_OUT),
        "conv2": conv(ks[1], C1_OUT, C2_OUT),
        "fc1": dense(ks[2], flat_dim, 512),    # original: Linear(75920, 512)
        "fc2": dense(ks[3], 512, 128),
        "fc3": dense(ks[4], 128, 128),
        "fc4": dense(ks[5], 128, 64),
        "fc5": dense(ks[6], 64, 22),
    }


def prepare_params(tp, pooled2_hw):
    """One-time conversion: pad conv channels to 128, pre-transpose FC weights,
    reorder conv weights to (kh,kw,ic) rows, permute fc1 for NHWC flatten."""
    PH2, PW2 = pooled2_hw
    out = {}

    def conv_to_kernel(w, b, ic_pad):
        oc, ic, kh, kw_ = w.shape
        wp = jnp.pad(w, ((0, OC_PAD - oc), (0, ic_pad - ic), (0, 0), (0, 0)))
        wk = jnp.transpose(wp, (2, 3, 1, 0)).reshape(kh * kw_ * ic_pad, OC_PAD)
        bk = jnp.pad(b, (0, OC_PAD - oc)).reshape(1, OC_PAD).astype(jnp.float32)
        return wk.astype(jnp.bfloat16), bk

    out["conv1_w"], out["conv1_b"] = conv_to_kernel(*tp["conv1"], ic_pad=STATE_FRAMES)
    out["conv2_w"], out["conv2_b"] = conv_to_kernel(*tp["conv2"], ic_pad=OC_PAD)

    # fc1: PyTorch flattens NCHW (c,h,w); our activation is sliced back to its
    # 40 real channels and flattened as (h,w,c) -> permute rows once here.
    # NO channel padding: K stays the real 40*PH2*PW2 (pad only to the K tile).
    w1, b1 = tp["fc1"]
    w1 = w1.reshape(512, C2_OUT, PH2, PW2)
    w1 = jnp.transpose(w1, (2, 3, 1, 0)).reshape(PH2 * PW2 * C2_OUT, 512)
    K = PH2 * PW2 * C2_OUT
    Kp = _fc1_padded_k(K)
    out["fc1_w"] = jnp.pad(w1, ((0, Kp - K), (0, 0))).astype(jnp.bfloat16)
    out["fc1_b"] = b1.reshape(1, 512).astype(jnp.float32)

    def dense_to_kernel(w, b, in_pad, out_pad):
        o, i = w.shape
        wk = jnp.pad(w.T, ((0, in_pad - i), (0, out_pad - o)))
        bk = jnp.pad(b, (0, out_pad - o)).reshape(1, out_pad)
        return wk.astype(jnp.bfloat16), bk.astype(jnp.float32)

    out["fc2_w"], out["fc2_b"] = dense_to_kernel(*tp["fc2"], 512, 128)
    out["fc3_w"], out["fc3_b"] = dense_to_kernel(*tp["fc3"], 128, 128)
    out["fc4_w"], out["fc4_b"] = dense_to_kernel(*tp["fc4"], 128, 128)
    out["fc5_w"], out["fc5_b"] = dense_to_kernel(*tp["fc5"], 128, 128)
    return out


# ----------------------------------------------------------------------------
# Forward pass (mirrors nn.Sequential in SakikoNetwork)
# ----------------------------------------------------------------------------
def sakiko_forward(kp, x_nchw):
    x = jnp.transpose(x_nchw, (0, 2, 3, 1))                     # NCHW -> NHWC once
    h, PH1, PW1 = conv1_relu_pool(x, kp["conv1_w"], kp["conv1_b"])
    h, PH2, PW2 = conv3x3_relu_pool(h, PH1, PW1, kp["conv2_w"], kp["conv2_b"])
    n = h.shape[0]
    # Drop the lane padding before fc1: contract over the 40 real channels only.
    h = h[:, :, :C2_OUT].reshape(n, -1)
    h = gemm_bias(h, kp["fc1_w"], kp["fc1_b"], n_real=512, relu=True,
                  out_dtype=jnp.bfloat16, tm=128,
                  tk=min(FC1_TK, kp["fc1_w"].shape[0]), tn=256)
    return fc_tail(h, kp)                                        # fc2..fc5 fused, f32


if __name__ == "__main__":
    key = jax.random.PRNGKey(0)
    kx, kparam = jax.random.split(key)

    # Small input consistent with the module structure: NCHW, STATE_FRAMES=4.
    N, C, H, W = 2, STATE_FRAMES, 16, 16
    x = jax.random.normal(kx, (N, C, H, W), jnp.float32)

    # Spatial bookkeeping (conv 3x3 valid -> pool 2x2 floor), matches PyTorch.
    H1, W1 = H - 2, W - 2
    P1H, P1W = H1 // 2, W1 // 2
    H2, W2 = P1H - 2, P1W - 2
    P2H, P2W = H2 // 2, W2 // 2
    flat_dim = C2_OUT * P2H * P2W   # original module hardcodes 75920 for full-size input

    torch_params = init_torch_params(kparam, flat_dim)
    params = prepare_params(torch_params, (P2H, P2W))

    fwd = jax.jit(sakiko_forward)
    out = jax.block_until_ready(fwd(params, x))
    assert out.shape == (N, 22), out.shape
    assert out.dtype == jnp.float32
    print("KERNEL_OK")
</pallas_src>

<mosaic_0001>
module attributes {stable_mosaic.version = 11 : i64} {
  func.func @_conv3x3_relu_pool_kernel(%arg0: i32, %arg1: memref<1x49x128xbf16, #tpu.memory_space<vmem>>, %arg2: memref<1152x128xbf16, #tpu.memory_space<vmem>>, %arg3: memref<1x128xf32, #tpu.memory_space<vmem>>, %arg4: memref<1x4x128xbf16, #tpu.memory_space<vmem>>, %arg5: memref<33x128xf32, #tpu.memory_space<vmem>>) attributes {dimension_semantics = [#tpu.dimension_semantics<parallel>], iteration_bounds = array<i64: 2>, scalar_prefetch = 0 : i64, scratch_operands = 1 : i64, tpu.core_type = #tpu.core_type<tc>, window_params = [{transform_indices = @transform_0, window_bounds = array<i64: 1, 49, 128>}, {pipeline_mode = #tpu.pipeline_mode<synchronous>, transform_indices = @transform_1, window_bounds = array<i64: 1152, 128>}, {pipeline_mode = #tpu.pipeline_mode<synchronous>, transform_indices = @transform_2, window_bounds = array<i64: 1, 128>}, {transform_indices = @transform_3, window_bounds = array<i64: 1, 4, 128>}]} {
    %c0 = arith.constant 0 : index
    %c0_0 = arith.constant 0 : index
    %c0_1 = arith.constant 0 : index
    %0 = vector.load %arg1[%c0, %c0_0, %c0_1] : memref<1x49x128xbf16, #tpu.memory_space<vmem>>, vector<1x33x128xbf16>
    %1 = vector.shape_cast %0 : vector<1x33x128xbf16> to vector<33x128xbf16>
    %c0_2 = arith.constant 0 : index
    %c0_3 = arith.constant 0 : index
    %2 = vector.load %arg2[%c0_2, %c0_3] : memref<1152x128xbf16, #tpu.memory_space<vmem>>, vector<128x128xbf16>
    %cst = arith.constant dense<0.000000e+00> : vector<33x128xf32>
    %3 = tpu.matmul %1, %2, %cst {dimension_numbers = #tpu.dot_dimension_numbers<[1], [0], [0], [1], [0, 0, 1, 1], [], []>} : vector<33x128xbf16>, vector<128x128xbf16>, vector<33x128xf32> -> vector<33x128xf32>
    %c0_4 = arith.constant 0 : index
    %c1 = arith.constant 1 : index
    %c0_5 = arith.constant 0 : index
    %4 = vector.load %arg1[%c0_4, %c1, %c0_5] : memref<1x49x128xbf16, #tpu.memory_space<vmem>>, vector<1x33x128xbf16>
    %5 = vector.shape_cast %4 : vector<1x33x128xbf16> to vector<33x128xbf16>
    %c128 = arith.constant 128 : index
    %c0_6 = arith.constant 0 : index
    %6 = vector.load %arg2[%c128, %c0_6] : memref<1152x128xbf16, #tpu.memory_space<vmem>>, vector<128x128xbf16>
    %cst_7 = arith.constant dense<0.000000e+00> : vector<33x128xf32>
    %7 = tpu.matmul %5, %6, %cst_7 {dimension_numbers = #tpu.dot_dimension_numbers<[1], [0], [0], [1], [0, 0, 1, 1], [], []>} : vector<33x128xbf16>, vector<128x128xbf16>, vector<33x128xf32> -> vector<33x128xf32>
    %8 = arith.addf %3, %7 : vector<33x128xf32>
    %c0_8 = arith.constant 0 : index
    %c2 = arith.constant 2 : index
    %c0_9 = arith.constant 0 : index
    %9 = vector.load %arg1[%c0_8, %c2, %c0_9] : memref<1x49x128xbf16, #tpu.memory_space<vmem>>, vector<1x33x128xbf16>
    %10 = vector.shape_cast %9 : vector<1x33x128xbf16> to vector<33x128xbf16>
    %c256 = arith.constant 256 : index
    %c0_10 = arith.constant 0 : index
    %11 = vector.load %arg2[%c256, %c0_10] : memref<1152x128xbf16, #tpu.memory_space<vmem>>, vector<128x128xbf16>
    %cst_11 = arith.constant dense<0.000000e+00> : vector<33x128xf32>
    %12 = tpu.matmul %10, %11, %cst_11 {dimension_numbers = #tpu.dot_dimension_numbers<[1], [0], [0], [1], [0, 0, 1, 1], [], []>} : vector<33x128xbf16>, vector<128x128xbf16>, vector<33x128xf32> -> vector<33x128xf32>
    %13 = arith.addf %8, %12 : vector<33x128xf32>
    %c0_12 = arith.constant 0 : index
    %c7 = arith.constant 7 : index
    %c0_13 = arith.constant 0 : index
    %14 = vector.load %arg1[%c0_12, %c7, %c0_13] : memref<1x49x128xbf16, #tpu.memory_space<vmem>>, vector<1x33x128xbf16>
    %15 = vector.shape_cast %14 : vector<1x33x128xbf16> to vector<33x128xbf16>
    %c384 = arith.constant 384 : index
    %c0_14 = arith.constant 0 : index
    %16 = vector.load %arg2[%c384, %c0_14] : memref<1152x128xbf16, #tpu.memory_space<vmem>>, vector<128x128xbf16>
    %cst_15 = arith.constant dense<0.000000e+00> : vector<33x128xf32>
    %17 = tpu.matmul %15, %16, %cst_15 {dimension_numbers = #tpu.dot_dimension_numbers<[1], [0], [0], [1], [0, 0, 1, 1], [], []>} : vector<33x128xbf16>, vector<128x128xbf16>, vector<33x128xf32> -> vector<33x128xf32>
    %18 = arith.addf %13, %17 : vector<33x128xf32>
    %c0_16 = arith.constant 0 : index
    %c8 = arith.constant 8 : index
    %c0_17 = arith.constant 0 : index
    %19 = vector.load %arg1[%c0_16, %c8, %c0_17] : memref<1x49x128xbf16, #tpu.memory_space<vmem>>, vector<1x33x128xbf16>
    %20 = vector.shape_cast %19 : vector<1x33x128xbf16> to vector<33x128xbf16>
    %c512 = arith.constant 512 : index
    %c0_18 = arith.constant 0 : index
    %21 = vector.load %arg2[%c512, %c0_18] : memref<1152x128xbf16, #tpu.memory_space<vmem>>, vector<128x128xbf16>
    %cst_19 = arith.constant dense<0.000000e+00> : vector<33x128xf32>
    %22 = tpu.matmul %20, %21, %cst_19 {dimension_numbers = #tpu.dot_dimension_numbers<[1], [0], [0], [1], [0, 0, 1, 1], [], []>} : vector<33x128xbf16>, vector<128x128xbf16>, vector<33x128xf32> -> vector<33x128xf32>
    %23 = arith.addf %18, %22 : vector<33x128xf32>
    %c0_20 = arith.constant 0 : index
    %c9 = arith.constant 9 : index
    %c0_21 = arith.constant 0 : index
    %24 = vector.load %arg1[%c0_20, %c9, %c0_21] : memref<1x49x128xbf16, #tpu.memory_space<vmem>>, vector<1x33x128xbf16>
    %25 = vector.shape_cast %24 : vector<1x33x128xbf16> to vector<33x128xbf16>
    %c640 = arith.constant 640 : index
    %c0_22 = arith.constant 0 : index
    %26 = vector.load %arg2[%c640, %c0_22] : memref<1152x128xbf16, #tpu.memory_space<vmem>>, vector<128x128xbf16>
    %cst_23 = arith.constant dense<0.000000e+00> : vector<33x128xf32>
    %27 = tpu.matmul %25, %26, %cst_23 {dimension_numbers = #tpu.dot_dimension_numbers<[1], [0], [0], [1], [0, 0, 1, 1], [], []>} : vector<33x128xbf16>, vector<128x128xbf16>, vector<33x128xf32> -> vector<33x128xf32>
    %28 = arith.addf %23, %27 : vector<33x128xf32>
    %c0_24 = arith.constant 0 : index
    %c14 = arith.constant 14 : index
    %c0_25 = arith.constant 0 : index
    %29 = vector.load %arg1[%c0_24, %c14, %c0_25] : memref<1x49x128xbf16, #tpu.memory_space<vmem>>, vector<1x33x128xbf16>
    %30 = vector.shape_cast %29 : vector<1x33x128xbf16> to vector<33x128xbf16>
    %c768 = arith.constant 768 : index
    %c0_26 = arith.constant 0 : index
    %31 = vector.load %arg2[%c768, %c0_26] : memref<1152x128xbf16, #tpu.memory_space<vmem>>, vector<128x128xbf16>
    %cst_27 = arith.constant dense<0.000000e+00> : vector<33x128xf32>
    %32 = tpu.matmul %30, %31, %cst_27 {dimension_numbers = #tpu.dot_dimension_numbers<[1], [0], [0], [1], [0, 0, 1, 1], [], []>} : vector<33x128xbf16>, vector<128x128xbf16>, vector<33x128xf32> -> vector<33x128xf32>
    %33 = arith.addf %28, %32 : vector<33x128xf32>
    %c0_28 = arith.constant 0 : index
    %c15 = arith.constant 15 : index
    %c0_29 = arith.constant 0 : index
    %34 = vector.load %arg1[%c0_28, %c15, %c0_29] : memref<1x49x128xbf16, #tpu.memory_space<vmem>>, vector<1x33x128xbf16>
    %35 = vector.shape_cast %34 : vector<1x33x128xbf16> to vector<33x128xbf16>
    %c896 = arith.constant 896 : index
    %c0_30 = arith.constant 0 : index
    %36 = vector.load %arg2[%c896, %c0_30] : memref<1152x128xbf16, #tpu.memory_space<vmem>>, vector<128x128xbf16>
    %cst_31 = arith.constant dense<0.000000e+00> : vector<33x128xf32>
    %37 = tpu.matmul %35, %36, %cst_31 {dimension_numbers = #tpu.dot_dimension_numbers<[1], [0], [0], [1], [0, 0, 1, 1], [], []>} : vector<33x128xbf16>, vector<128x128xbf16>, vector<33x128xf32> -> vector<33x128xf32>
    %38 = arith.addf %33, %37 : vector<33x128xf32>
    %c0_32 = arith.constant 0 : index
    %c16 = arith.constant 16 : index
    %c0_33 = arith.constant 0 : index
    %39 = vector.load %arg1[%c0_32, %c16, %c0_33] : memref<1x49x128xbf16, #tpu.memory_space<vmem>>, vector<1x33x128xbf16>
    %40 = vector.shape_cast %39 : vector<1x33x128xbf16> to vector<33x128xbf16>
    %c1024 = arith.constant 1024 : index
    %c0_34 = arith.constant 0 : index
    %41 = vector.load %arg2[%c1024, %c0_34] : memref<1152x128xbf16, #tpu.memory_space<vmem>>, vector<128x128xbf16>
    %cst_35 = arith.constant dense<0.000000e+00> : vector<33x128xf32>
    %42 = tpu.matmul %40, %41, %cst_35 {dimension_numbers = #tpu.dot_dimension_numbers<[1], [0], [0], [1], [0, 0, 1, 1], [], []>} : vector<33x128xbf16>, vector<128x128xbf16>, vector<33x128xf32> -> vector<33x128xf32>
    %43 = arith.addf %38, %42 : vector<33x128xf32>
    %c0_36 = arith.constant 0 : index
    %c0_37 = arith.constant 0 : index
    %44 = vector.load %arg3[%c0_36, %c0_37] : memref<1x128xf32, #tpu.memory_space<vmem>>, vector<1x128xf32>
    %45 = vector.broadcast %44 : vector<1x128xf32> to vector<33x128xf32>
    %46 = arith.addf %43, %45 : vector<33x128xf32>
    %cst_38 = arith.constant 0.000000e+00 : f32
    %47 = vector.broadcast %cst_38 : f32 to vector<33x128xf32>
    %48 = arith.maximumf %46, %47 : vector<33x128xf32>
    %c0_39 = arith.constant 0 : index
    %c0_40 = arith.constant 0 : index
    %49 = vector.load %arg5[%c0_39, %c0_40] : memref<33x128xf32, #tpu.memory_space<vmem>>, vector<33x128xf32>
    tpu.vector_store %arg5[%c0_39, %c0_40], %48 {strides = array<i32>} : memref<33x128xf32, #tpu.memory_space<vmem>>, vector<33x128xf32>,
    %c0_41 = arith.constant 0 : index
    %c0_42 = arith.constant 0 : index
    %50 = tpu.strided_load %arg5[%c0_41, %c0_42] {strides = array<i32: 2, 1>} : memref<33x128xf32, #tpu.memory_space<vmem>>, vector<2x128xf32>
    %c1_43 = arith.constant 1 : index
    %c0_44 = arith.constant 0 : index
    %51 = tpu.strided_load %arg5[%c1_43, %c0_44] {strides = array<i32: 2, 1>} : memref<33x128xf32, #tpu.memory_space<vmem>>, vector<2x128xf32>
    %52 = arith.maximumf %50, %51 : vector<2x128xf32>
    %c7_45 = arith.constant 7 : index
    %c0_46 = arith.constant 0 : index
    %53 = tpu.strided_load %arg5[%c7_45, %c0_46] {strides = array<i32: 2, 1>} : memref<33x128xf32, #tpu.memory_space<vmem>>, vector<2x128xf32>
    %c8_47 = arith.constant 8 : index
    %c0_48 = arith.constant 0 : index
    %54 = tpu.strided_load %arg5[%c8_47, %c0_48] {strides = array<i32: 2, 1>} : memref<33x128xf32, #tpu.memory_space<vmem>>, vector<2x128xf32>
    %55 = arith.maximumf %53, %54 : vector<2x128xf32>
    %56 = arith.maximumf %52, %55 : vector<2x128xf32>
    %c14_49 = arith.constant 14 : index
    %c0_50 = arith.constant 0 : index
    %57 = tpu.strided_load %arg5[%c14_49, %c0_50] {strides = array<i32: 2, 1>} : memref<33x128xf32, #tpu.memory_space<vmem>>, vector<2x128xf32>
    %c15_51 = arith.constant 15 : index
    %c0_52 = arith.constant 0 : index
    %58 = tpu.strided_load %arg5[%c15_51, %c0_52] {strides = array<i32: 2, 1>} : memref<33x128xf32, #tpu.memory_space<vmem>>, vector<2x128xf32>
    %59 = arith.maximumf %57, %58 : vector<2x128xf32>
    %c21 = arith.constant 21 : index
    %c0_53 = arith.constant 0 : index
    %60 = tpu.strided_load %arg5[%c21, %c0_53] {strides = array<i32: 2, 1>} : memref<33x128xf32, #tpu.memory_space<vmem>>, vector<2x128xf32>
    %c22 = arith.constant 22 : index
    %c0_54 = arith.constant 0 : index
    %61 = tpu.strided_load %arg5[%c22, %c0_54] {strides = array<i32: 2, 1>} : memref<33x128xf32, #tpu.memory_space<vmem>>, vector<2x128xf32>
    %62 = arith.maximumf %60, %61 : vector<2x128xf32>
    %63 = arith.maximumf %59, %62 : vector<2x128xf32>
    %64 = tpu.concatenate %56, %63 in 0 : vector<2x128xf32>, vector<2x128xf32> -> vector<4x128xf32>
    %65 = arith.truncf %64 : vector<4x128xf32> to vector<4x128xbf16>
    %c0_55 = arith.constant 0 : index
    %c0_56 = arith.constant 0 : index
    %c0_57 = arith.constant 0 : index
    %66 = vector.load %arg4[%c0_55, %c0_56, %c0_57] : memref<1x4x128xbf16, #tpu.memory_space<vmem>>, vector<1x4x128xbf16>
    %67 = vector.shape_cast %66 : vector<1x4x128xbf16> to vector<4x128xbf16>
    %68 = vector.shape_cast %65 : vector<4x128xbf16> to vector<1x4x128xbf16>
    tpu.vector_store %arg4[%c0_55, %c0_56, %c0_57], %68 {strides = array<i32>} : memref<1x4x128xbf16, #tpu.memory_space<vmem>>, vector<1x4x128xbf16>,
    return
  }
  func.func @transform_0(%arg0: i32) -> (i32, i32, i32) {
    %c0_i32 = arith.constant 0 : i32
    %c0_i32_0 = arith.constant 0 : i32
    %c0_i32_1 = arith.constant 0 : i32
    return %arg0, %c0_i32, %c0_i32_0 : i32, i32, i32
  }
  func.func @transform_1(%arg0: i32) -> (i32, i32) {
    %c0_i32 = arith.constant 0 : i32
    %c0_i32_0 = arith.constant 0 : i32
    %c0_i32_1 = arith.constant 0 : i32
    return %c0_i32, %c0_i32_0 : i32, i32
  }
  func.func @transform_2(%arg0: i32) -> (i32, i32) {
    %c0_i32 = arith.constant 0 : i32
    %c0_i32_0 = arith.constant 0 : i32
    %c0_i32_1 = arith.constant 0 : i32
    return %c0_i32, %c0_i32_0 : i32, i32
  }
  func.func @transform_3(%arg0: i32) -> (i32, i32, i32) {
    %c0_i32 = arith.constant 0 : i32
    %c0_i32_0 = arith.constant 0 : i32
    %c0_i32_1 = arith.constant 0 : i32
    return %arg0, %c0_i32, %c0_i32_0 : i32, i32, i32
  }
}

module attributes {stable_mosaic.version = 11 : i64} {
  func.func @_conv1_gemm_relu_pool_kernel(%arg0: i32, %arg1: memref<1x196x36xbf16, #tpu.memory_space<vmem>>, %arg2: memref<36x128xbf16, #tpu.memory_space<vmem>>, %arg3: memref<1x128xf32, #tpu.memory_space<vmem>>, %arg4: memref<1x49x128xbf16, #tpu.memory_space<vmem>>, %arg5: memref<196x128xf32, #tpu.memory_space<vmem>>) attributes {dimension_semantics = [#tpu.dimension_semantics<parallel>], iteration_bounds = array<i64: 2>, scalar_prefetch = 0 : i64, scratch_operands = 1 : i64, tpu.core_type = #tpu.core_type<tc>, window_params = [{transform_indices = @transform_0, window_bounds = array<i64: 1, 196, 36>}, {pipeline_mode = #tpu.pipeline_mode<synchronous>, transform_indices = @transform_1, window_bounds = array<i64: 36, 128>}, {pipeline_mode = #tpu.pipeline_mode<synchronous>, transform_indices = @transform_2, window_bounds = array<i64: 1, 128>}, {transform_indices = @transform_3, window_bounds = array<i64: 1, 49, 128>}]} {
    %c0 = arith.constant 0 : index
    %c0_0 = arith.constant 0 : index
    %c0_1 = arith.constant 0 : index
    %0 = vector.load %arg1[%c0, %c0_0, %c0_1] : memref<1x196x36xbf16, #tpu.memory_space<vmem>>, vector<1x196x36xbf16>
    %1 = vector.shape_cast %0 : vector<1x196x36xbf16> to vector<196x36xbf16>
    %c0_2 = arith.constant 0 : index
    %c0_3 = arith.constant 0 : index
    %2 = vector.load %arg2[%c0_2, %c0_3] : memref<36x128xbf16, #tpu.memory_space<vmem>>, vector<36x128xbf16>
    %cst = arith.constant dense<0.000000e+00> : vector<196x128xf32>
    %3 = tpu.matmul %1, %2, %cst {dimension_numbers = #tpu.dot_dimension_numbers<[1], [0], [0], [1], [0, 0, 1, 1], [], []>} : vector<196x36xbf16>, vector<36x128xbf16>, vector<196x128xf32> -> vector<196x128xf32>
    %c0_4 = arith.constant 0 : index
    %c0_5 = arith.constant 0 : index
    %4 = vector.load %arg3[%c0_4, %c0_5] : memref<1x128xf32, #tpu.memory_space<vmem>>, vector<1x128xf32>
    %5 = vector.broadcast %4 : vector<1x128xf32> to vector<196x128xf32>
    %6 = arith.addf %3, %5 : vector<196x128xf32>
    %cst_6 = arith.constant 0.000000e+00 : f32
    %7 = vector.broadcast %cst_6 : f32 to vector<196x128xf32>
    %8 = arith.maximumf %6, %7 : vector<196x128xf32>
    %c0_7 = arith.constant 0 : index
    %c0_8 = arith.constant 0 : index
    %9 = vector.load %arg5[%c0_7, %c0_8] : memref<196x128xf32, #tpu.memory_space<vmem>>, vector<196x128xf32>
    tpu.vector_store %arg5[%c0_7, %c0_8], %8 {strides = array<i32>} : memref<196x128xf32, #tpu.memory_space<vmem>>, vector<196x128xf32>,
    %c0_9 = arith.constant 0 : index
    %c0_10 = arith.constant 0 : index
    %10 = tpu.strided_load %arg5[%c0_9, %c0_10] {strides = array<i32: 2, 1>} : memref<196x128xf32, #tpu.memory_space<vmem>>, vector<7x128xf32>
    %c1 = arith.constant 1 : index
    %c0_11 = arith.constant 0 : index
    %11 = tpu.strided_load %arg5[%c1, %c0_11] {strides = array<i32: 2, 1>} : memref<196x128xf32, #tpu.memory_space<vmem>>, vector<7x128xf32>
    %12 = arith.maximumf %10, %11 : vector<7x128xf32>
    %c14 = arith.constant 14 : index
    %c0_12 = arith.constant 0 : index
    %13 = tpu.strided_load %arg5[%c14, %c0_12] {strides = array<i32: 2, 1>} : memref<196x128xf32, #tpu.memory_space<vmem>>, vector<7x128xf32>
    %c15 = arith.constant 15 : index
    %c0_13 = arith.constant 0 : index
    %14 = tpu.strided_load %arg5[%c15, %c0_13] {strides = array<i32: 2, 1>} : memref<196x128xf32, #tpu.memory_space<vmem>>, vector<7x128xf32>
    %15 = arith.maximumf %13, %14 : vector<7x128xf32>
    %16 = arith.maximumf %12, %15 : vector<7x128xf32>
    %c28 = arith.constant 28 : index
    %c0_14 = arith.constant 0 : index
    %17 = tpu.strided_load %arg5[%c28, %c0_14] {strides = array<i32: 2, 1>} : memref<196x128xf32, #tpu.memory_space<vmem>>, vector<7x128xf32>
    %c29 = arith.constant 29 : index
    %c0_15 = arith.constant 0 : index
    %18 = tpu.strided_load %arg5[%c29, %c0_15] {strides = array<i32: 2, 1>} : memref<196x128xf32, #tpu.memory_space<vmem>>, vector<7x128xf32>
    %19 = arith.maximumf %17, %18 : vector<7x128xf32>
    %c42 = arith.constant 42 : index
    %c0_16 = arith.constant 0 : index
    %20 = tpu.strided_load %arg5[%c42, %c0_16] {strides = array<i32: 2, 1>} : memref<196x128xf32, #tpu.memory_space<vmem>>, vector<7x128xf32>
    %c43 = arith.constant 43 : index
    %c0_17 = arith.constant 0 : index
    %21 = tpu.strided_load %arg5[%c43, %c0_17] {strides = array<i32: 2, 1>} : memref<196x128xf32, #tpu.memory_space<vmem>>, vector<7x128xf32>
    %22 = arith.maximumf %20, %21 : vector<7x128xf32>
    %23 = arith.maximumf %19, %22 : vector<7x128xf32>
    %c56 = arith.constant 56 : index
    %c0_18 = arith.constant 0 : index
    %24 = tpu.strided_load %arg5[%c56, %c0_18] {strides = array<i32: 2, 1>} : memref<196x128xf32, #tpu.memory_space<vmem>>, vector<7x128xf32>
    %c57 = arith.constant 57 : index
    %c0_19 = arith.constant 0 : index
    %25 = tpu.strided_load %arg5[%c57, %c0_19] {strides = array<i32: 2, 1>} : memref<196x128xf32, #tpu.memory_space<vmem>>, vector<7x128xf32>
    %26 = arith.maximumf %24, %25 : vector<7x128xf32>
    %c70 = arith.constant 70 : index
    %c0_20 = arith.constant 0 : index
    %27 = tpu.strided_load %arg5[%c70, %c0_20] {strides = array<i32: 2, 1>} : memref<196x128xf32, #tpu.memory_space<vmem>>, vector<7x128xf32>
    %c71 = arith.constant 71 : index
    %c0_21 = arith.constant 0 : index
    %28 = tpu.strided_load %arg5[%c71, %c0_21] {strides = array<i32: 2, 1>} : memref<196x128xf32, #tpu.memory_space<vmem>>, vector<7x128xf32>
    %29 = arith.maximumf %27, %28 : vector<7x128xf32>
    %30 = arith.maximumf %26, %29 : vector<7x128xf32>
    %c84 = arith.constant 84 : index
    %c0_22 = arith.constant 0 : index
    %31 = tpu.strided_load %arg5[%c84, %c0_22] {strides = array<i32: 2, 1>} : memref<196x128xf32, #tpu.memory_space<vmem>>, vector<7x128xf32>
    %c85 = arith.constant 85 : index
    %c0_23 = arith.constant 0 : index
    %32 = tpu.strided_load %arg5[%c85, %c0_23] {strides = array<i32: 2, 1>} : memref<196x128xf32, #tpu.memory_space<vmem>>, vector<7x128xf32>
    %33 = arith.maximumf %31, %32 : vector<7x128xf32>
    %c98 = arith.constant 98 : index
    %c0_24 = arith.constant 0 : index
    %34 = tpu.strided_load %arg5[%c98, %c0_24] {strides = array<i32: 2, 1>} : memref<196x128xf32, #tpu.memory_space<vmem>>, vector<7x128xf32>
    %c99 = arith.constant 99 : index
    %c0_25 = arith.constant 0 : index
    %35 = tpu.strided_load %arg5[%c99, %c0_25] {strides = array<i32: 2, 1>} : memref<196x128xf32, #tpu.memory_space<vmem>>, vector<7x128xf32>
    %36 = arith.maximumf %34, %35 : vector<7x128xf32>
    %37 = arith.maximumf %33, %36 : vector<7x128xf32>
    %c112 = arith.constant 112 : index
    %c0_26 = arith.constant 0 : index
    %38 = tpu.strided_load %arg5[%c112, %c0_26] {strides = array<i32: 2, 1>} : memref<196x128xf32, #tpu.memory_space<vmem>>, vector<7x128xf32>
    %c113 = arith.constant 113 : index
    %c0_27 = arith.constant 0 : index
    %39 = tpu.strided_load %arg5[%c113, %c0_27] {strides = array<i32: 2, 1>} : memref<196x128xf32, #tpu.memory_space<vmem>>, vector<7x128xf32>
    %40 = arith.maximumf %38, %39 : vector<7x128xf32>
    %c126 = arith.constant 126 : index
    %c0_28 = arith.constant 0 : index
    %41 = tpu.strided_load %arg5[%c126, %c0_28] {strides = array<i32: 2, 1>} : memref<196x128xf32, #tpu.memory_space<vmem>>, vector<7x128xf32>
    %c127 = arith.constant 127 : index
    %c0_29 = arith.constant 0 : index
    %42 = tpu.strided_load %arg5[%c127, %c0_29] {strides = array<i32: 2, 1>} : memref<196x128xf32, #tpu.memory_space<vmem>>, vector<7x128xf32>
    %43 = arith.maximumf %41, %42 : vector<7x128xf32>
    %44 = arith.maximumf %40, %43 : vector<7x128xf32>
    %c140 = arith.constant 140 : index
    %c0_30 = arith.constant 0 : index
    %45 = tpu.strided_load %arg5[%c140, %c0_30] {strides = array<i32: 2, 1>} : memref<196x128xf32, #tpu.memory_space<vmem>>, vector<7x128xf32>
    %c141 = arith.constant 141 : index
    %c0_31 = arith.constant 0 : index
    %46 = tpu.strided_load %arg5[%c141, %c0_31] {strides = array<i32: 2, 1>} : memref<196x128xf32, #tpu.memory_space<vmem>>, vector<7x128xf32>
    %47 = arith.maximumf %45, %46 : vector<7x128xf32>
    %c154 = arith.constant 154 : index
    %c0_32 = arith.constant 0 : index
    %48 = tpu.strided_load %arg5[%c154, %c0_32] {strides = array<i32: 2, 1>} : memref<196x128xf32, #tpu.memory_space<vmem>>, vector<7x128xf32>
    %c155 = arith.constant 155 : index
    %c0_33 = arith.constant 0 : index
    %49 = tpu.strided_load %arg5[%c155, %c0_33] {strides = array<i32: 2, 1>} : memref<196x128xf32, #tpu.memory_space<vmem>>, vector<7x128xf32>
    %50 = arith.maximumf %48, %49 : vector<7x128xf32>
    %51 = arith.maximumf %47, %50 : vector<7x128xf32>
    %c168 = arith.constant 168 : index
    %c0_34 = arith.constant 0 : index
    %52 = tpu.strided_load %arg5[%c168, %c0_34] {strides = array<i32: 2, 1>} : memref<196x128xf32, #tpu.memory_space<vmem>>, vector<7x128xf32>
    %c169 = arith.constant 169 : index
    %c0_35 = arith.constant 0 : index
    %53 = tpu.strided_load %arg5[%c169, %c0_35] {strides = array<i32: 2, 1>} : memref<196x128xf32, #tpu.memory_space<vmem>>, vector<7x128xf32>
    %54 = arith.maximumf %52, %53 : vector<7x128xf32>
    %c182 = arith.constant 182 : index
    %c0_36 = arith.constant 0 : index
    %55 = tpu.strided_load %arg5[%c182, %c0_36] {strides = array<i32: 2, 1>} : memref<196x128xf32, #tpu.memory_space<vmem>>, vector<7x128xf32>
    %c183 = arith.constant 183 : index
    %c0_37 = arith.constant 0 : index
    %56 = tpu.strided_load %arg5[%c183, %c0_37] {strides = array<i32: 2, 1>} : memref<196x128xf32, #tpu.memory_space<vmem>>, vector<7x128xf32>
    %57 = arith.maximumf %55, %56 : vector<7x128xf32>
    %58 = arith.maximumf %54, %57 : vector<7x128xf32>
    %59 = tpu.concatenate %16, %23, %30, %37, %44, %51, %58 in 0 : vector<7x128xf32>, vector<7x128xf32>, vector<7x128xf32>, vector<7x128xf32>, vector<7x128xf32>, vector<7x128xf32>, vector<7x128xf32> -> vector<49x128xf32>
    %60 = arith.truncf %59 : vector<49x128xf32> to vector<49x128xbf16>
    %c0_38 = arith.constant 0 : index
    %c0_39 = arith.constant 0 : index
    %c0_40 = arith.constant 0 : index
    %61 = vector.load %arg4[%c0_38, %c0_39, %c0_40] : memref<1x49x128xbf16, #tpu.memory_space<vmem>>, vector<1x49x128xbf16>
    %62 = vector.shape_cast %61 : vector<1x49x128xbf16> to vector<49x128xbf16>
    %63 = vector.shape_cast %60 : vector<49x128xbf16> to vector<1x49x128xbf16>
    tpu.vector_store %arg4[%c0_38, %c0_39, %c0_40], %63 {strides = array<i32>} : memref<1x49x128xbf16, #tpu.memory_space<vmem>>, vector<1x49x128xbf16>,
    return
  }
  func.func @transform_0(%arg0: i32) -> (i32, i32, i32) {
    %c0_i32 = arith.constant 0 : i32
    %c0_i32_0 = arith.constant 0 : i32
    %c0_i32_1 = arith.constant 0 : i32
    return %arg0, %c0_i32, %c0_i32_0 : i32, i32, i32
  }
  func.func @transform_1(%arg0: i32) -> (i32, i32) {
    %c0_i32 = arith.constant 0 : i32
    %c0_i32_0 = arith.constant 0 : i32
    %c0_i32_1 = arith.constant 0 : i32
    return %c0_i32, %c0_i32_0 : i32, i32
  }
  func.func @transform_2(%arg0: i32) -> (i32, i32) {
    %c0_i32 = arith.constant 0 : i32
    %c0_i32_0 = arith.constant 0 : i32
    %c0_i32_1 = arith.constant 0 : i32
    return %c0_i32, %c0_i32_0 : i32, i32
  }
  func.func @transform_3(%arg0: i32) -> (i32, i32, i32) {
    %c0_i32 = arith.constant 0 : i32
    %c0_i32_0 = arith.constant 0 : i32
    %c0_i32_1 = arith.constant 0 : i32
    return %arg0, %c0_i32, %c0_i32_0 : i32, i32, i32
  }
}

module attributes {stable_mosaic.version = 11 : i64} {
  func.func @_gemm_bias_kernel(%arg0: i32, %arg1: i32, %arg2: i32, %arg3: memref<128x256xbf16, #tpu.memory_space<vmem>>, %arg4: memref<256x256xbf16, #tpu.memory_space<vmem>>, %arg5: memref<1x256xf32, #tpu.memory_space<vmem>>, %arg6: memref<128x256xbf16, #tpu.memory_space<vmem>>, %arg7: memref<128x256xf32, #tpu.memory_space<vmem>>) attributes {dimension_semantics = [#tpu.dimension_semantics<parallel>, #tpu.dimension_semantics<parallel>, #tpu.dimension_semantics<arbitrary>], iteration_bounds = array<i64: 1, 2, 1>, scalar_prefetch = 0 : i64, scratch_operands = 1 : i64, tpu.core_type = #tpu.core_type<tc>, window_params = [{transform_indices = @transform_0, window_bounds = array<i64: 128, 256>}, {transform_indices = @transform_1, window_bounds = array<i64: 256, 256>}, {transform_indices = @transform_2, window_bounds = array<i64: 1, 256>}, {transform_indices = @transform_3, window_bounds = array<i64: 128, 256>}]} {
    %c0_i32 = arith.constant 0 : i32
    %0 = arith.cmpi eq, %arg2, %c0_i32 : i32
    %1 = arith.extui %0 : i1 to i32
    %c0_i32_0 = arith.constant 0 : i32
    %2 = arith.cmpi ne, %1, %c0_i32_0 : i32
    scf.if %2 {
      %cst_10 = arith.constant 0.000000e+00 : f32
      %12 = vector.broadcast %cst_10 : f32 to vector<128x256xf32>
      %c0_11 = arith.constant 0 : index
      %c0_12 = arith.constant 0 : index
      %13 = vector.load %arg7[%c0_11, %c0_12] : memref<128x256xf32, #tpu.memory_space<vmem>>, vector<128x256xf32>
      tpu.vector_store %arg7[%c0_11, %c0_12], %12 {strides = array<i32>} : memref<128x256xf32, #tpu.memory_space<vmem>>, vector<128x256xf32>,
    } else {
    }
    %c0 = arith.constant 0 : index
    %c0_1 = arith.constant 0 : index
    %3 = vector.load %arg7[%c0, %c0_1] : memref<128x256xf32, #tpu.memory_space<vmem>>, vector<128x256xf32>
    %c0_2 = arith.constant 0 : index
    %c0_3 = arith.constant 0 : index
    %4 = vector.load %arg3[%c0_2, %c0_3] : memref<128x256xbf16, #tpu.memory_space<vmem>>, vector<128x256xbf16>
    %c0_4 = arith.constant 0 : index
    %c0_5 = arith.constant 0 : index
    %5 = vector.load %arg4[%c0_4, %c0_5] : memref<256x256xbf16, #tpu.memory_space<vmem>>, vector<256x256xbf16>
    %cst = arith.constant dense<0.000000e+00> : vector<128x256xf32>
    %6 = tpu.matmul %4, %5, %cst {dimension_numbers = #tpu.dot_dimension_numbers<[1], [0], [0], [1], [0, 0, 1, 1], [], []>} : vector<128x256xbf16>, vector<256x256xbf16>, vector<128x256xf32> -> vector<128x256xf32>
    %7 = arith.addf %3, %6 : vector<128x256xf32>
    %c0_6 = arith.constant 0 : index
    %c0_7 = arith.constant 0 : index
    %8 = vector.load %arg7[%c0_6, %c0_7] : memref<128x256xf32, #tpu.memory_space<vmem>>, vector<128x256xf32>
    tpu.vector_store %arg7[%c0_6, %c0_7], %7 {strides = array<i32>} : memref<128x256xf32, #tpu.memory_space<vmem>>, vector<128x256xf32>,
    %c0_i32_8 = arith.constant 0 : i32
    %9 = arith.cmpi eq, %arg2, %c0_i32_8 : i32
    %10 = arith.extui %9 : i1 to i32
    %c0_i32_9 = arith.constant 0 : i32
    %11 = arith.cmpi ne, %10, %c0_i32_9 : i32
    scf.if %11 {
      %c0_10 = arith.constant 0 : index
      %c0_11 = arith.constant 0 : index
      %12 = vector.load %arg7[%c0_10, %c0_11] : memref<128x256xf32, #tpu.memory_space<vmem>>, vector<128x256xf32>
      %c0_12 = arith.constant 0 : index
      %c0_13 = arith.constant 0 : index
      %13 = vector.load %arg5[%c0_12, %c0_13] : memref<1x256xf32, #tpu.memory_space<vmem>>, vector<1x256xf32>
      %14 = vector.broadcast %13 : vector<1x256xf32> to vector<128x256xf32>
      %15 = arith.addf %12, %14 : vector<128x256xf32>
      %cst_14 = arith.constant 0.000000e+00 : f32
      %16 = vector.broadcast %cst_14 : f32 to vector<128x256xf32>
      %17 = arith.maximumf %15, %16 : vector<128x256xf32>
      %18 = arith.truncf %17 : vector<128x256xf32> to vector<128x256xbf16>
      %c0_15 = arith.constant 0 : index
      %c0_16 = arith.constant 0 : index
      %19 = vector.load %arg6[%c0_15, %c0_16] : memref<128x256xbf16, #tpu.memory_space<vmem>>, vector<128x256xbf16>
      tpu.vector_store %arg6[%c0_15, %c0_16], %18 {strides = array<i32>} : memref<128x256xbf16, #tpu.memory_space<vmem>>, vector<128x256xbf16>,
    } else {
    }
    return
  }
  func.func @transform_0(%arg0: i32, %arg1: i32, %arg2: i32) -> (i32, i32) {
    %c0_i32 = arith.constant 0 : i32
    return %arg0, %arg2 : i32, i32
  }
  func.func @transform_1(%arg0: i32, %arg1: i32, %arg2: i32) -> (i32, i32) {
    %c0_i32 = arith.constant 0 : i32
    return %arg2, %arg1 : i32, i32
  }
  func.func @transform_2(%arg0: i32, %arg1: i32, %arg2: i32) -> (i32, i32) {
    %c0_i32 = arith.constant 0 : i32
    %c0_i32_0 = arith.constant 0 : i32
    return %c0_i32, %arg1 : i32, i32
  }
  func.func @transform_3(%arg0: i32, %arg1: i32, %arg2: i32) -> (i32, i32) {
    %c0_i32 = arith.constant 0 : i32
    return %arg0, %arg1 : i32, i32
  }
}

module attributes {stable_mosaic.version = 11 : i64} {
  func.func @_fc_tail_kernel(%arg0: i32, %arg1: memref<128x512xbf16, #tpu.memory_space<vmem>>, %arg2: memref<512x128xbf16, #tpu.memory_space<vmem>>, %arg3: memref<1x128xf32, #tpu.memory_space<vmem>>, %arg4: memref<128x128xbf16, #tpu.memory_space<vmem>>, %arg5: memref<1x128xf32, #tpu.memory_space<vmem>>, %arg6: memref<128x128xbf16, #tpu.memory_space<vmem>>, %arg7: memref<1x128xf32, #tpu.memory_space<vmem>>, %arg8: memref<128x128xbf16, #tpu.memory_space<vmem>>, %arg9: memref<1x128xf32, #tpu.memory_space<vmem>>, %arg10: memref<128x128xf32, #tpu.memory_space<vmem>>) attributes {dimension_semantics = [#tpu.dimension_semantics<parallel>], iteration_bounds = array<i64: 1>, scalar_prefetch = 0 : i64, scratch_operands = 0 : i64, tpu.core_type = #tpu.core_type<tc>, window_params = [{transform_indices = @transform_0, window_bounds = array<i64: 128, 512>}, {pipeline_mode = #tpu.pipeline_mode<synchronous>, transform_indices = @transform_1, window_bounds = array<i64: 512, 128>}, {pipeline_mode = #tpu.pipeline_mode<synchronous>, transform_indices = @transform_2, window_bounds = array<i64: 1, 128>}, {pipeline_mode = #tpu.pipeline_mode<synchronous>, transform_indices = @transform_3, window_bounds = array<i64: 128, 128>}, {pipeline_mode = #tpu.pipeline_mode<synchronous>, transform_indices = @transform_4, window_bounds = array<i64: 1, 128>}, {pipeline_mode = #tpu.pipeline_mode<synchronous>, transform_indices = @transform_5, window_bounds = array<i64: 128, 128>}, {pipeline_mode = #tpu.pipeline_mode<synchronous>, transform_indices = @transform_6, window_bounds = array<i64: 1, 128>}, {pipeline_mode = #tpu.pipeline_mode<synchronous>, transform_indices = @transform_7, window_bounds = array<i64: 128, 128>}, {pipeline_mode = #tpu.pipeline_mode<synchronous>, transform_indices = @transform_8, window_bounds = array<i64: 1, 128>}, {transform_indices = @transform_9, window_bounds = array<i64: 128, 128>}]} {
    %c0 = arith.constant 0 : index
    %c0_0 = arith.constant 0 : index
    %0 = vector.load %arg1[%c0, %c0_0] : memref<128x512xbf16, #tpu.memory_space<vmem>>, vector<128x512xbf16>
    %c0_1 = arith.constant 0 : index
    %c0_2 = arith.constant 0 : index
    %1 = vector.load %arg2[%c0_1, %c0_2] : memref<512x128xbf16, #tpu.memory_space<vmem>>, vector<512x128xbf16>
    %cst = arith.constant dense<0.000000e+00> : vector<128x128xf32>
    %2 = tpu.matmul %0, %1, %cst {dimension_numbers = #tpu.dot_dimension_numbers<[1], [0], [0], [1], [0, 0, 1, 1], [], []>} : vector<128x512xbf16>, vector<512x128xbf16>, vector<128x128xf32> -> vector<128x128xf32>
    %c0_3 = arith.constant 0 : index
    %c0_4 = arith.constant 0 : index
    %3 = vector.load %arg3[%c0_3, %c0_4] : memref<1x128xf32, #tpu.memory_space<vmem>>, vector<1x128xf32>
    %4 = vector.broadcast %3 : vector<1x128xf32> to vector<128x128xf32>
    %5 = arith.addf %2, %4 : vector<128x128xf32>
    %cst_5 = arith.constant 0.000000e+00 : f32
    %6 = vector.broadcast %cst_5 : f32 to vector<128x128xf32>
    %7 = arith.maximumf %5, %6 : vector<128x128xf32>
    %8 = arith.truncf %7 : vector<128x128xf32> to vector<128x128xbf16>
    %c0_6 = arith.constant 0 : index
    %c0_7 = arith.constant 0 : index
    %9 = vector.load %arg4[%c0_6, %c0_7] : memref<128x128xbf16, #tpu.memory_space<vmem>>, vector<128x128xbf16>
    %cst_8 = arith.constant dense<0.000000e+00> : vector<128x128xf32>
    %10 = tpu.matmul %8, %9, %cst_8 {dimension_numbers = #tpu.dot_dimension_numbers<[1], [0], [0], [1], [0, 0, 1, 1], [], []>} : vector<128x128xbf16>, vector<128x128xbf16>, vector<128x128xf32> -> vector<128x128xf32>
    %c0_9 = arith.constant 0 : index
    %c0_10 = arith.constant 0 : index
    %11 = vector.load %arg5[%c0_9, %c0_10] : memref<1x128xf32, #tpu.memory_space<vmem>>, vector<1x128xf32>
    %12 = vector.broadcast %11 : vector<1x128xf32> to vector<128x128xf32>
    %13 = arith.addf %10, %12 : vector<128x128xf32>
    %cst_11 = arith.constant 0.000000e+00 : f32
    %14 = vector.broadcast %cst_11 : f32 to vector<128x128xf32>
    %15 = arith.maximumf %13, %14 : vector<128x128xf32>
    %16 = arith.truncf %15 : vector<128x128xf32> to vector<128x128xbf16>
    %c0_12 = arith.constant 0 : index
    %c0_13 = arith.constant 0 : index
    %17 = vector.load %arg6[%c0_12, %c0_13] : memref<128x128xbf16, #tpu.memory_space<vmem>>, vector<128x128xbf16>
    %cst_14 = arith.constant dense<0.000000e+00> : vector<128x128xf32>
    %18 = tpu.matmul %16, %17, %cst_14 {dimension_numbers = #tpu.dot_dimension_numbers<[1], [0], [0], [1], [0, 0, 1, 1], [], []>} : vector<128x128xbf16>, vector<128x128xbf16>, vector<128x128xf32> -> vector<128x128xf32>
    %c0_15 = arith.constant 0 : index
    %c0_16 = arith.constant 0 : index
    %19 = vector.load %arg7[%c0_15, %c0_16] : memref<1x128xf32, #tpu.memory_space<vmem>>, vector<1x128xf32>
    %20 = vector.broadcast %19 : vector<1x128xf32> to vector<128x128xf32>
    %21 = arith.addf %18, %20 : vector<128x128xf32>
    %cst_17 = arith.constant 0.000000e+00 : f32
    %22 = vector.broadcast %cst_17 : f32 to vector<128x128xf32>
    %23 = arith.maximumf %21, %22 : vector<128x128xf32>
    %24 = arith.truncf %23 : vector<128x128xf32> to vector<128x128xbf16>
    %c0_18 = arith.constant 0 : index
    %c0_19 = arith.constant 0 : index
    %25 = vector.load %arg8[%c0_18, %c0_19] : memref<128x128xbf16, #tpu.memory_space<vmem>>, vector<128x128xbf16>
    %cst_20 = arith.constant dense<0.000000e+00> : vector<128x128xf32>
    %26 = tpu.matmul %24, %25, %cst_20 {dimension_numbers = #tpu.dot_dimension_numbers<[1], [0], [0], [1], [0, 0, 1, 1], [], []>} : vector<128x128xbf16>, vector<128x128xbf16>, vector<128x128xf32> -> vector<128x128xf32>
    %c0_21 = arith.constant 0 : index
    %c0_22 = arith.constant 0 : index
    %27 = vector.load %arg9[%c0_21, %c0_22] : memref<1x128xf32, #tpu.memory_space<vmem>>, vector<1x128xf32>
    %28 = vector.broadcast %27 : vector<1x128xf32> to vector<128x128xf32>
    %29 = arith.addf %26, %28 : vector<128x128xf32>
    %c0_23 = arith.constant 0 : index
    %c0_24 = arith.constant 0 : index
    %30 = vector.load %arg10[%c0_23, %c0_24] : memref<128x128xf32, #tpu.memory_space<vmem>>, vector<128x128xf32>
    tpu.vector_store %arg10[%c0_23, %c0_24], %29 {strides = array<i32>} : memref<128x128xf32, #tpu.memory_space<vmem>>, vector<128x128xf32>,
    return
  }
  func.func @transform_0(%arg0: i32) -> (i32, i32) {
    %c0_i32 = arith.constant 0 : i32
    %c0_i32_0 = arith.constant 0 : i32
    return %arg0, %c0_i32 : i32, i32
  }
  func.func @transform_1(%arg0: i32) -> (i32, i32) {
    %c0_i32 = arith.constant 0 : i32
    %c0_i32_0 = arith.constant 0 : i32
    %c0_i32_1 = arith.constant 0 : i32
    return %c0_i32, %c0_i32_0 : i32, i32
  }
  func.func @transform_2(%arg0: i32) -> (i32, i32) {
    %c0_i32 = arith.constant 0 : i32
    %c0_i32_0 = arith.constant 0 : i32
    %c0_i32_1 = arith.constant 0 : i32
    return %c0_i32, %c0_i32_0 : i32, i32
  }
  func.func @transform_3(%arg0: i32) -> (i32, i32) {
    %c0_i32 = arith.constant 0 : i32
    %c0_i32_0 = arith.constant 0 : i32
    %c0_i32_1 = arith.constant 0 : i32
    return %c0_i32, %c0_i32_0 : i32, i32
  }
  func.func @transform_4(%arg0: i32) -> (i32, i32) {
    %c0_i32 = arith.constant 0 : i32
    %c0_i32_0 = arith.constant 0 : i32
    %c0_i32_1 = arith.constant 0 : i32
    return %c0_i32, %c0_i32_0 : i32, i32
  }
  func.func @transform_5(%arg0: i32) -> (i32, i32) {
    %c0_i32 = arith.constant 0 : i32
    %c0_i32_0 = arith.constant 0 : i32
    %c0_i32_1 = arith.constant 0 : i32
    return %c0_i32, %c0_i32_0 : i32, i32
  }
  func.func @transform_6(%arg0: i32) -> (i32, i32) {
    %c0_i32 = arith.constant 0 : i32
    %c0_i32_0 = arith.constant 0 : i32
    %c0_i32_1 = arith.constant 0 : i32
    return %c0_i32, %c0_i32_0 : i32, i32
  }
  func.func @transform_7(%arg0: i32) -> (i32, i32) {
    %c0_i32 = arith.constant 0 : i32
    %c0_i32_0 = arith.constant 0 : i32
    %c0_i32_1 = arith.constant 0 : i32
    return %c0_i32, %c0_i32_0 : i32, i32
  }
  func.func @transform_8(%arg0: i32) -> (i32, i32) {
    %c0_i32 = arith.constant 0 : i32
    %c0_i32_0 = arith.constant 0 : i32
    %c0_i32_1 = arith.constant 0 : i32
    return %c0_i32, %c0_i32_0 : i32, i32
  }
  func.func @transform_9(%arg0: i32) -> (i32, i32) {
    %c0_i32 = arith.constant 0 : i32
    %c0_i32_0 = arith.constant 0 : i32
    return %arg0, %c0_i32 : i32, i32
  }
}

</mosaic_0001>

<bundles_post_ra>
// kernel: sakiko_forward.4
= control target key start
LH: loop header
LB: loop body
LE: loop exit
PB: predicated region body
PF: predicated region fallthrough
CT: control target
= control target key end

     0   :  { %s787_s12 = smov 0   ;;  %s884_s0 = inlined_call_operand.vmem [shape: bf16[2,196,36], index: 0, kind: input, shape index: {}]   ;;  %s885_s1 = inlined_call_operand.vmem [shape: bf16[36,128], index: 1, kind: input, shape index: {}]   ;;  %s886_s2 = inlined_call_operand.vmem [shape: f32[1,128], index: 2, kind: input, shape index: {}]   ;;  %s887_s3 = inlined_call_operand.vmem [shape: bf16[2,49,128], index: 3, kind: output, shape index: {}]  }
   0x1 LB: > { %s630_s13 = sadd.s32 4294967295, %s765_s12   ;;  %p634_p0 = scmp.ge.s32.totalorder %s765_s12, 1  ;;  %s765_s12 = sphi %s787_s12, %s13_s12  }
   0x2   : > { %p137_p1 = scmp.lt.s32.totalorder %s765_s12, 3 }
   0x4   : > { %p138_p2 = pnand %p634_p0, %p137_p1 }
   0x5   : > { %p161_p3 = scmp.lt.s32.totalorder (!%p138_p2), %s630_s13, 1 }
   0x6   : > { %141 = sbr.rel (%p138_p2) target bundleno = 240 (0xf0), region = 32 }
   0xb   : > { %v201_v0 = vld [vmem:[%s885_s1 + $0x10] sm:$0x3]  ;;  %vm324_vm0 = vcmask 1041408   ;;  %s889_s13 = smov (!%p161_p3, %s630_s13), 1  ;;  %v721_v4 = vld [vmem:[%s885_s1 + $0x8] sm:$0xff]  ;;  %v720_v5 = vld [vmem:[%s885_s1] sm:$0xff] }
   0xc   : > { %v278_v1 = vunpack.c.l.b16 %v201_v0  ;;  %s748_s18 = smul.u32 100, %s889_s13  ;;  %vm284_vm1 = vcmask 293888   ;;  %v842_v21 = vld [vmem:[%s886_s2] ss:$0 sm:$0xff]  ;;  %vm545_vm2 = vcmask 1046528   ;;  %vm547_vm3 = vcmask 1045504  }
   0xd   : > { %s749_s26 = smul.u32 28, %s889_s13  ;;  %vm549_vm4 = vcmask 1044480   ;;  %vm551_vm5 = vcmask 1043456   ;;  %vm569_vm6 = vcmask 1040384   ;;  %vm570_vm7 = vsmask.f32 256 }
   0xe   : > { %v281_v2 = vpack.c.b16 %v278_v1, %v278_v1  ;;  %s811_s23 = scalar_lea.vmem %s884_s0, %s748_s18  ;;  %vm553_vm8 = vcmask 1042432   ;;  %vm571_vm9 = vmand %vm569_vm6, %vm570_vm7 }
   0xf   : > { %v708_v6 = vld [vmem:[%s811_s23] sm:$0xff]  ;;  %v711_v7 = vld [vmem:[%s811_s23 + $0x18] sm:$0xff]  ;;  %v709_v12 = vld [vmem:[%s811_s23 + $0x8] sm:$0xff]  ;;  %s872_s29 = scalar_lea.vmem %s887_s3, %s749_s26 }
  0x10   : > { %v326_v3 = vsel %vm324_vm0, %v281_v2, 0  ;;  %v715_v8 = vld [vmem:[%s811_s23 + $0x38] sm:$0xff]  ;;  %v196_v10 = vld [vmem:[%s811_s23 + $0x60] sm:$0x3]  ;;  %v710_v16 = vld [vmem:[%s811_s23 + $0x10] sm:$0xff] }
  0x11   : > { %333 = vmatpush.bf16.msra.mxu0 %v326_v3  ;;  %739 = vmatpush.bf16.msra.mxu1 %v326_v3  ;;  %v719_v9 = vld [vmem:[%s811_s23 + $0x58] sm:$0xff]  ;;  %v255_v11 = vunpack.c.l.b16 %v196_v10  ;;  %v712_v13 = vld [vmem:[%s811_s23 + $0x20] sm:$0xff]  ;;  %v713_v17 = vld [vmem:[%s811_s23 + $0x28] sm:$0xff] }
  0x12   : > { %740 = vmatpush.bf16.msra.mxu2 %v326_v3  ;;  %741 = vmatpush.bf16.msra.mxu3 %v326_v3  ;;  %v716_v14 = vld [vmem:[%s811_s23 + $0x40] sm:$0xff]  ;;  %v717_v18 = vld [vmem:[%s811_s23 + $0x48] sm:$0xff]  ;;  %v714_v19 = vld [vmem:[%s811_s23 + $0x30] sm:$0xff] }
  0x13   : > { %v268_v15 = vpack.c.b16 %v255_v11, %v255_v11  ;;  %v718_v20 = vld [vmem:[%s811_s23 + $0x50] sm:$0xff] }
  0x15   : > { %334 = vmatpush.bf16.msra.mxu0 %v721_v4  ;;  %742 = vmatpush.bf16.msra.mxu1 %v721_v4 }
  0x16   : > { %743 = vmatpush.bf16.msra.mxu2 %v721_v4  ;;  %744 = vmatpush.bf16.msra.mxu3 %v721_v4 }
  0x19   : > { %335 = vmatpush.bf16.msra.mxu0 %v720_v5  ;;  %745 = vmatpush.bf16.msra.mxu1 %v720_v5 }
  0x1a   : > { %746 = vmatpush.bf16.msra.mxu2 %v720_v5  ;;  %747 = vmatpush.bf16.msra.mxu3 %v720_v5 }
  0x1c   : > { %693 = vmatmul.msk.bf16.vlgmr.msra.gmra.mxu0 %vm284_vm1, %v708_v6  ;;  %696 = vmatmul.msk.bf16.vlgmr.msra.gmra.mxu1 %vm284_vm1, %v711_v7 }
  0x1d   : > { %700 = vmatmul.msk.bf16.vlgmr.msra.gmra.mxu2 %vm284_vm1, %v715_v8  ;;  %704 = vmatmul.msk.bf16.vlgmr.msra.gmra.mxu3 %vm284_vm1, %v719_v9 }
  0x2c   : > { %694 = vmatmul.msk.bf16.gmra.mxu0 %vm284_vm1, %v709_v12  ;;  %697 = vmatmul.msk.bf16.gmra.mxu1 %vm284_vm1, %v712_v13 }
  0x2d   : > { %701 = vmatmul.msk.bf16.gmra.mxu2 %vm284_vm1, %v716_v14  ;;  %705 = vmatmul.msk.bf16.gmra.mxu3 %vm284_vm1, %v268_v15 }
  0x3c   : > { %695 = vmatmul.msk.bf16.gmra.mxu0 %vm284_vm1, %v710_v16  ;;  %698 = vmatmul.msk.bf16.gmra.mxu1 %vm284_vm1, %v713_v17 }
  0x3d   : > { %702 = vmatmul.msk.bf16.gmra.mxu2 %vm284_vm1, %v717_v18 }
  0x4c   : > { %699 = vmatmul.msk.bf16.gmra.mxu1 %vm284_vm1, %v714_v19 }
  0x4d   : > { %703 = vmatmul.msk.bf16.gmra.mxu2 %vm284_vm1, %v718_v20 }
  0x99   : > { %v337_v22 = vpop.f32.mrf.mxu0  ;;  %v352_v23 = vpop.f32.mrf.mxu1 }
  0x9a   : > { %v338_v24 = vadd.f32 %v842_v21, %v337_v22  ;;  %v353_v25 = vadd.f32 %v842_v21, %v352_v23 }
  0x9c   : > { %v401_v26 = vmax.f32 %v338_v24, 0.0  ;;  %v407_v27 = vmax.f32 %v353_v25, 0.0 }
  0x9e   : > { %426 = vst [vmem:[#allocation2] sm:$0xff] %v401_v26 }
  0x9f   : > { %432 = vst [vmem:[#allocation2 + $0x30] sm:$0xff] %v407_v27 }
  0xa0   : > { %v372_v28 = vpop.f32.mrf.mxu2  ;;  %v392_v29 = vpop.f32.mrf.mxu3 }
  0xa1   : > { %v373_v30 = vadd.f32 %v842_v21, %v372_v28  ;;  %v339_v31 = vpop.f32.mrf.mxu0  ;;  %v354_v32 = vpop.f32.mrf.mxu1  ;;  %v393_v43 = vadd.f32 %v842_v21, %v392_v29 }
  0xa2   : > { %v340_v33 = vadd.f32 %v842_v21, %v339_v31  ;;  %v355_v34 = vadd.f32 %v842_v21, %v354_v32 }
  0xa3   : > { %v415_v35 = vmax.f32 %v373_v30, 0.0  ;;  %v423_v50 = vmax.f32 %v393_v43, 0.0 }
  0xa4   : > { %v402_v36 = vmax.f32 %v340_v33, 0.0  ;;  %v408_v37 = vmax.f32 %v355_v34, 0.0 }
  0xa5   : > { %440 = vst [vmem:[#allocation2 + $0x70] sm:$0xff] %v415_v35 }
  0xa6   : > { %427 = vst [vmem:[#allocation2 + $0x8] sm:$0xff] %v402_v36 }
  0xa7   : > { %433 = vst [vmem:[#allocation2 + $0x38] sm:$0xff] %v408_v37 }
  0xa8   : > { %v374_v38 = vpop.f32.mrf.mxu2  ;;  %v394_v39 = vpop.f32.mrf.mxu3  ;;  %448 = vst [vmem:[#allocation2 + $0xb0] sm:$0xff] %v423_v50 }
  0xa9   : > { %v375_v40 = vadd.f32 %v842_v21, %v374_v38  ;;  %v342_v41 = vpop.f32.mrf.mxu0  ;;  %v357_v42 = vpop.f32.mrf.mxu1  ;;  %v395_v47 = vadd.f32 %v842_v21, %v394_v39 }
  0xaa   : > { %v343_v44 = vadd.f32 %v842_v21, %v342_v41  ;;  %v358_v45 = vadd.f32 %v842_v21, %v357_v42 }
  0xab   : > { %v416_v46 = vmax.f32 %v375_v40, 0.0  ;;  %v424_v51 = vmax.f32 %v395_v47, 0.0 }
  0xac   : > { %v403_v48 = vmax.f32 %v343_v44, 0.0  ;;  %v409_v49 = vmax.f32 %v358_v45, 0.0 }
  0xad   : > { %441 = vst [vmem:[#allocation2 + $0x78] sm:$0xff] %v416_v46  ;;  %v451_v32 = vld [vmem:[#allocation2] ss:$2 sm:$0x7f] }
  0xae   : > { %428 = vst [vmem:[#allocation2 + $0x10] sm:$0xff] %v403_v48  ;;  %v453_v33 = vld [vmem:[#allocation2 + $0x1] ss:$2 sm:$0x7f] }
  0xaf   : > { %434 = vst [vmem:[#allocation2 + $0x40] sm:$0xff] %v409_v49  ;;  %v454_v48 = vmax.f32 %v451_v32, %v453_v33  ;;  %v572_v32 = vld [vmem:[%s872_s29 + $0x18] sm:$0x1] }
  0xb0   : > { %v377_v52 = vpop.f32.mrf.mxu2  ;;  %v397_v53 = vpop.f32.mrf.mxu3  ;;  %449 = vst [vmem:[#allocation2 + $0xb8] sm:$0xff] %v424_v51 }
  0xb1   : > { %v378_v54 = vadd.f32 %v842_v21, %v377_v52  ;;  %v344_v55 = vpop.f32.mrf.mxu0  ;;  %v359_v56 = vpop.f32.mrf.mxu1  ;;  %v398_v59 = vadd.f32 %v842_v21, %v397_v53 }
  0xb2   : > { %v345_v57 = vadd.f32 %v842_v21, %v344_v55  ;;  %v360_v58 = vadd.f32 %v842_v21, %v359_v56 }
  0xb3   : > { %v417_v60 = vmax.f32 %v378_v54, 0.0  ;;  %v425_v63 = vmax.f32 %v398_v59, 0.0 }
  0xb4   : > { %v404_v61 = vmax.f32 %v345_v57, 0.0  ;;  %v410_v62 = vmax.f32 %v360_v58, 0.0 }
  0xb5   : > { %442 = vst [vmem:[#allocation2 + $0x80] sm:$0xff] %v417_v60 }
  0xb6   : > { %429 = vst [vmem:[#allocation2 + $0x18] sm:$0xff] %v404_v61  ;;  %v473_v26 = vld [vmem:[#allocation2 + $0x38] ss:$2 sm:$0x7f] }
  0xb7   : > { %435 = vst [vmem:[#allocation2 + $0x48] sm:$0xff] %v410_v62  ;;  %v475_v28 = vld [vmem:[#allocation2 + $0x39] ss:$2 sm:$0x7f] }
  0xb8   : > { %v379_v0 = vpop.f32.mrf.mxu2  ;;  %v399_v1 = vpop.f32.mrf.mxu3  ;;  %450 = vst [vmem:[#allocation2 + $0xc0] sm:$0xf] %v425_v63  ;;  %v476_v35 = vmax.f32 %v473_v26, %v475_v28  ;;  %v495_v61 = vld [vmem:[#allocation2 + $0x70] ss:$2 sm:$0x7f] }
  0xb9   : > { %v380_v2 = vadd.f32 %v842_v21, %v379_v0  ;;  %v347_v3 = vpop.f32.mrf.mxu0  ;;  %v362_v4 = vpop.f32.mrf.mxu1  ;;  %v497_v63 = vld [vmem:[#allocation2 + $0x71] ss:$2 sm:$0x7f] }
  0xba   : > { %v348_v5 = vadd.f32 %v842_v21, %v347_v3  ;;  %v363_v6 = vadd.f32 %v842_v21, %v362_v4 }
  0xbb   : > { %v418_v7 = vmax.f32 %v380_v2, 0.0 }
  0xbc   : > { %v405_v8 = vmax.f32 %v348_v5, 0.0  ;;  %v411_v9 = vmax.f32 %v363_v6, 0.0 }
  0xbd   : > { %443 = vst [vmem:[#allocation2 + $0x88] sm:$0xff] %v418_v7  ;;  %v456_v30 = vld [vmem:[#allocation2 + $0xe] ss:$2 sm:$0x7f]  ;;  %v498_v7 = vmax.f32 %v495_v61, %v497_v63 }
  0xbe   : > { %430 = vst [vmem:[#allocation2 + $0x20] sm:$0xff] %v405_v8  ;;  %v458_v34 = vld [vmem:[#allocation2 + $0xf] ss:$2 sm:$0x7f] }
  0xbf   : > { %436 = vst [vmem:[#allocation2 + $0x50] sm:$0xff] %v411_v9  ;;  %v459_v42 = vmax.f32 %v456_v30, %v458_v34 }
  0xc0   : > { %v382_v10 = vpop.f32.mrf.mxu2 }
  0xc1   : > { %v383_v11 = vadd.f32 %v842_v21, %v382_v10  ;;  %v349_v12 = vpop.f32.mrf.mxu0  ;;  %v364_v13 = vpop.f32.mrf.mxu1  ;;  %v460_v51 = vmax.f32 %v454_v48, %v459_v42 }
  0xc2   : > { %v350_v14 = vadd.f32 %v842_v21, %v349_v12  ;;  %v365_v15 = vadd.f32 %v842_v21, %v364_v13 }
  0xc3   : > { %v419_v16 = vmax.f32 %v383_v11, 0.0 }
  0xc4   : > { %v406_v17 = vmax.f32 %v350_v14, 0.0  ;;  %v412_v18 = vmax.f32 %v365_v15, 0.0  ;;  %v500_v57 = vld [vmem:[#allocation2 + $0x7e] ss:$2 sm:$0x7f] }
  0xc5   : > { %444 = vst [vmem:[#allocation2 + $0x90] sm:$0xff] %v419_v16  ;;  %v502_v58 = vld [vmem:[#allocation2 + $0x7f] ss:$2 sm:$0x7f] }
  0xc6   : > { %431 = vst [vmem:[#allocation2 + $0x28] sm:$0xff] %v406_v17  ;;  %v478_v23 = vld [vmem:[#allocation2 + $0x46] ss:$2 sm:$0x7f]  ;;  %v503_v1 = vmax.f32 %v500_v57, %v502_v58 }
  0xc7   : > { %437 = vst [vmem:[#allocation2 + $0x58] sm:$0xff] %v412_v18  ;;  %v480_v24 = vld [vmem:[#allocation2 + $0x47] ss:$2 sm:$0x7f] }
  0xc8   : > { %v384_v19 = vpop.f32.mrf.mxu2  ;;  %v481_v31 = vmax.f32 %v478_v23, %v480_v24  ;;  %v504_v11 = vmax.f32 %v498_v7, %v503_v1  ;;  %v524_v17 = vld [vmem:[#allocation2 + $0xb7] ss:$2 sm:$0x7f] }
  0xc9   : > { %v385_v20 = vadd.f32 %v842_v21, %v384_v19  ;;  %v367_v22 = vpop.f32.mrf.mxu1 }
  0xca   : > { %v368_v25 = vadd.f32 %v842_v21, %v367_v22  ;;  %v482_v43 = vmax.f32 %v476_v35, %v481_v31  ;;  %v537_v18 = vrot.slane %v504_v11, 4 }
  0xcb   : > { %v420_v27 = vmax.f32 %v385_v20, 0.0 }
  0xcc   : > { %v413_v29 = vmax.f32 %v368_v25, 0.0  ;;  %v531_v52 = vrot.slane %v482_v43, 2 }
  0xcd   : > { %445 = vst [vmem:[#allocation2 + $0x98] sm:$0xff] %v420_v27  ;;  %v462_v36 = vld [vmem:[#allocation2 + $0x1c] ss:$2 sm:$0x7f] }
  0xce   : > { %438 = vst [vmem:[#allocation2 + $0x60] sm:$0xff] %v413_v29  ;;  %v464_v37 = vld [vmem:[#allocation2 + $0x1d] ss:$2 sm:$0x7f] }
  0xcf   : > { %v465_v38 = vmax.f32 %v462_v36, %v464_v37  ;;  %v467_v39 = vld [vmem:[#allocation2 + $0x2a] ss:$2 sm:$0x7f]  ;;  %v469_v40 = vld [vmem:[#allocation2 + $0x2b] ss:$2 sm:$0x7f] }
  0xd0   : > { %v387_v41 = vpop.f32.mrf.mxu2  ;;  %v470_v44 = vmax.f32 %v467_v39, %v469_v40 }
  0xd1   : > { %v388_v45 = vadd.f32 %v842_v21, %v387_v41  ;;  %v369_v46 = vpop.f32.mrf.mxu1 }
  0xd2   : > { %v370_v47 = vadd.f32 %v842_v21, %v369_v46  ;;  %v471_v49 = vmax.f32 %v465_v38, %v470_v44 }
  0xd3   : > { %v421_v50 = vmax.f32 %v388_v45, 0.0 }
  0xd4   : > { %v528_v53 = vrot.slane %v471_v49, 1  ;;  %v414_v54 = vmax.f32 %v370_v47, 0.0  ;;  %v506_v4 = vld [vmem:[#allocation2 + $0x8c] ss:$2 sm:$0x7f] }
  0xd5   : > { %446 = vst [vmem:[#allocation2 + $0xa0] sm:$0xff] %v421_v50  ;;  %v484_v0 = vld [vmem:[#allocation2 + $0x54] ss:$2 sm:$0x7f] }
  0xd6   : > { %v546_v55 = vsel %vm545_vm2, %v460_v51, %v528_v53  ;;  %v548_v56 = vsel %vm547_vm3, %v528_v53, %v531_v52  ;;  %439 = vst [vmem:[#allocation2 + $0x68] sm:$0xff] %v414_v54  ;;  %v486_v2 = vld [vmem:[#allocation2 + $0x55] ss:$2 sm:$0x7f] }
  0xd7   : > { %v725_v59 = vpack.c.bf16 %v548_v56, %v546_v55  ;;  %v508_v8 = vld [vmem:[#allocation2 + $0x8d] ss:$2 sm:$0x7f]  ;;  %v487_v12 = vmax.f32 %v484_v0, %v486_v2 }
  0xd8   : > { %v389_v60 = vpop.f32.mrf.mxu2  ;;  %v509_v15 = vmax.f32 %v506_v4, %v508_v8 }
  0xd9   : > { %v390_v62 = vadd.f32 %v842_v21, %v389_v60  ;;  %726 = vst [vmem:[%s872_s29] sm:$0xff] %v725_v59   ;;  %v522_v21 = vld [vmem:[#allocation2 + $0xb6] ss:$2 sm:$0x7f] }
  0xda   : > { %v525_v24 = vmax.f32 %v522_v21, %v524_v17 }
  0xdb   : > { %v422_v3 = vmax.f32 %v390_v62, 0.0 }
  0xdc   : > { %v511_v5 = vld [vmem:[#allocation2 + $0x9a] ss:$2 sm:$0x7f]  ;;  %v513_v6 = vld [vmem:[#allocation2 + $0x9b] ss:$2 sm:$0x7f] }
  0xdd   : > { %447 = vst [vmem:[#allocation2 + $0xa8] sm:$0xff] %v422_v3  ;;  %v489_v9 = vld [vmem:[#allocation2 + $0x62] ss:$2 sm:$0x7f]  ;;  %v514_v13 = vmax.f32 %v511_v5, %v513_v6 }
  0xde   : > { %v491_v10 = vld [vmem:[#allocation2 + $0x63] ss:$2 sm:$0x7f] }
  0xdf   : > { %v492_v14 = vmax.f32 %v489_v9, %v491_v10  ;;  %v515_v19 = vmax.f32 %v509_v15, %v514_v13 }
  0xe1   : > { %v493_v16 = vmax.f32 %v487_v12, %v492_v14  ;;  %v540_v29 = vrot.slane %v515_v19, 5 }
  0xe3   : > { %v534_v20 = vrot.slane %v493_v16, 3  ;;  %v554_v33 = vsel %vm553_vm8, %v537_v18, %v540_v29 }
  0xe4   : > { %v517_v22 = vld [vmem:[#allocation2 + $0xa8] ss:$2 sm:$0x7f]  ;;  %v519_v23 = vld [vmem:[#allocation2 + $0xa9] ss:$2 sm:$0x7f] }
  0xe5   : > { %v550_v25 = vsel %vm549_vm4, %v531_v52, %v534_v20  ;;  %v552_v26 = vsel %vm551_vm5, %v534_v20, %v537_v18  ;;  %v520_v27 = vmax.f32 %v517_v22, %v519_v23 }
  0xe6   : > { %v730_v28 = vpack.c.bf16 %v552_v26, %v550_v25 }
  0xe7   : > { %v526_v30 = vmax.f32 %v520_v27, %v525_v24 }
  0xe8   : > { %737 = vst [vmem:[%s872_s29 + $0x8] sm:$0xff] %v730_v28  }
  0xe9   : > { %v543_v31 = vrot.slane %v526_v30, 6 }
  0xeb   : > { %v555_v34 = vsel %vm324_vm0, %v540_v29, %v543_v31  ;;  %v562_v35 = vpack.c.bf16 %v543_v31, %v543_v31 }
  0xec   : > { %v735_v36 = vpack.c.bf16 %v555_v34, %v554_v33 }
  0xed   : > { %v573_v37 = vsel %vm571_vm9, %v562_v35, %v572_v32 }
  0xee   : > { %738 = vst [vmem:[%s872_s29 + $0x10] sm:$0xff] %v735_v36  }
  0xef   : > { %574 = vst [vmem:[%s872_s29 + $0x18] sm:$0x1] %v573_v37 }
  0xf0 PF: > { %s13_s12 = sadd.s32 1, %s765_s12  }
  0xf1   : > { %p10_p4 = scmp.ge.s32.totalorder %s13_s12, 4  }
  0xf3   :  { %12 = sbr.rel (!%p10_p4) target bundleno = 1 (0x1), region = 89 }

// kernel: sakiko_forward.5
= control target key start
LH: loop header
LB: loop body
LE: loop exit
PB: predicated region body
PF: predicated region fallthrough
CT: control target
= control target key end

     0   :  { %s1742_s12 = smov 0   ;;  %s2070_s0 = inlined_call_operand.vmem [shape: bf16[2,49,128], index: 0, kind: input, shape index: {}]   ;;  %s2071_s1 = inlined_call_operand.vmem [shape: bf16[1152,128], index: 1, kind: input, shape index: {}]   ;;  %s2072_s2 = inlined_call_operand.vmem [shape: f32[1,128], index: 2, kind: input, shape index: {}]   ;;  %s2073_s3 = inlined_call_operand.vmem [shape: bf16[2,4,128], index: 3, kind: output, shape index: {}]  }
   0x1 LB: > { %s1292_s13 = sadd.s32 4294967295, %s1720_s12   ;;  %p1296_p0 = scmp.ge.s32.totalorder %s1720_s12, 1  ;;  %s1720_s12 = sphi %s1742_s12, %s13_s12  }
   0x2   : > { %p137_p1 = scmp.lt.s32.totalorder %s1720_s12, 3 }
   0x4   : > { %p138_p2 = pnand %p1296_p0, %p137_p1 }
   0x5   : > { %p160_p3 = scmp.lt.s32.totalorder (!%p138_p2), %s1292_s13, 1 }
   0x6   : > { %141 = sbr.rel (%p138_p2) target bundleno = 303 (0x12f), region = 32 }
   0xb   : > { %v1621_v0 = vld [vmem:[%s2071_s1 + $0x78] sm:$0xff]  ;;  %v1620_v2 = vld [vmem:[%s2071_s1 + $0x70] sm:$0xff]  ;;  %s2075_s13 = smov (!%p160_p3, %s1292_s13), 1  ;;  %v1619_v6 = vld [vmem:[%s2071_s1 + $0x68] sm:$0xff]  ;;  %vm219_vm0 = vsmask.f32 7424 }
   0xc   : > { %v1629_v1 = vld [vmem:[%s2071_s1 + $0xb8] sm:$0xff]  ;;  %293 = vmatpush.bf16.msra.mxu0 %v1621_v0  ;;  %1685 = vmatpush.bf16.msra.mxu1 %v1621_v0  ;;  %v1628_v4 = vld [vmem:[%s2071_s1 + $0xb0] sm:$0xff]  ;;  %v1627_v7 = vld [vmem:[%s2071_s1 + $0xa8] sm:$0xff]  ;;  %s1701_s30 = smul.u32 28, %s2075_s13  ;;  %vm414_vm1 = vcmask 1046528   ;;  %vm878_vm3 = vcmask 1044480  }
   0xd   : > { %v1637_v3 = vld [vmem:[%s2071_s1 + $0xf8] sm:$0xff]  ;;  %471 = vmatpush.bf16.msra.mxu2 %v1629_v1  ;;  %v1636_v5 = vld [vmem:[%s2071_s1 + $0xf0] sm:$0xff]  ;;  %v1635_v8 = vld [vmem:[%s2071_s1 + $0xe8] sm:$0xff]  ;;  %vm523_vm2 = vsmask.f32 4352  ;;  %s1298_s18 = sshll.u32 %s2075_s13, 1 }
   0xe   : > { %596 = vmatpush.bf16.msra.mxu3 %v1637_v3  ;;  %v1618_v9 = vld [vmem:[%s2071_s1 + $0x60] sm:$0xff]  ;;  %s1789_s14 = scalar_lea.vmem %s2070_s0, %s1701_s30  ;;  %v1617_v14 = vld [vmem:[%s2071_s1 + $0x58] sm:$0xff]  ;;  %v1616_v22 = vld [vmem:[%s2071_s1 + $0x50] sm:$0xff]  ;;  %vm1235_vm4 = vcmask 1041408   ;;  %s168_s21 = scalar_lea.vmem %s2073_s3, %s1298_s18 }
   0xf   : > { %v1626_v10 = vld [vmem:[%s2071_s1 + $0xa0] sm:$0xff]  ;;  %v1625_v16 = vld [vmem:[%s2071_s1 + $0x98] sm:$0xff]  ;;  %v173_v19 = vld [vmem:[%s1789_s14 + $0x10] sm:$0x1] }
  0x10   : > { %294 = vmatpush.bf16.msra.mxu0 %v1620_v2  ;;  %1686 = vmatpush.bf16.msra.mxu1 %v1620_v2  ;;  %v1634_v11 = vld [vmem:[%s2071_s1 + $0xe0] sm:$0xff]  ;;  %v1633_v18 = vld [vmem:[%s2071_s1 + $0xd8] sm:$0xff]  ;;  %v1814_v23 = vld [vmem:[%s1789_s14 + $0x8] sm:$0xff]  ;;  %v215_v26 = vunpack.c.l.b16 %v173_v19 }
  0x11   : > { %472 = vmatpush.bf16.msra.mxu2 %v1628_v4  ;;  %v499_v12 = vld [vmem:[%s1789_s14] sm:$0x8]  ;;  %v1624_v25 = vld [vmem:[%s2071_s1 + $0x90] sm:$0xff]  ;;  %v232_v29 = vshrl.u32 %v1814_v23, 16  ;;  %v1615_v32 = vld [vmem:[%s2071_s1 + $0x48] sm:$0xff]  ;;  %v228_v35 = vshll.u32 %v1814_v23, 16 }
  0x12   : > { %597 = vmatpush.bf16.msra.mxu3 %v1636_v5  ;;  %v519_v13 = vunpack.c.l.b16 %v499_v12  ;;  %v1799_v15 = vld [vmem:[%s1789_s14] sm:$0xff]   ;;  %v1632_v27 = vld [vmem:[%s2071_s1 + $0xd0] sm:$0xff]  ;;  %v1623_v36 = vld [vmem:[%s2071_s1 + $0x88] sm:$0xff]  ;;  %v1832_v37 = vpack.c.b16 %v215_v26, %v215_v26  ;;  %v416_v52 = vrot.slane %v1814_v23, 1 }
  0x13   : > { %v1684_v17 = vunpack.c.h.b16 %v1799_v15  ;;  %v390_v20 = vld [vmem:[%s1789_s14] sm:$0xe]  ;;  %v223_v24 = vshll.u32 %v1799_v15, 16  ;;  %v221_v33 = vshrl.u32 %v1799_v15, 16  ;;  %v1631_v38 = vld [vmem:[%s2071_s1 + $0xc8] sm:$0xff]  ;;  %v532_v42 = vrot.slane %v232_v29, 3 }
  0x14   : > { %295 = vmatpush.bf16.msra.mxu0 %v1619_v6  ;;  %1687 = vmatpush.bf16.msra.mxu1 %v1619_v6  ;;  %v410_v28 = vunpack.c.l.b16 %v390_v20  ;;  %v533_v43 = vrot.slane %v228_v35, 4  ;;  %v1614_v44 = vld [vmem:[%s2071_s1 + $0x40] sm:$0xff]  ;;  %v230_v46 = vrot.slane %v228_v35, 1  ;;  %v1843_v47 = vld [vmem:[%s1789_s14 + $0x10] sm:$0xff]   ;;  %v1613_v48 = vld [vmem:[%s2071_s1 + $0x38] sm:$0xff]  ;;  %v240_v50 = vshrl.u32 %v1832_v37, 16 }
  0x15   : > { %473 = vmatpush.bf16.msra.mxu2 %v1627_v7  ;;  %v521_v21 = vpack.c.b16 %v1684_v17, %v519_v13  ;;  %v225_v34 = vrot.slane %v223_v24, 1  ;;  %v1646_v49 = vld [vmem:[%s2071_s1 + $0x138] sm:$0xff]  ;;  %v1622_v51 = vld [vmem:[%s2071_s1 + $0x80] sm:$0xff]  ;;  %v520_v57 = vunpack.c.l.b16 %v1843_v47  ;;  %v1612_v61 = vld [vmem:[%s2071_s1 + $0x30] sm:$0xff] }
  0x16   : > { %598 = vmatpush.bf16.msra.mxu3 %v1635_v8  ;;  %v412_v39 = vpack.c.b16 %v1684_v17, %v410_v28  ;;  %v1630_v53 = vld [vmem:[%s2071_s1 + $0xc0] sm:$0xff]  ;;  %v1859_v56 = vor.u32 %v533_v43, %v532_v42  ;;  %v1662_v59 = vld [vmem:[%s2071_s1 + $0x1b8] sm:$0xff]  ;;  %v1645_v62 = vld [vmem:[%s2071_s1 + $0x130] sm:$0xff]  ;;  %v234_v19 = vor.u32 %v232_v29, %v230_v46 }
  0x17   : > { %v525_v30 = vshrl.u32 %v521_v21, 16  ;;  %v528_v31 = vshll.u32 %v521_v21, 16  ;;  %v226_v45 = vor.u32 %v225_v34, %v221_v33  ;;  %v1670_v60 = vld [vmem:[%s2071_s1 + $0x1f8] sm:$0xff]  ;;  %v522_v1 = vpack.c.b16 %v520_v57, %v520_v57  ;;  %v1661_v2 = vld [vmem:[%s2071_s1 + $0x1b0] sm:$0xff]  ;;  %v1611_v5 = vld [vmem:[%s2071_s1 + $0x28] sm:$0xff] }
  0x18   : > { %296 = vmatpush.bf16.msra.mxu0 %v1618_v9  ;;  %1688 = vmatpush.bf16.msra.mxu1 %v1618_v9  ;;  %v415_v54 = vrot.slane %v412_v39, 1  ;;  %v391_v3 = vld [vmem:[%s1789_s14 + $0x10] sm:$0x3]  ;;  %v1644_v6 = vld [vmem:[%s2071_s1 + $0x128] sm:$0xff]  ;;  %v1610_v13 = vld [vmem:[%s2071_s1 + $0x20] sm:$0xff] }
  0x19   : > { %474 = vmatpush.bf16.msra.mxu2 %v1626_v10  ;;  %v527_v40 = vrot.slane %v525_v30, 3  ;;  %v530_v41 = vrot.slane %v528_v31, 4  ;;  %v231_v58 = vsel %vm219_vm0, %v226_v45, %v230_v46  ;;  %v1669_v4 = vld [vmem:[%s2071_s1 + $0x1f0] sm:$0xff]  ;;  %v411_v7 = vunpack.c.l.b16 %v391_v3  ;;  %v1668_v12 = vld [vmem:[%s2071_s1 + $0x1e8] sm:$0xff]  ;;  %v1659_v21 = vld [vmem:[%s2071_s1 + $0x1a0] sm:$0xff] }
  0x1a   : > { %599 = vmatpush.bf16.msra.mxu3 %v1634_v11  ;;  %v417_v63 = vsel %vm414_vm1, %v415_v54, %v416_v52  ;;  %v537_v8 = vshrl.u32 %v522_v1, 16  ;;  %v540_v9 = vshll.u32 %v522_v1, 16  ;;  %v236_v10 = vshll.u32 %v1832_v37, 16  ;;  %v1660_v11 = vld [vmem:[%s2071_s1 + $0x1a8] sm:$0xff]  ;;  %v1642_v24 = vld [vmem:[%s2071_s1 + $0x118] sm:$0xff]  ;;  %v1667_v29 = vld [vmem:[%s2071_s1 + $0x1e0] sm:$0xff] }
  0x1b   : > { %v531_v55 = vor.u32 %v530_v41, %v527_v40  ;;  %v1658_v28 = vld [vmem:[%s2071_s1 + $0x198] sm:$0xff]  ;;  %v1608_v30 = vld [vmem:[%s2071_s1 + $0x10] sm:$0xff]  ;;  %v1957_v40 = vld [vmem:[%s1789_s14 + $0x4] sm:$0xff]  }
  0x1c   : > { %297 = vmatpush.bf16.msra.mxu0 %v1617_v14  ;;  %1689 = vmatpush.bf16.msra.mxu1 %v1617_v14  ;;  %v1643_v14 = vld [vmem:[%s2071_s1 + $0x120] sm:$0xff]  ;;  %v1908_v17 = vrot.slane %v537_v8, 3  ;;  %v238_v20 = vrot.slane %v236_v10, 1  ;;  %v1641_v31 = vld [vmem:[%s2071_s1 + $0x110] sm:$0xff]  ;;  %v1666_v34 = vld [vmem:[%s2071_s1 + $0x1d8] sm:$0xff] }
  0x1d   : > { %475 = vmatpush.bf16.msra.mxu2 %v1625_v16  ;;  %v535_v0 = vsel %vm523_vm2, %v531_v55, %v1859_v56  ;;  %v1906_v16 = vpack.c.b16 %v411_v7, %v411_v7  ;;  %v1657_v35 = vld [vmem:[%s2071_s1 + $0x190] sm:$0xff]  ;;  %v1711_v41 = vld [vmem:[%s1789_s14 + $0x4] sm:$0xf0]  ;;  %v1606_v43 = vld [vmem:[%s2071_s1] sm:$0xff] }
  0x1e   : > { %600 = vmatpush.bf16.msra.mxu3 %v1633_v18  ;;  %v542_v18 = vrot.slane %v540_v9, 4  ;;  %v1665_v39 = vld [vmem:[%s2071_s1 + $0x1d0] sm:$0xff]  ;;  %v1656_v42 = vld [vmem:[%s2071_s1 + $0x188] sm:$0xff]  ;;  %v1654_v45 = vld [vmem:[%s2071_s1 + $0x178] sm:$0xff] }
  0x1f   : > { %v1680_v46 = vld [vmem:[%s2071_s1 + $0x238] sm:$0xff]  ;;  %v1652_v54 = vld [vmem:[%s2071_s1 + $0x168] sm:$0xff]  ;;  %v1675_v8 = vld [vmem:[%s2071_s1 + $0x210] sm:$0xff] }
  0x20   : > { %298 = vmatpush.bf16.msra.mxu0 %v1616_v22  ;;  %1690 = vmatpush.bf16.msra.mxu1 %v1616_v22  ;;  %v1609_v22 = vld [vmem:[%s2071_s1 + $0x18] sm:$0xff]  ;;  %v543_v26 = vor.u32 %v542_v18, %v1908_v17  ;;  %v1678_v55 = vld [vmem:[%s2071_s1 + $0x228] sm:$0xff]  ;;  %v1673_v18 = vld [vmem:[%s2071_s1 + $0x200] sm:$0xff] }
  0x21   : > { %476 = vmatpush.bf16.msra.mxu2 %v1624_v25  ;;  %v418_v25 = vrot.slane %v1906_v16, 1  ;;  %v2003_v57 = vld [vmem:[%s1789_s14 + $0xc] sm:$0xff]  ;;  %v1647_v16 = vld [vmem:[%s2071_s1 + $0x140] sm:$0xff] }
  0x22   : > { %601 = vmatpush.bf16.msra.mxu3 %v1632_v27  ;;  %v239_v27 = vsel %vm219_vm0, %v234_v19, %v238_v20  ;;  %v544_v33 = vsel %vm523_vm2, %v1859_v56, %v543_v26  ;;  %v1651_v56 = vld [vmem:[%s2071_s1 + $0x160] sm:$0xff]  ;;  %v880_v7 = vrot.slane %v2003_v57, 3 }
  0x24   : > { %299 = vmatpush.bf16.msra.mxu0 %v1615_v32  ;;  %1691 = vmatpush.bf16.msra.mxu1 %v1615_v32  ;;  %v419_v32 = vsel %vm414_vm1, %v416_v52, %v418_v25  ;;  %v1712_v52 = vld [vmem:[%s1789_s14 + $0x4] sm:$0x8] }
  0x25   : > { %477 = vmatpush.bf16.msra.mxu2 %v1623_v36  ;;  %v1607_v36 = vld [vmem:[%s2071_s1 + $0x8] sm:$0xff] }
  0x26   : > { %602 = vmatpush.bf16.msra.mxu3 %v1631_v38  ;;  %v1640_v38 = vld [vmem:[%s2071_s1 + $0x108] sm:$0xff] }
  0x28   : > { %300 = vmatpush.bf16.msra.mxu0 %v1614_v44  ;;  %1692 = vmatpush.bf16.msra.mxu1 %v1614_v44  ;;  %v1639_v44 = vld [vmem:[%s2071_s1 + $0x100] sm:$0xff] }
  0x29   : > { %478 = vmatpush.bf16.msra.mxu2 %v1622_v51  ;;  %v1679_v51 = vld [vmem:[%s2071_s1 + $0x230] sm:$0xff] }
  0x2a   : > { %603 = vmatpush.bf16.msra.mxu3 %v1630_v53  ;;  %v1663_v53 = vld [vmem:[%s2071_s1 + $0x1c0] sm:$0xff] }
  0x2b   : > { %301 = vmatmul.bf16.vlgmr.msra.gmra.mxu0 %v231_v58  ;;  %311 = vmatmul.bf16.vlgmr.msra.gmra.mxu1 %v240_v50  ;;  %v1653_v50 = vld [vmem:[%s2071_s1 + $0x170] sm:$0xff]  ;;  %v1677_v58 = vld [vmem:[%s2071_s1 + $0x220] sm:$0xff] }
  0x2c   : > { %367 = vmatpush.bf16.msrb.mxu1 %v1613_v48  ;;  %709 = vmatpush.bf16.msrb.mxu0 %v1646_v49  ;;  %v1664_v48 = vld [vmem:[%s2071_s1 + $0x1c8] sm:$0xff]  ;;  %v1655_v49 = vld [vmem:[%s2071_s1 + $0x180] sm:$0xff] }
  0x2d   : > { %935 = vmatpush.bf16.msrb.mxu2 %v1662_v59  ;;  %604 = vmatmul.bf16.vlgmr.msra.gmra.mxu3 %v535_v0  ;;  %v761_v59 = vshll.u32 %v2003_v57, 16  ;;  %v1676_v0 = vld [vmem:[%s2071_s1 + $0x218] sm:$0xff] }
  0x2e   : > { %1051 = vmatpush.bf16.msrb.mxu3 %v1670_v60  ;;  %479 = vmatmul.bf16.vlgmr.msra.gmra.mxu2 %v417_v63  ;;  %v765_v60 = vshrl.u32 %v2003_v57, 16  ;;  %v1650_v63 = vld [vmem:[%s2071_s1 + $0x158] sm:$0xff] }
  0x30   : > { %368 = vmatpush.bf16.msrb.mxu1 %v1612_v61  ;;  %710 = vmatpush.bf16.msrb.mxu0 %v1645_v62  ;;  %v987_v3 = vrot.slane %v765_v60, 3 }
  0x31   : > { %936 = vmatpush.bf16.msrb.mxu2 %v1661_v2 }
  0x32   : > { %1052 = vmatpush.bf16.msrb.mxu3 %v1669_v4  ;;  %v988_v4 = vrot.slane %v761_v59, 4 }
  0x34   : > { %369 = vmatpush.bf16.msrb.mxu1 %v1611_v5  ;;  %711 = vmatpush.bf16.msrb.mxu0 %v1644_v6  ;;  %v1649_v5 = vld [vmem:[%s2071_s1 + $0x150] sm:$0xff]  ;;  %v989_v10 = vor.u32 %v988_v4, %v987_v3 }
  0x35   : > { %937 = vmatpush.bf16.msrb.mxu2 %v1660_v11  ;;  %v1648_v11 = vld [vmem:[%s2071_s1 + $0x148] sm:$0xff] }
  0x36   : > { %1053 = vmatpush.bf16.msrb.mxu3 %v1668_v12  ;;  %v875_v12 = vunpack.c.h.b16 %v1843_v47  ;;  %v628_v47 = vld [vmem:[%s1789_s14 + $0x14] sm:$0x1] }
  0x38   : > { %370 = vmatpush.bf16.msrb.mxu1 %v1610_v13  ;;  %712 = vmatpush.bf16.msrb.mxu0 %v1643_v14  ;;  %v1674_v14 = vld [vmem:[%s2071_s1 + $0x208] sm:$0xff] }
  0x39   : > { %938 = vmatpush.bf16.msrb.mxu2 %v1659_v21  ;;  %v654_v21 = vunpack.c.l.b16 %v628_v47 }
  0x3a   : > { %1054 = vmatpush.bf16.msrb.mxu3 %v1667_v29 }
  0x3b   : > { %306 = vmatmul.bf16.gmra.mxu0 %v239_v27 }
  0x3c   : > { %371 = vmatpush.bf16.msrb.mxu1 %v1609_v22  ;;  %713 = vmatpush.bf16.msrb.mxu0 %v1642_v24 }
  0x3d   : > { %939 = vmatpush.bf16.msrb.mxu2 %v1658_v28  ;;  %609 = vmatmul.bf16.gmra.mxu3 %v544_v33  ;;  %v756_v28 = vshll.u32 %v1957_v40, 16 }
  0x3e   : > { %484 = vmatmul.bf16.gmra.mxu2 %v419_v32  ;;  %1055 = vmatpush.bf16.msrb.mxu3 %v1666_v34  ;;  %v763_v34 = vrot.slane %v761_v59, 1 }
  0x3f   : > { %v758_v32 = vrot.slane %v756_v28, 1 }
  0x40   : > { %372 = vmatpush.bf16.msrb.mxu1 %v1608_v30  ;;  %714 = vmatpush.bf16.msrb.mxu0 %v1641_v31  ;;  %v754_v31 = vshrl.u32 %v1957_v40, 16 }
  0x41   : > { %940 = vmatpush.bf16.msrb.mxu2 %v1657_v35  ;;  %v1671_v35 = vld [vmem:[%s1789_s14 + $0x8] sm:$0xff] }
  0x42   : > { %1056 = vmatpush.bf16.msrb.mxu3 %v1665_v39  ;;  %v759_v33 = vor.u32 %v758_v32, %v754_v31  ;;  %v1710_v32 = vld [vmem:[%s2072_s2] ss:$0 sm:$0xff] }
  0x44   : > { %373 = vmatpush.bf16.msrb.mxu1 %v1607_v36  ;;  %715 = vmatpush.bf16.msrb.mxu0 %v1640_v38  ;;  %v767_v38 = vor.u32 %v765_v60, %v763_v34 }
  0x45   : > { %941 = vmatpush.bf16.msrb.mxu2 %v1656_v42 }
  0x46   : > { %1057 = vmatpush.bf16.msrb.mxu3 %v1664_v48 }
  0x48   : > { %374 = vmatpush.bf16.msrb.mxu1 %v1606_v43  ;;  %716 = vmatpush.bf16.msrb.mxu0 %v1639_v44  ;;  %v1672_v43 = vld [vmem:[%s1789_s14 + $0x10] sm:$0xff] }
  0x49   : > { %942 = vmatpush.bf16.msrb.mxu2 %v1655_v49 }
  0x4a   : > { %1058 = vmatpush.bf16.msrb.mxu3 %v1663_v53 }
  0x4b   : > { %375 = vmatmul.bf16.vlgmr.msrb.gmra.mxu1 %v1799_v15  ;;  %717 = vmatmul.bf16.vlgmr.msrb.gmra.mxu0 %v1957_v40  ;;  %v1713_v15 = vor.u32 %v1712_v52, %v1711_v41  ;;  %v1083_v40 = vld [vmem:[%s1789_s14 + $0x18] sm:$0x1] }
  0x4c   : > { %826 = vmatpush.bf16.msra.mxu1 %v1654_v45  ;;  %1164 = vmatpush.bf16.msra.mxu0 %v1680_v46  ;;  %v1109_v42 = vunpack.c.l.b16 %v1083_v40 }
  0x4d   : > { %1693 = vmatpush.bf16.msra.mxu2 %v1680_v46  ;;  %614 = vmatmul.bf16.gmra.mxu3 %v1908_v17  ;;  %v980_v61 = vshrl.u32 %v1713_v15, 16  ;;  %v983_v62 = vshll.u32 %v1713_v15, 16  ;;  %v879_v6 = vrot.slane %v1713_v15, 3  ;;  %v877_v17 = vpack.c.b16 %v875_v12, %v875_v12 }
  0x4e   : > { %489 = vmatmul.bf16.gmra.mxu2 %v418_v25  ;;  %v657_v25 = vpack.c.b16 %v654_v21, %v654_v21  ;;  %v1112_v44 = vpack.c.b16 %v1109_v42, %v1109_v42 }
  0x4f   : > { %v982_v1 = vrot.slane %v980_v61, 3  ;;  %v985_v2 = vrot.slane %v983_v62, 4  ;;  %v992_v19 = vshrl.u32 %v877_v17, 16  ;;  %v995_v20 = vshll.u32 %v877_v17, 16 }
  0x50   : > { %827 = vmatpush.bf16.msra.mxu1 %v1653_v50  ;;  %1165 = vmatpush.bf16.msra.mxu0 %v1679_v51  ;;  %v882_v26 = vrot.slane %v877_v17, 3  ;;  %v769_v36 = vshll.u32 %v657_v25, 16  ;;  %v773_v45 = vshrl.u32 %v657_v25, 16 }
  0x51   : > { %1694 = vmatpush.bf16.msra.mxu2 %v1679_v51  ;;  %v986_v9 = vor.u32 %v985_v2, %v982_v1  ;;  %v994_v22 = vrot.slane %v992_v19, 3  ;;  %v997_v24 = vrot.slane %v995_v20, 4 }
  0x52   : > { %v883_v29 = vsel %vm878_vm3, %v880_v7, %v882_v26  ;;  %v771_v39 = vrot.slane %v769_v36, 1 }
  0x53   : > { %v990_v13 = vsel %vm523_vm2, %v986_v9, %v989_v10  ;;  %v998_v27 = vor.u32 %v997_v24, %v994_v22 }
  0x54   : > { %828 = vmatpush.bf16.msra.mxu1 %v1652_v54  ;;  %1166 = vmatpush.bf16.msra.mxu0 %v1678_v55  ;;  %v772_v41 = vsel %vm219_vm0, %v767_v38, %v771_v39 }
  0x55   : > { %1695 = vmatpush.bf16.msra.mxu2 %v1678_v55  ;;  %v999_v30 = vsel %vm523_vm2, %v989_v10, %v998_v27 }
  0x58   : > { %829 = vmatpush.bf16.msra.mxu1 %v1651_v56  ;;  %1167 = vmatpush.bf16.msra.mxu0 %v1677_v58 }
  0x59   : > { %1696 = vmatpush.bf16.msra.mxu2 %v1677_v58 }
  0x5b   : > { %380 = vmatmul.bf16.gmra.mxu1 %v1814_v23  ;;  %722 = vmatmul.bf16.gmra.mxu0 %v2003_v57  ;;  %v881_v23 = vsel %vm878_vm3, %v879_v6, %v880_v7 }
  0x5c   : > { %830 = vmatpush.bf16.msra.mxu1 %v1650_v63  ;;  %1168 = vmatpush.bf16.msra.mxu0 %v1676_v0 }
  0x5d   : > { %1697 = vmatpush.bf16.msra.mxu2 %v1676_v0  ;;  %1059 = vmatmul.bf16.vlgmr.msrb.gmra.mxu3 %v990_v13 }
  0x5e   : > { %943 = vmatmul.bf16.vlgmr.msrb.gmra.mxu2 %v881_v23 }
  0x60   : > { %831 = vmatpush.bf16.msra.mxu1 %v1649_v5  ;;  %1169 = vmatpush.bf16.msra.mxu0 %v1675_v8 }
  0x61   : > { %1698 = vmatpush.bf16.msra.mxu2 %v1675_v8 }
  0x64   : > { %832 = vmatpush.bf16.msra.mxu1 %v1648_v11  ;;  %1170 = vmatpush.bf16.msra.mxu0 %v1674_v14 }
  0x65   : > { %1699 = vmatpush.bf16.msra.mxu2 %v1674_v14 }
  0x68   : > { %833 = vmatpush.bf16.msra.mxu1 %v1647_v16  ;;  %1171 = vmatpush.bf16.msra.mxu0 %v1673_v18 }
  0x69   : > { %1700 = vmatpush.bf16.msra.mxu2 %v1673_v18 }
  0x6b   : > { %385 = vmatmul.bf16.gmra.mxu1 %v1832_v37  ;;  %727 = vmatmul.bf16.gmra.mxu0 %v657_v25  ;;  %v764_v37 = vsel %vm219_vm0, %v759_v33, %v763_v34 }
  0x6d   : > { %1064 = vmatmul.bf16.gmra.mxu3 %v999_v30 }
  0x6e   : > { %948 = vmatmul.bf16.gmra.mxu2 %v883_v29 }
  0x7b   : > { %834 = vmatmul.bf16.vlgmr.msra.gmra.mxu1 %v764_v37  ;;  %1172 = vmatmul.bf16.vlgmr.msra.gmra.mxu0 %v1671_v35 }
  0x7d   : > { %1069 = vmatmul.bf16.gmra.mxu3 %v994_v22 }
  0x7e   : > { %953 = vmatmul.bf16.gmra.mxu2 %v882_v26 }
  0x8b   : > { %839 = vmatmul.bf16.gmra.mxu1 %v772_v41  ;;  %1177 = vmatmul.bf16.gmra.mxu0 %v1672_v43 }
  0x8e   : > { %1182 = vmatmul.bf16.vlgmr.msra.gmra.mxu2 %v1112_v44 }
  0x9b   : > { %844 = vmatmul.bf16.gmra.mxu1 %v773_v45 }
  0xa8   : > { %v302_v46 = vpop.f32.mrf.mxu0  ;;  %v312_v48 = vpop.f32.mrf.mxu1 }
  0xb0   : > { %v304_v49 = vpop.f32.mrf.mxu0  ;;  %v314_v50 = vpop.f32.mrf.mxu1 }
  0xb1   : > { %v480_v51 = vpop.f32.mrf.mxu2  ;;  %v605_v52 = vpop.f32.mrf.mxu3 }
  0xb8   : > { %v307_v53 = vpop.f32.mrf.mxu0 }
  0xb9   : > { %v482_v54 = vpop.f32.mrf.mxu2  ;;  %v607_v55 = vpop.f32.mrf.mxu3 }
  0xc0   : > { %v309_v15 = vpop.f32.mrf.mxu0 }
  0xc1   : > { %v485_v56 = vpop.f32.mrf.mxu2  ;;  %v610_v57 = vpop.f32.mrf.mxu3 }
  0xc8   : > { %v376_v58 = vpop.f32.mrf.mxu1  ;;  %v718_v59 = vpop.f32.mrf.mxu0 }
  0xc9   : > { %v487_v60 = vpop.f32.mrf.mxu2  ;;  %v612_v61 = vpop.f32.mrf.mxu3  ;;  %v377_v11 = vadd.f32 %v376_v58, %v302_v46 }
  0xcb   : > { %v494_v14 = vadd.f32 %v480_v51, %v377_v11 }
  0xcd   : > { %v619_v17 = vadd.f32 %v605_v52, %v494_v14 }
  0xcf   : > { %v732_v21 = vadd.f32 %v718_v59, %v619_v17 }
  0xd0   : > { %v378_v62 = vpop.f32.mrf.mxu1  ;;  %v720_v63 = vpop.f32.mrf.mxu0 }
  0xd1   : > { %v490_v0 = vpop.f32.mrf.mxu2  ;;  %v615_v1 = vpop.f32.mrf.mxu3  ;;  %v379_v47 = vadd.f32 %v378_v62, %v304_v49 }
  0xd3   : > { %v495_v22 = vadd.f32 %v482_v54, %v379_v47 }
  0xd5   : > { %v620_v26 = vadd.f32 %v607_v55, %v495_v22 }
  0xd7   : > { %v733_v34 = vadd.f32 %v720_v63, %v620_v26 }
  0xd8   : > { %v381_v2 = vpop.f32.mrf.mxu1  ;;  %v723_v3 = vpop.f32.mrf.mxu0 }
  0xd9   : > { %v492_v4 = vpop.f32.mrf.mxu2  ;;  %v617_v5 = vpop.f32.mrf.mxu3  ;;  %v382_v27 = vadd.f32 %v381_v2, %v307_v53 }
  0xdb   : > { %v496_v37 = vadd.f32 %v485_v56, %v382_v27 }
  0xdd   : > { %v621_v40 = vadd.f32 %v610_v57, %v496_v37 }
  0xdf   : > { %v734_v49 = vadd.f32 %v723_v3, %v621_v40 }
  0xe0   : > { %v383_v6 = vpop.f32.mrf.mxu1  ;;  %v725_v7 = vpop.f32.mrf.mxu0 }
  0xe1   : > { %v944_v8 = vpop.f32.mrf.mxu2  ;;  %v1060_v9 = vpop.f32.mrf.mxu3  ;;  %v384_v41 = vadd.f32 %v383_v6, %v309_v15 }
  0xe3   : > { %v497_v50 = vadd.f32 %v487_v60, %v384_v41 }
  0xe5   : > { %v622_v55 = vadd.f32 %v612_v61, %v497_v50 }
  0xe7   : > { %v735_v63 = vadd.f32 %v725_v7, %v622_v55 }
  0xe8   : > { %v386_v10 = vpop.f32.mrf.mxu1  ;;  %v728_v12 = vpop.f32.mrf.mxu0 }
  0xe9   : > { %v946_v23 = vpop.f32.mrf.mxu2  ;;  %v1062_v13 = vpop.f32.mrf.mxu3 }
  0xf0   : > { %v388_v16 = vpop.f32.mrf.mxu1  ;;  %v730_v18 = vpop.f32.mrf.mxu0 }
  0xf1   : > { %v949_v19 = vpop.f32.mrf.mxu2  ;;  %v1065_v20 = vpop.f32.mrf.mxu3 }
  0xf8   : > { %v835_v24 = vpop.f32.mrf.mxu1  ;;  %v1173_v29 = vpop.f32.mrf.mxu0 }
  0xf9   : > { %v849_v25 = vadd.f32 %v835_v24, %v732_v21  ;;  %v951_v30 = vpop.f32.mrf.mxu2  ;;  %v1067_v33 = vpop.f32.mrf.mxu3 }
  0xfb   : > { %v958_v28 = vadd.f32 %v944_v8, %v849_v25 }
  0xfd   : > { %v1074_v31 = vadd.f32 %v1060_v9, %v958_v28 }
  0xff   : > { %v1187_v35 = vadd.f32 %v1173_v29, %v1074_v31 }
 0x100   : > { %v837_v36 = vpop.f32.mrf.mxu1  ;;  %v1175_v44 = vpop.f32.mrf.mxu0 }
 0x101   : > { %v1196_v38 = vadd.f32 %v1710_v32, %v1187_v35  ;;  %v850_v39 = vadd.f32 %v837_v36, %v733_v34  ;;  %v954_v45 = vpop.f32.mrf.mxu2  ;;  %v1070_v48 = vpop.f32.mrf.mxu3 }
 0x103   : > { %v1201_v42 = vmax.f32 %v1196_v38, 0.0  ;;  %v959_v43 = vadd.f32 %v946_v23, %v850_v39 }
 0x105   : > { %1206 = vst [vmem:[#allocation2] sm:$0xff] %v1201_v42  ;;  %v1075_v46 = vadd.f32 %v1062_v13, %v959_v43 }
 0x107   : > { %v1188_v51 = vadd.f32 %v1175_v44, %v1075_v46 }
 0x108   : > { %v840_v52 = vpop.f32.mrf.mxu1  ;;  %v1178_v59 = vpop.f32.mrf.mxu0 }
 0x109   : > { %v1197_v53 = vadd.f32 %v1710_v32, %v1188_v51  ;;  %v851_v54 = vadd.f32 %v840_v52, %v734_v49  ;;  %v956_v62 = vpop.f32.mrf.mxu2  ;;  %v1072_v57 = vpop.f32.mrf.mxu3 }
 0x10b   : > { %v1202_v56 = vmax.f32 %v1197_v53, 0.0  ;;  %v960_v58 = vadd.f32 %v949_v19, %v851_v54 }
 0x10c   : > { %v1211_v14 = vld [vmem:[#allocation2] ss:$2 sm:$0x3]  ;;  %v1213_v47 = vld [vmem:[#allocation2 + $0x1] ss:$2 sm:$0x3] }
 0x10d   : > { %1207 = vst [vmem:[#allocation2 + $0x8] sm:$0xff] %v1202_v56  ;;  %v1076_v15 = vadd.f32 %v1065_v20, %v960_v58  ;;  %v1214_v24 = vmax.f32 %v1211_v14, %v1213_v47 }
 0x10f   : > { %v1189_v0 = vadd.f32 %v1178_v59, %v1076_v15 }
 0x110   : > { %v842_v1 = vpop.f32.mrf.mxu1  ;;  %v1180_v8 = vpop.f32.mrf.mxu0 }
 0x111   : > { %v1198_v2 = vadd.f32 %v1710_v32, %v1189_v0  ;;  %v852_v4 = vadd.f32 %v842_v1, %v735_v63  ;;  %v1183_v60 = vpop.f32.mrf.mxu2 }
 0x113   : > { %v1203_v5 = vmax.f32 %v1198_v2, 0.0  ;;  %v961_v3 = vadd.f32 %v951_v30, %v852_v4 }
 0x114   : > { %v1216_v13 = vld [vmem:[#allocation2 + $0x7] ss:$2 sm:$0x3]  ;;  %v1218_v7 = vld [vmem:[#allocation2 + $0x8] ss:$2 sm:$0x3] }
 0x115   : > { %1208 = vst [vmem:[#allocation2 + $0x10] sm:$0xff] %v1203_v5  ;;  %v1077_v6 = vadd.f32 %v1067_v33, %v961_v3  ;;  %v1219_v20 = vmax.f32 %v1216_v13, %v1218_v7 }
 0x117   : > { %v1190_v9 = vadd.f32 %v1180_v8, %v1077_v6  ;;  %v1220_v26 = vmax.f32 %v1214_v24, %v1219_v20 }
 0x118   : > { %v845_v61 = vpop.f32.mrf.mxu1 }
 0x119   : > { %v1199_v10 = vadd.f32 %v1710_v32, %v1190_v9  ;;  %v1185_v12 = vpop.f32.mrf.mxu2 }
 0x11b   : > { %v1204_v11 = vmax.f32 %v1199_v10, 0.0 }
 0x11c   : > { %v1222_v16 = vld [vmem:[#allocation2 + $0xe] ss:$2 sm:$0x3]  ;;  %v1224_v17 = vld [vmem:[#allocation2 + $0xf] ss:$2 sm:$0x3] }
 0x11d   : > { %1209 = vst [vmem:[#allocation2 + $0x18] sm:$0xff] %v1204_v11  ;;  %v1227_v18 = vld [vmem:[#allocation2 + $0x15] ss:$2 sm:$0x3]  ;;  %v1225_v21 = vmax.f32 %v1222_v16, %v1224_v17 }
 0x120   : > { %v847_v23 = vpop.f32.mrf.mxu1 }
 0x124   : > { %v1229_v19 = vld [vmem:[#allocation2 + $0x16] ss:$2 sm:$0x3] }
 0x125   : > { %v1230_v22 = vmax.f32 %v1227_v18, %v1229_v19 }
 0x127   : > { %v1231_v25 = vmax.f32 %v1225_v21, %v1230_v22 }
 0x129   : > { %v1233_v27 = vrot.slane %v1231_v25, 6 }
 0x12b   : > { %v1236_v28 = vsel %vm1235_vm4, %v1220_v26, %v1233_v27 }
 0x12c   : > { %v1237_v29 = vpack.c.bf16 %v1236_v28, %v1236_v28 }
 0x12e   : > { %1238 = vst [vmem:[%s168_s21] sm:$0x3] %v1237_v29 }
 0x12f PF: > { %s13_s12 = sadd.s32 1, %s1720_s12  }
 0x130   : > { %p10_p4 = scmp.ge.s32.totalorder %s13_s12, 4  }
 0x132   :  { %12 = sbr.rel (!%p10_p4) target bundleno = 1 (0x1), region = 69 }

// kernel: sakiko_forward.6
= control target key start
LH: loop header
LB: loop body
LE: loop exit
PB: predicated region body
PF: predicated region fallthrough
CT: control target
= control target key end

     0   :  { %s1737_s12 = smov 0   ;;  %s1739_s13 = smov 0   ;;  %s2117_s0 = inlined_call_operand.vmem [shape: bf16[128,256], index: 0, kind: input, shape index: {}]   ;;  %s2118_s1 = inlined_call_operand.vmem [shape: bf16[256,512], index: 1, kind: input, shape index: {}]   ;;  %s2119_s2 = inlined_call_operand.vmem [shape: f32[1,512], index: 2, kind: input, shape index: {}]   ;;  %s2120_s3 = inlined_call_operand.vmem [shape: bf16[128,512], index: 3, kind: output, shape index: {}]  }
   0x1   :  { %s1741_s14 = smov 0   ;;  %s1743_s15 = smov 0  }
   0x2   :  { %s1745_s16 = smov 0  }
   0x3 LB: > { %s28_s17 = sadd.s32 1, %s1711_s15  ;;  %s1378_s18 = sadd.s32 4294967295, %s1715_s16   ;;  %s1715_s16 = sphi %s1745_s16, %s13_s16   ;;  %s1711_s15 = sphi %s1743_s15, %s2125_s15   ;;  %s1707_s14 = sphi %s1741_s14, %s2124_s14   ;;  %s1703_s13 = sphi %s1739_s13, %s2123_s13   ;;  %s1699_s12 = sphi %s1737_s12, %s2122_s12  }
   0x4   : > { %p30_p0 = scmp.ge.s32.totalorder %s28_s17, 2  ;;  %p76_p1 = scmp.ne.s32.totalorder %s1703_s13, %s1699_s12 }
   0x5   : > { %p77_p2 = scmp.eq.s32.totalorder %s1715_s16, 0  ;;  %p134_p4 = scmp.eq.s32.totalorder %s1378_s18, 1 }
   0x6   : > { %s2127_s17 = smov (%p30_p0, %s28_s17), 0  ;;  %s69_s20 = sadd.s32 1, %s1703_s13 }
   0x7   : > { %p78_p3 = por %p77_p2, %p76_p1  ;;  %s65_s19 = ssub.s32 %s1711_s15, %s2127_s17 }
   0x8   : > { %p67_p5 = scmp.eq.s32.totalorder %s65_s19, 0  ;;  %p1772_p6 = por %p134_p4, %p76_p1 }
   0x9   : > { %p1382_p7 = scmp.ge.s32.totalorder %s1715_s16, 2 }
   0xa   : > { %s1777_s22 = scalar_select %p67_p5, %s1703_s13, %s69_s20  }
   0xb   : > { %171 = sbr.rel (%p1382_p7) target bundleno = 52 (0x34), region = 20 }
  0x10   : > { %174 = sbr.rel (!%p78_p3) target bundleno = 52 (0x34), region = 24  ;;  %s176_s23 = sand.u32 (%p78_p3), 1, %s1703_s13  }
  0x11   : > { %s1587_s24 = sshll.u32 (%p78_p3), %s1711_s15, 3  ;;  %s1383_s25 = sshll.u32 (%p78_p3), %s176_s23, 8 }
  0x12   : > { %s1785_s28 = scalar_lea.vmem (%p78_p3), %s2118_s1, %s1587_s24  ;;  %s1790_s29 = scalar_lea.vmem (%p78_p3), [#allocation3], %s1383_s25 }
  0x13   : > { %v275_v0 = vld [vmem:[%s1785_s28] sm:$0xff] (%p78_p3)  ;;  %v277_v1 = vld [vmem:[%s1785_s28 + $0x10] sm:$0xff] (%p78_p3) }
  0x14   : > { %v279_v2 = vld [vmem:[%s1785_s28 + $0x20] sm:$0xff] (%p78_p3)  ;;  %276 = vst [vmem:[%s1790_s29] sm:$0xff] (%p78_p3), %v275_v0  ;;  %v281_v3 = vld [vmem:[%s1785_s28 + $0x30] sm:$0xff] (%p78_p3) }
  0x15   : > { %278 = vst [vmem:[%s1790_s29 + $0x8] sm:$0xff] %v277_v1  ;;  %v283_v4 = vld [vmem:[%s1785_s28 + $0x40] sm:$0xff]  ;;  %v285_v5 = vld [vmem:[%s1785_s28 + $0x50] sm:$0xff] }
  0x16   : > { %280 = vst [vmem:[%s1790_s29 + $0x10] sm:$0xff] %v279_v2  ;;  %v287_v6 = vld [vmem:[%s1785_s28 + $0x60] sm:$0xff]  ;;  %v289_v7 = vld [vmem:[%s1785_s28 + $0x70] sm:$0xff] }
  0x17   : > { %282 = vst [vmem:[%s1790_s29 + $0x18] sm:$0xff] %v281_v3  ;;  %v291_v8 = vld [vmem:[%s1785_s28 + $0x80] sm:$0xff]  ;;  %v293_v9 = vld [vmem:[%s1785_s28 + $0x90] sm:$0xff] }
  0x18   : > { %284 = vst [vmem:[%s1790_s29 + $0x20] sm:$0xff] %v283_v4  ;;  %v295_v10 = vld [vmem:[%s1785_s28 + $0xa0] sm:$0xff]  ;;  %v297_v11 = vld [vmem:[%s1785_s28 + $0xb0] sm:$0xff] }
  0x19   : > { %286 = vst [vmem:[%s1790_s29 + $0x28] sm:$0xff] %v285_v5  ;;  %v299_v12 = vld [vmem:[%s1785_s28 + $0xc0] sm:$0xff]  ;;  %v301_v13 = vld [vmem:[%s1785_s28 + $0xd0] sm:$0xff] }
  0x1a   : > { %288 = vst [vmem:[%s1790_s29 + $0x30] sm:$0xff] %v287_v6  ;;  %v303_v14 = vld [vmem:[%s1785_s28 + $0xe0] sm:$0xff]  ;;  %v305_v15 = vld [vmem:[%s1785_s28 + $0xf0] sm:$0xff] }
  0x1b   : > { %290 = vst [vmem:[%s1790_s29 + $0x38] sm:$0xff] %v289_v7  ;;  %v307_v16 = vld [vmem:[%s1785_s28 + $0x100] sm:$0xff]  ;;  %v309_v17 = vld [vmem:[%s1785_s28 + $0x110] sm:$0xff] }
  0x1c   : > { %292 = vst [vmem:[%s1790_s29 + $0x40] sm:$0xff] %v291_v8  ;;  %v311_v18 = vld [vmem:[%s1785_s28 + $0x120] sm:$0xff]  ;;  %v313_v19 = vld [vmem:[%s1785_s28 + $0x130] sm:$0xff] }
  0x1d   : > { %294 = vst [vmem:[%s1790_s29 + $0x48] sm:$0xff] %v293_v9  ;;  %v315_v20 = vld [vmem:[%s1785_s28 + $0x140] sm:$0xff]  ;;  %v317_v21 = vld [vmem:[%s1785_s28 + $0x150] sm:$0xff] }
  0x1e   : > { %296 = vst [vmem:[%s1790_s29 + $0x50] sm:$0xff] %v295_v10  ;;  %v319_v22 = vld [vmem:[%s1785_s28 + $0x160] sm:$0xff]  ;;  %v321_v23 = vld [vmem:[%s1785_s28 + $0x170] sm:$0xff] }
  0x1f   : > { %298 = vst [vmem:[%s1790_s29 + $0x58] sm:$0xff] %v297_v11  ;;  %v323_v24 = vld [vmem:[%s1785_s28 + $0x180] sm:$0xff]  ;;  %v325_v25 = vld [vmem:[%s1785_s28 + $0x190] sm:$0xff] }
  0x20   : > { %300 = vst [vmem:[%s1790_s29 + $0x60] sm:$0xff] %v299_v12  ;;  %v327_v26 = vld [vmem:[%s1785_s28 + $0x1a0] sm:$0xff]  ;;  %v329_v27 = vld [vmem:[%s1785_s28 + $0x1b0] sm:$0xff] }
  0x21   : > { %302 = vst [vmem:[%s1790_s29 + $0x68] sm:$0xff] %v301_v13  ;;  %v331_v28 = vld [vmem:[%s1785_s28 + $0x1c0] sm:$0xff]  ;;  %v333_v29 = vld [vmem:[%s1785_s28 + $0x1d0] sm:$0xff] }
  0x22   : > { %304 = vst [vmem:[%s1790_s29 + $0x70] sm:$0xff] %v303_v14  ;;  %v335_v30 = vld [vmem:[%s1785_s28 + $0x1e0] sm:$0xff]  ;;  %v337_v31 = vld [vmem:[%s1785_s28 + $0x1f0] sm:$0xff] }
  0x23   : > { %306 = vst [vmem:[%s1790_s29 + $0x78] sm:$0xff] %v305_v15 }
  0x24   : > { %308 = vst [vmem:[%s1790_s29 + $0x80] sm:$0xff] %v307_v16 }
  0x25   : > { %310 = vst [vmem:[%s1790_s29 + $0x88] sm:$0xff] %v309_v17 }
  0x26   : > { %312 = vst [vmem:[%s1790_s29 + $0x90] sm:$0xff] %v311_v18 }
  0x27   : > { %314 = vst [vmem:[%s1790_s29 + $0x98] sm:$0xff] %v313_v19 }
  0x28   : > { %316 = vst [vmem:[%s1790_s29 + $0xa0] sm:$0xff] %v315_v20 }
  0x29   : > { %318 = vst [vmem:[%s1790_s29 + $0xa8] sm:$0xff] %v317_v21 }
  0x2a   : > { %320 = vst [vmem:[%s1790_s29 + $0xb0] sm:$0xff] %v319_v22 }
  0x2b   : > { %322 = vst [vmem:[%s1790_s29 + $0xb8] sm:$0xff] %v321_v23 }
  0x2c   : > { %324 = vst [vmem:[%s1790_s29 + $0xc0] sm:$0xff] %v323_v24 }
  0x2d   : > { %326 = vst [vmem:[%s1790_s29 + $0xc8] sm:$0xff] %v325_v25 }
  0x2e   : > { %328 = vst [vmem:[%s1790_s29 + $0xd0] sm:$0xff] %v327_v26 }
  0x2f   : > { %330 = vst [vmem:[%s1790_s29 + $0xd8] sm:$0xff] %v329_v27 }
  0x30   : > { %332 = vst [vmem:[%s1790_s29 + $0xe0] sm:$0xff] %v331_v28 }
  0x31   : > { %334 = vst [vmem:[%s1790_s29 + $0xe8] sm:$0xff] %v333_v29 }
  0x32   : > { %336 = vst [vmem:[%s1790_s29 + $0xf0] sm:$0xff] %v335_v30 }
  0x33   : > { %338 = vst [vmem:[%s1790_s29 + $0xf8] sm:$0xff] %v337_v31 }
  0x34 PF: > { %p1386_p8 = scmp.ge.s32.totalorder %s1715_s16, 1  ;;  %p351_p9 = scmp.lt.s32.totalorder %s1715_s16, 3 }
  0x36   : > { %p352_p10 = pnand %p1386_p8, %p351_p9 }
  0x37   : > { %s358_s30 = sand.u32 (!%p352_p10), 1, %s1699_s12   ;;  %s1389_s24 = sshll.u32 (!%p352_p10), %s1707_s14, 1 }
  0x38   : > { %355 = sbr.rel (%p352_p10) target bundleno = 366 (0x16e), region = 66  ;;  %s1387_s4 = sshll.u32 (!%p352_p10), %s358_s30, 8 }
  0x39   : > { %s1858_s5 = scalar_lea.vmem (!%p352_p10), [#allocation3], %s1387_s4  ;;  %p409_p11 = scmp.lt.s32.totalorder (!%p352_p10), %s1389_s24, 3 }
  0x3a   : > { %s1388_s28 = sshll.u32 (!%p352_p10), %s358_s30, 7 }
  0x3b   : > { %s2032_s29 = scalar_lea.vmem (!%p352_p10), [#allocation4], %s1388_s28 }
  0x3d   : > { %v1512_v32 = vld [vmem:[%s1858_s5 + $0x70] sm:$0xf]  ;;  %v1619_v33 = vld [vmem:[%s1858_s5 + $0x74] sm:$0xf0]  ;;  %v1618_v37 = vld [vmem:[%s1858_s5 + $0x74] sm:$0xf] }
  0x3e   : > { %v1576_v34 = vld [vmem:[%s1858_s5 + $0xf0] sm:$0xf]  ;;  %v1513_v35 = vor.u32 %v1619_v33, %v1512_v32  ;;  %v1635_v36 = vld [vmem:[%s1858_s5 + $0xf4] sm:$0xf0]  ;;  %v1514_v38 = vld [vmem:[%s1858_s5 + $0x78] sm:$0xf0] }
  0x3f   : > { %v1577_v39 = vor.u32 %v1635_v36, %v1576_v34  ;;  %v1517_v40 = vor.u32 %v1618_v37, %v1514_v38  ;;  %v1634_v41 = vld [vmem:[%s1858_s5 + $0xf4] sm:$0xf]  ;;  %v1578_v42 = vld [vmem:[%s1858_s5 + $0xf8] sm:$0xf0]  ;;  %v1504_v43 = vld [vmem:[%s1858_s5 + $0x60] sm:$0xf] }
  0x40   : > { %771 = vmatpush.bf16.msra.mxu0 %v1513_v35  ;;  %v1581_v44 = vor.u32 %v1634_v41, %v1578_v42  ;;  %v1617_v45 = vld [vmem:[%s1858_s5 + $0x64] sm:$0xf0]  ;;  %v1568_v46 = vld [vmem:[%s1858_s5 + $0xe0] sm:$0xf]  ;;  %v1616_v50 = vld [vmem:[%s1858_s5 + $0x64] sm:$0xf] }
  0x41   : > { %v1633_v47 = vld [vmem:[%s1858_s5 + $0xe4] sm:$0xf0]  ;;  %820 = vmatpush.bf16.msra.mxu1 %v1577_v39  ;;  %869 = vmatpush.bf16.msra.mxu2 %v1517_v40  ;;  %v1505_v48 = vor.u32 %v1617_v45, %v1504_v43  ;;  %v1506_v51 = vld [vmem:[%s1858_s5 + $0x68] sm:$0xf0]  ;;  %v1632_v52 = vld [vmem:[%s1858_s5 + $0xe4] sm:$0xf] }
  0x42   : > { %v1569_v49 = vor.u32 %v1633_v47, %v1568_v46  ;;  %918 = vmatpush.bf16.msra.mxu3 %v1581_v44  ;;  %v1509_v53 = vor.u32 %v1616_v50, %v1506_v51  ;;  %v1570_v54 = vld [vmem:[%s1858_s5 + $0xe8] sm:$0xf0]  ;;  %v1496_v55 = vld [vmem:[%s1858_s5 + $0x50] sm:$0xf]  ;;  %v1615_v56 = vld [vmem:[%s1858_s5 + $0x54] sm:$0xf0] }
  0x43   : > { %v1573_v57 = vor.u32 %v1632_v52, %v1570_v54  ;;  %v1560_v58 = vld [vmem:[%s1858_s5 + $0xd0] sm:$0xf]  ;;  %v1631_v59 = vld [vmem:[%s1858_s5 + $0xd4] sm:$0xf0]  ;;  %v1614_v60 = vld [vmem:[%s1858_s5 + $0x54] sm:$0xf]  ;;  %v1497_v61 = vor.u32 %v1615_v56, %v1496_v55 }
  0x44   : > { %772 = vmatpush.bf16.msra.mxu0 %v1505_v48  ;;  %v1498_v62 = vld [vmem:[%s1858_s5 + $0x58] sm:$0xf0]  ;;  %v1630_v63 = vld [vmem:[%s1858_s5 + $0xd4] sm:$0xf]  ;;  %v1561_v1 = vor.u32 %v1631_v59, %v1560_v58  ;;  %v1488_v3 = vld [vmem:[%s1858_s5 + $0x40] sm:$0xf] }
  0x45   : > { %v1562_v0 = vld [vmem:[%s1858_s5 + $0xd8] sm:$0xf0]  ;;  %821 = vmatpush.bf16.msra.mxu1 %v1569_v49  ;;  %870 = vmatpush.bf16.msra.mxu2 %v1509_v53  ;;  %v1501_v2 = vor.u32 %v1614_v60, %v1498_v62  ;;  %v1613_v4 = vld [vmem:[%s1858_s5 + $0x44] sm:$0xf0]  ;;  %v1552_v5 = vld [vmem:[%s1858_s5 + $0xc0] sm:$0xf] }
  0x46   : > { %919 = vmatpush.bf16.msra.mxu3 %v1573_v57  ;;  %v1565_v6 = vor.u32 %v1630_v63, %v1562_v0  ;;  %v1629_v7 = vld [vmem:[%s1858_s5 + $0xc4] sm:$0xf0]  ;;  %v1612_v8 = vld [vmem:[%s1858_s5 + $0x44] sm:$0xf]  ;;  %v1490_v9 = vld [vmem:[%s1858_s5 + $0x48] sm:$0xf0]  ;;  %v1489_v12 = vor.u32 %v1613_v4, %v1488_v3 }
  0x47   : > { %v1628_v10 = vld [vmem:[%s1858_s5 + $0xc4] sm:$0xf]  ;;  %v1554_v11 = vld [vmem:[%s1858_s5 + $0xc8] sm:$0xf0]  ;;  %v1553_v13 = vor.u32 %v1629_v7, %v1552_v5  ;;  %v1493_v14 = vor.u32 %v1612_v8, %v1490_v9  ;;  %v1480_v15 = vld [vmem:[%s1858_s5 + $0x30] sm:$0xf] }
  0x48   : > { %773 = vmatpush.bf16.msra.mxu0 %v1497_v61  ;;  %v1611_v16 = vld [vmem:[%s1858_s5 + $0x34] sm:$0xf0]  ;;  %v1544_v17 = vld [vmem:[%s1858_s5 + $0xb0] sm:$0xf]  ;;  %v1557_v18 = vor.u32 %v1628_v10, %v1554_v11  ;;  %v1610_v20 = vld [vmem:[%s1858_s5 + $0x34] sm:$0xf] }
  0x49   : > { %822 = vmatpush.bf16.msra.mxu1 %v1561_v1  ;;  %871 = vmatpush.bf16.msra.mxu2 %v1501_v2  ;;  %v1627_v19 = vld [vmem:[%s1858_s5 + $0xb4] sm:$0xf0]  ;;  %v1482_v21 = vld [vmem:[%s1858_s5 + $0x38] sm:$0xf0]  ;;  %v1626_v22 = vld [vmem:[%s1858_s5 + $0xb4] sm:$0xf]  ;;  %v1481_v24 = vor.u32 %v1611_v16, %v1480_v15 }
  0x4a   : > { %920 = vmatpush.bf16.msra.mxu3 %v1565_v6  ;;  %v1546_v23 = vld [vmem:[%s1858_s5 + $0xb8] sm:$0xf0]  ;;  %v1545_v25 = vor.u32 %v1627_v19, %v1544_v17  ;;  %v1485_v26 = vor.u32 %v1610_v20, %v1482_v21  ;;  %v1472_v27 = vld [vmem:[%s1858_s5 + $0x20] sm:$0xf]  ;;  %v1609_v28 = vld [vmem:[%s1858_s5 + $0x24] sm:$0xf0] }
  0x4b   : > { %v1536_v29 = vld [vmem:[%s1858_s5 + $0xa0] sm:$0xf]  ;;  %v1549_v30 = vor.u32 %v1626_v22, %v1546_v23  ;;  %v1625_v31 = vld [vmem:[%s1858_s5 + $0xa4] sm:$0xf0]  ;;  %v1608_v32 = vld [vmem:[%s1858_s5 + $0x24] sm:$0xf]  ;;  %v1473_v36 = vor.u32 %v1609_v28, %v1472_v27 }
  0x4c   : > { %774 = vmatpush.bf16.msra.mxu0 %v1489_v12  ;;  %v1474_v33 = vld [vmem:[%s1858_s5 + $0x28] sm:$0xf0]  ;;  %v1624_v34 = vld [vmem:[%s1858_s5 + $0xa4] sm:$0xf]  ;;  %v1537_v37 = vor.u32 %v1625_v31, %v1536_v29  ;;  %v1464_v39 = vld [vmem:[%s1858_s5 + $0x10] sm:$0xf] }
  0x4d   : > { %823 = vmatpush.bf16.msra.mxu1 %v1553_v13  ;;  %872 = vmatpush.bf16.msra.mxu2 %v1493_v14  ;;  %v1538_v35 = vld [vmem:[%s1858_s5 + $0xa8] sm:$0xf0]  ;;  %v1477_v38 = vor.u32 %v1608_v32, %v1474_v33  ;;  %v1607_v40 = vld [vmem:[%s1858_s5 + $0x14] sm:$0xf0]  ;;  %v1528_v41 = vld [vmem:[%s1858_s5 + $0x90] sm:$0xf] }
  0x4e   : > { %921 = vmatpush.bf16.msra.mxu3 %v1557_v18  ;;  %v1541_v42 = vor.u32 %v1624_v34, %v1538_v35  ;;  %v1623_v43 = vld [vmem:[%s1858_s5 + $0x94] sm:$0xf0]  ;;  %v1606_v44 = vld [vmem:[%s1858_s5 + $0x14] sm:$0xf]  ;;  %v1466_v45 = vld [vmem:[%s1858_s5 + $0x18] sm:$0xf0]  ;;  %v1465_v48 = vor.u32 %v1607_v40, %v1464_v39 }
  0x4f   : > { %v1622_v46 = vld [vmem:[%s1858_s5 + $0x94] sm:$0xf]  ;;  %v1530_v47 = vld [vmem:[%s1858_s5 + $0x98] sm:$0xf0]  ;;  %v1529_v49 = vor.u32 %v1623_v43, %v1528_v41  ;;  %v1469_v50 = vor.u32 %v1606_v44, %v1466_v45  ;;  %v1456_v51 = vld [vmem:[%s1858_s5] sm:$0xf] }
  0x50   : > { %775 = vmatpush.bf16.msra.mxu0 %v1481_v24  ;;  %v1605_v52 = vld [vmem:[%s1858_s5 + $0x4] sm:$0xf0]  ;;  %v1520_v53 = vld [vmem:[%s1858_s5 + $0x80] sm:$0xf]  ;;  %v1533_v54 = vor.u32 %v1622_v46, %v1530_v47  ;;  %v1604_v56 = vld [vmem:[%s1858_s5 + $0x4] sm:$0xf] }
  0x51   : > { %824 = vmatpush.bf16.msra.mxu1 %v1545_v25  ;;  %873 = vmatpush.bf16.msra.mxu2 %v1485_v26  ;;  %v1621_v55 = vld [vmem:[%s1858_s5 + $0x84] sm:$0xf0]  ;;  %v1458_v57 = vld [vmem:[%s1858_s5 + $0x8] sm:$0xf0]  ;;  %v1620_v58 = vld [vmem:[%s1858_s5 + $0x84] sm:$0xf]  ;;  %v1457_v60 = vor.u32 %v1605_v52, %v1456_v51 }
  0x52   : > { %922 = vmatpush.bf16.msra.mxu3 %v1549_v30  ;;  %v1522_v59 = vld [vmem:[%s1858_s5 + $0x88] sm:$0xf0]  ;;  %v1392_v61 = vld [vmem:[%s2117_s0] sm:$0xf]  ;;  %v1589_v62 = vld [vmem:[%s2117_s0 + $0x4] sm:$0xf0]  ;;  %v1521_v63 = vor.u32 %v1621_v55, %v1520_v53  ;;  %v1461_v0 = vor.u32 %v1604_v56, %v1458_v57 }
  0x53   : > { %v1588_v1 = vld [vmem:[%s2117_s0 + $0x4] sm:$0xf]  ;;  %v1394_v2 = vld [vmem:[%s2117_s0 + $0x8] sm:$0xf0]  ;;  %v1525_v3 = vor.u32 %v1620_v58, %v1522_v59  ;;  %v1393_v4 = vor.u32 %v1589_v62, %v1392_v61  ;;  %v1400_v6 = vld [vmem:[%s2117_s0 + $0x10] sm:$0xf] }
  0x54   : > { %776 = vmatpush.bf16.msra.mxu0 %v1473_v36  ;;  %v1397_v5 = vor.u32 %v1588_v1, %v1394_v2  ;;  %v1591_v7 = vld [vmem:[%s2117_s0 + $0x14] sm:$0xf0]  ;;  %v1590_v8 = vld [vmem:[%s2117_s0 + $0x14] sm:$0xf]  ;;  %v1402_v9 = vld [vmem:[%s2117_s0 + $0x18] sm:$0xf0] }
  0x55   : > { %825 = vmatpush.bf16.msra.mxu1 %v1537_v37  ;;  %874 = vmatpush.bf16.msra.mxu2 %v1477_v38  ;;  %v1401_v10 = vor.u32 %v1591_v7, %v1400_v6  ;;  %v1405_v11 = vor.u32 %v1590_v8, %v1402_v9  ;;  %v1408_v12 = vld [vmem:[%s2117_s0 + $0x20] sm:$0xf]  ;;  %v1593_v13 = vld [vmem:[%s2117_s0 + $0x24] sm:$0xf0]  ;;  %v1592_v14 = vld [vmem:[%s2117_s0 + $0x24] sm:$0xf] }
  0x56   : > { %923 = vmatpush.bf16.msra.mxu3 %v1541_v42  ;;  %v1410_v15 = vld [vmem:[%s2117_s0 + $0x28] sm:$0xf0]  ;;  %v1409_v16 = vor.u32 %v1593_v13, %v1408_v12  ;;  %v1416_v18 = vld [vmem:[%s2117_s0 + $0x30] sm:$0xf]  ;;  %v1595_v19 = vld [vmem:[%s2117_s0 + $0x34] sm:$0xf0] }
  0x57   : > { %v1413_v17 = vor.u32 %v1592_v14, %v1410_v15  ;;  %v1594_v20 = vld [vmem:[%s2117_s0 + $0x34] sm:$0xf]  ;;  %v1418_v21 = vld [vmem:[%s2117_s0 + $0x38] sm:$0xf0]  ;;  %v1417_v22 = vor.u32 %v1595_v19, %v1416_v18  ;;  %v1424_v24 = vld [vmem:[%s2117_s0 + $0x40] sm:$0xf] }
  0x58   : > { %777 = vmatpush.bf16.msra.mxu0 %v1465_v48  ;;  %v1421_v23 = vor.u32 %v1594_v20, %v1418_v21  ;;  %v1597_v25 = vld [vmem:[%s2117_s0 + $0x44] sm:$0xf0]  ;;  %v1596_v26 = vld [vmem:[%s2117_s0 + $0x44] sm:$0xf]  ;;  %v1426_v27 = vld [vmem:[%s2117_s0 + $0x48] sm:$0xf0] }
  0x59   : > { %826 = vmatpush.bf16.msra.mxu1 %v1529_v49  ;;  %875 = vmatpush.bf16.msra.mxu2 %v1469_v50  ;;  %v1425_v28 = vor.u32 %v1597_v25, %v1424_v24  ;;  %v1429_v29 = vor.u32 %v1596_v26, %v1426_v27  ;;  %v1432_v30 = vld [vmem:[%s2117_s0 + $0x50] sm:$0xf]  ;;  %v1599_v31 = vld [vmem:[%s2117_s0 + $0x54] sm:$0xf0]  ;;  %v1598_v32 = vld [vmem:[%s2117_s0 + $0x54] sm:$0xf] }
  0x5a   : > { %924 = vmatpush.bf16.msra.mxu3 %v1533_v54  ;;  %v1434_v33 = vld [vmem:[%s2117_s0 + $0x58] sm:$0xf0]  ;;  %v1433_v34 = vor.u32 %v1599_v31, %v1432_v30  ;;  %v1440_v36 = vld [vmem:[%s2117_s0 + $0x60] sm:$0xf]  ;;  %v1601_v37 = vld [vmem:[%s2117_s0 + $0x64] sm:$0xf0] }
  0x5b   : > { %v1437_v35 = vor.u32 %v1598_v32, %v1434_v33  ;;  %v1600_v38 = vld [vmem:[%s2117_s0 + $0x64] sm:$0xf]  ;;  %v1442_v39 = vld [vmem:[%s2117_s0 + $0x68] sm:$0xf0]  ;;  %v1441_v40 = vor.u32 %v1601_v37, %v1440_v36  ;;  %v1448_v42 = vld [vmem:[%s2117_s0 + $0x70] sm:$0xf] }
  0x5c   : > { %778 = vmatpush.bf16.msra.mxu0 %v1457_v60  ;;  %v1445_v41 = vor.u32 %v1600_v38, %v1442_v39  ;;  %v1603_v43 = vld [vmem:[%s2117_s0 + $0x74] sm:$0xf0]  ;;  %v1602_v44 = vld [vmem:[%s2117_s0 + $0x74] sm:$0xf]  ;;  %v1450_v45 = vld [vmem:[%s2117_s0 + $0x78] sm:$0xf0] }
  0x5d   : > { %827 = vmatpush.bf16.msra.mxu1 %v1521_v63  ;;  %876 = vmatpush.bf16.msra.mxu2 %v1461_v0  ;;  %v1449_v46 = vor.u32 %v1603_v43, %v1448_v42  ;;  %v1453_v47 = vor.u32 %v1602_v44, %v1450_v45  ;;  %s2129_s24 = smov (!%p409_p11, %s1389_s24), 3  ;;  %s1636_s12 = sshll.u32 (%p1772_p6), %s1707_s14, 3 }
  0x5e   : > { %925 = vmatpush.bf16.msra.mxu3 %v1525_v3  ;;  %s411_s27 = scalar_lea.vmem %s2119_s2, %s2129_s24  ;;  %s1180_s5 = scalar_lea.vmem (%p1772_p6), %s2120_s3, %s1636_s12 }
  0x5f   : > { %779 = vmatmul.bf16.vlgmr.msra.gmra.mxu0 %v1393_v4  ;;  %v1066_v49 = vld [vmem:[%s411_s27] sm:$0x3] }
  0x60   : > { %828 = vmatmul.bf16.vlgmr.msra.gmra.mxu1 %v1397_v5  ;;  %877 = vmatmul.bf16.vlgmr.msra.gmra.mxu2 %v1393_v4  ;;  %v2024_v52 = vperm.slane %v1066_v49, 0  ;;  %v2027_v55 = vperm.slane %v1066_v49, 1 }
  0x61   : > { %926 = vmatmul.bf16.vlgmr.msra.gmra.mxu3 %v1397_v5 }
  0x6f   : > { %784 = vmatmul.bf16.gmra.mxu0 %v1401_v10 }
  0x70   : > { %833 = vmatmul.bf16.gmra.mxu1 %v1405_v11  ;;  %882 = vmatmul.bf16.gmra.mxu2 %v1401_v10 }
  0x71   : > { %931 = vmatmul.bf16.gmra.mxu3 %v1405_v11 }
  0x7f   : > { %789 = vmatmul.bf16.gmra.mxu0 %v1409_v16 }
  0x80   : > { %838 = vmatmul.bf16.gmra.mxu1 %v1413_v17  ;;  %887 = vmatmul.bf16.gmra.mxu2 %v1409_v16 }
  0x81   : > { %936 = vmatmul.bf16.gmra.mxu3 %v1413_v17 }
  0x8f   : > { %794 = vmatmul.bf16.gmra.mxu0 %v1417_v22 }
  0x90   : > { %843 = vmatmul.bf16.gmra.mxu1 %v1421_v23  ;;  %892 = vmatmul.bf16.gmra.mxu2 %v1417_v22 }
  0x91   : > { %941 = vmatmul.bf16.gmra.mxu3 %v1421_v23 }
  0x9f   : > { %799 = vmatmul.bf16.gmra.mxu0 %v1425_v28 }
  0xa0   : > { %848 = vmatmul.bf16.gmra.mxu1 %v1429_v29  ;;  %897 = vmatmul.bf16.gmra.mxu2 %v1425_v28 }
  0xa1   : > { %946 = vmatmul.bf16.gmra.mxu3 %v1429_v29 }
  0xaf   : > { %804 = vmatmul.bf16.gmra.mxu0 %v1433_v34 }
  0xb0   : > { %853 = vmatmul.bf16.gmra.mxu1 %v1437_v35  ;;  %902 = vmatmul.bf16.gmra.mxu2 %v1433_v34 }
  0xb1   : > { %951 = vmatmul.bf16.gmra.mxu3 %v1437_v35 }
  0xbf   : > { %809 = vmatmul.bf16.gmra.mxu0 %v1441_v40 }
  0xc0   : > { %858 = vmatmul.bf16.gmra.mxu1 %v1445_v41  ;;  %907 = vmatmul.bf16.gmra.mxu2 %v1441_v40 }
  0xc1   : > { %956 = vmatmul.bf16.gmra.mxu3 %v1445_v41 }
  0xcf   : > { %814 = vmatmul.bf16.gmra.mxu0 %v1449_v46 }
  0xd0   : > { %863 = vmatmul.bf16.gmra.mxu1 %v1453_v47  ;;  %912 = vmatmul.bf16.gmra.mxu2 %v1449_v46 }
  0xd1   : > { %961 = vmatmul.bf16.gmra.mxu3 %v1453_v47 }
  0xdc   : > { %v780_v48 = vpop.f32.mrf.mxu0 }
  0xdd   : > { %v829_v50 = vpop.f32.mrf.mxu1 }
  0xde   : > { %v830_v51 = vadd.f32 %v829_v50, %v780_v48 }
  0xe0   : > { %v1072_v53 = vadd.f32 %v2024_v52, %v830_v51 }
  0xe2   : > { %v1104_v60 = vmax.f32 %v1072_v53, 0.0 }
  0xe3   : > { %v878_v54 = vpop.f32.mrf.mxu2 }
  0xe4   : > { %v927_v56 = vpop.f32.mrf.mxu3  ;;  %v782_v57 = vpop.f32.mrf.mxu0 }
  0xe5   : > { %v928_v58 = vadd.f32 %v927_v56, %v878_v54  ;;  %v831_v59 = vpop.f32.mrf.mxu1 }
  0xe6   : > { %v832_v63 = vadd.f32 %v831_v59, %v782_v57 }
  0xe7   : > { %v1073_v61 = vadd.f32 %v2027_v55, %v928_v58 }
  0xe8   : > { %v1074_v4 = vadd.f32 %v2024_v52, %v832_v63 }
  0xe9   : > { %v1105_v62 = vmax.f32 %v1073_v61, 0.0 }
  0xea   : > { %v1106_v9 = vmax.f32 %v1074_v4, 0.0 }
  0xeb   : > { %v1136_v0 = vpack.c.bf16 %v1105_v62, %v1104_v60  ;;  %v880_v1 = vpop.f32.mrf.mxu2 }
  0xec   : > { %v929_v2 = vpop.f32.mrf.mxu3  ;;  %v785_v3 = vpop.f32.mrf.mxu0 }
  0xed   : > { %1152 = vst [vmem:[%s2032_s29] sm:$0xff] %v1136_v0  ;;  %v930_v5 = vadd.f32 %v929_v2, %v880_v1  ;;  %v834_v6 = vpop.f32.mrf.mxu1 }
  0xee   : > { %v835_v8 = vadd.f32 %v834_v6, %v785_v3 }
  0xef   : > { %v1075_v7 = vadd.f32 %v2027_v55, %v930_v5 }
  0xf0   : > { %v1076_v12 = vadd.f32 %v2024_v52, %v835_v8 }
  0xf1   : > { %v1107_v10 = vmax.f32 %v1075_v7, 0.0 }
  0xf2   : > { %v1108_v18 = vmax.f32 %v1076_v12, 0.0 }
  0xf3   : > { %v1137_v11 = vpack.c.bf16 %v1107_v10, %v1106_v9  ;;  %v883_v13 = vpop.f32.mrf.mxu2 }
  0xf4   : > { %v932_v14 = vpop.f32.mrf.mxu3  ;;  %v787_v15 = vpop.f32.mrf.mxu0 }
  0xf5   : > { %1153 = vst [vmem:[%s2032_s29 + $0x8] sm:$0xff] %v1137_v11  ;;  %v933_v16 = vadd.f32 %v932_v14, %v883_v13  ;;  %v836_v17 = vpop.f32.mrf.mxu1 }
  0xf6   : > { %v837_v21 = vadd.f32 %v836_v17, %v787_v15 }
  0xf7   : > { %v1077_v19 = vadd.f32 %v2027_v55, %v933_v16 }
  0xf8   : > { %v1078_v26 = vadd.f32 %v2024_v52, %v837_v21 }
  0xf9   : > { %v1109_v20 = vmax.f32 %v1077_v19, 0.0 }
  0xfa   : > { %v1110_v31 = vmax.f32 %v1078_v26, 0.0 }
  0xfb   : > { %v1138_v22 = vpack.c.bf16 %v1109_v20, %v1108_v18  ;;  %v885_v23 = vpop.f32.mrf.mxu2 }
  0xfc   : > { %v934_v24 = vpop.f32.mrf.mxu3  ;;  %v790_v25 = vpop.f32.mrf.mxu0 }
  0xfd   : > { %1154 = vst [vmem:[%s2032_s29 + $0x10] sm:$0xff] %v1138_v22  ;;  %v935_v27 = vadd.f32 %v934_v24, %v885_v23  ;;  %v839_v28 = vpop.f32.mrf.mxu1 }
  0xfe   : > { %v840_v30 = vadd.f32 %v839_v28, %v790_v25 }
  0xff   : > { %v1079_v29 = vadd.f32 %v2027_v55, %v935_v27 }
 0x100   : > { %v1080_v34 = vadd.f32 %v2024_v52, %v840_v30 }
 0x101   : > { %v1111_v32 = vmax.f32 %v1079_v29, 0.0 }
 0x102   : > { %v1112_v40 = vmax.f32 %v1080_v34, 0.0 }
 0x103   : > { %v1139_v33 = vpack.c.bf16 %v1111_v32, %v1110_v31  ;;  %v888_v35 = vpop.f32.mrf.mxu2 }
 0x104   : > { %v937_v36 = vpop.f32.mrf.mxu3  ;;  %v792_v37 = vpop.f32.mrf.mxu0 }
 0x105   : > { %1155 = vst [vmem:[%s2032_s29 + $0x18] sm:$0xff] %v1139_v33  ;;  %v938_v38 = vadd.f32 %v937_v36, %v888_v35  ;;  %v841_v39 = vpop.f32.mrf.mxu1 }
 0x106   : > { %v842_v43 = vadd.f32 %v841_v39, %v792_v37 }
 0x107   : > { %v1081_v41 = vadd.f32 %v2027_v55, %v938_v38 }
 0x108   : > { %v1082_v48 = vadd.f32 %v2024_v52, %v842_v43 }
 0x109   : > { %v1113_v42 = vmax.f32 %v1081_v41, 0.0 }
 0x10a   : > { %v1114_v54 = vmax.f32 %v1082_v48, 0.0 }
 0x10b   : > { %v1140_v44 = vpack.c.bf16 %v1113_v42, %v1112_v40  ;;  %v890_v45 = vpop.f32.mrf.mxu2 }
 0x10c   : > { %v939_v46 = vpop.f32.mrf.mxu3  ;;  %v795_v47 = vpop.f32.mrf.mxu0 }
 0x10d   : > { %1156 = vst [vmem:[%s2032_s29 + $0x20] sm:$0xff] %v1140_v44  ;;  %v940_v49 = vadd.f32 %v939_v46, %v890_v45  ;;  %v844_v50 = vpop.f32.mrf.mxu1 }
 0x10e   : > { %v845_v53 = vadd.f32 %v844_v50, %v795_v47 }
 0x10f   : > { %v1083_v51 = vadd.f32 %v2027_v55, %v940_v49 }
 0x110   : > { %v1084_v58 = vadd.f32 %v2024_v52, %v845_v53 }
 0x111   : > { %v1115_v56 = vmax.f32 %v1083_v51, 0.0 }
 0x112   : > { %v1116_v0 = vmax.f32 %v1084_v58, 0.0 }
 0x113   : > { %v1141_v57 = vpack.c.bf16 %v1115_v56, %v1114_v54  ;;  %v893_v59 = vpop.f32.mrf.mxu2 }
 0x114   : > { %v942_v60 = vpop.f32.mrf.mxu3  ;;  %v797_v61 = vpop.f32.mrf.mxu0 }
 0x115   : > { %1157 = vst [vmem:[%s2032_s29 + $0x28] sm:$0xff] %v1141_v57  ;;  %v943_v62 = vadd.f32 %v942_v60, %v893_v59  ;;  %v846_v63 = vpop.f32.mrf.mxu1 }
 0x116   : > { %v847_v3 = vadd.f32 %v846_v63, %v797_v61 }
 0x117   : > { %v1085_v1 = vadd.f32 %v2027_v55, %v943_v62 }
 0x118   : > { %v1086_v8 = vadd.f32 %v2024_v52, %v847_v3 }
 0x119   : > { %v1117_v2 = vmax.f32 %v1085_v1, 0.0 }
 0x11a   : > { %v1118_v13 = vmax.f32 %v1086_v8, 0.0 }
 0x11b   : > { %v1142_v4 = vpack.c.bf16 %v1117_v2, %v1116_v0  ;;  %v895_v5 = vpop.f32.mrf.mxu2 }
 0x11c   : > { %v944_v6 = vpop.f32.mrf.mxu3  ;;  %v800_v7 = vpop.f32.mrf.mxu0 }
 0x11d   : > { %1158 = vst [vmem:[%s2032_s29 + $0x30] sm:$0xff] %v1142_v4  ;;  %v945_v9 = vadd.f32 %v944_v6, %v895_v5  ;;  %v849_v10 = vpop.f32.mrf.mxu1 }
 0x11e   : > { %v850_v12 = vadd.f32 %v849_v10, %v800_v7 }
 0x11f   : > { %v1087_v11 = vadd.f32 %v2027_v55, %v945_v9 }
 0x120   : > { %v1088_v16 = vadd.f32 %v2024_v52, %v850_v12 }
 0x121   : > { %v1119_v14 = vmax.f32 %v1087_v11, 0.0 }
 0x122   : > { %v1120_v22 = vmax.f32 %v1088_v16, 0.0 }
 0x123   : > { %v1143_v15 = vpack.c.bf16 %v1119_v14, %v1118_v13  ;;  %v898_v17 = vpop.f32.mrf.mxu2 }
 0x124   : > { %v947_v18 = vpop.f32.mrf.mxu3  ;;  %v802_v19 = vpop.f32.mrf.mxu0 }
 0x125   : > { %1159 = vst [vmem:[%s2032_s29 + $0x38] sm:$0xff] %v1143_v15  ;;  %v948_v20 = vadd.f32 %v947_v18, %v898_v17  ;;  %v851_v21 = vpop.f32.mrf.mxu1 }
 0x126   : > { %v852_v25 = vadd.f32 %v851_v21, %v802_v19 }
 0x127   : > { %v1089_v23 = vadd.f32 %v2027_v55, %v948_v20 }
 0x128   : > { %v1090_v30 = vadd.f32 %v2024_v52, %v852_v25 }
 0x129   : > { %v1121_v24 = vmax.f32 %v1089_v23, 0.0 }
 0x12a   : > { %v1122_v35 = vmax.f32 %v1090_v30, 0.0 }
 0x12b   : > { %v1144_v26 = vpack.c.bf16 %v1121_v24, %v1120_v22  ;;  %v900_v27 = vpop.f32.mrf.mxu2 }
 0x12c   : > { %v949_v28 = vpop.f32.mrf.mxu3  ;;  %v805_v29 = vpop.f32.mrf.mxu0 }
 0x12d   : > { %1160 = vst [vmem:[%s2032_s29 + $0x40] sm:$0xff] %v1144_v26  ;;  %v950_v31 = vadd.f32 %v949_v28, %v900_v27  ;;  %v854_v32 = vpop.f32.mrf.mxu1 }
 0x12e   : > { %v855_v34 = vadd.f32 %v854_v32, %v805_v29 }
 0x12f   : > { %v1091_v33 = vadd.f32 %v2027_v55, %v950_v31 }
 0x130   : > { %v1092_v38 = vadd.f32 %v2024_v52, %v855_v34 }
 0x131   : > { %v1123_v36 = vmax.f32 %v1091_v33, 0.0 }
 0x132   : > { %v1124_v44 = vmax.f32 %v1092_v38, 0.0 }
 0x133   : > { %v1145_v37 = vpack.c.bf16 %v1123_v36, %v1122_v35  ;;  %v903_v39 = vpop.f32.mrf.mxu2 }
 0x134   : > { %v952_v40 = vpop.f32.mrf.mxu3  ;;  %v807_v41 = vpop.f32.mrf.mxu0 }
 0x135   : > { %1161 = vst [vmem:[%s2032_s29 + $0x48] sm:$0xff] %v1145_v37  ;;  %v953_v42 = vadd.f32 %v952_v40, %v903_v39  ;;  %v856_v43 = vpop.f32.mrf.mxu1  ;;  %v1243_v39 = vld [vmem:[%s2032_s29 + $0x10] sm:$0xff] (%p1772_p6)  ;;  %v1245_v40 = vld [vmem:[%s2032_s29 + $0x18] sm:$0xff] (%p1772_p6) }
 0x136   : > { %v857_v47 = vadd.f32 %v856_v43, %v807_v41  ;;  %v1247_v41 = vld [vmem:[%s2032_s29 + $0x20] sm:$0xff] (%p1772_p6)  ;;  %1244 = vst [vmem:[%s1180_s5 + $0x20] sm:$0xff] (%p1772_p6), %v1243_v39  ;;  %v1251_v43 = vld [vmem:[%s2032_s29 + $0x30] sm:$0xff] (%p1772_p6) }
 0x137   : > { %v1093_v45 = vadd.f32 %v2027_v55, %v953_v42  ;;  %v1249_v42 = vld [vmem:[%s2032_s29 + $0x28] sm:$0xff] (%p1772_p6)  ;;  %1246 = vst [vmem:[%s1180_s5 + $0x30] sm:$0xff] (%p1772_p6), %v1245_v40 }
 0x138   : > { %v1094_v53 = vadd.f32 %v2024_v52, %v857_v47  ;;  %1248 = vst [vmem:[%s1180_s5 + $0x40] sm:$0xff] (%p1772_p6), %v1247_v41 }
 0x139   : > { %v1125_v46 = vmax.f32 %v1093_v45, 0.0  ;;  %1250 = vst [vmem:[%s1180_s5 + $0x50] sm:$0xff] (%p1772_p6), %v1249_v42  ;;  %v1255_v45 = vld [vmem:[%s2032_s29 + $0x40] sm:$0xff] (%p1772_p6) }
 0x13a   : > { %v1126_v59 = vmax.f32 %v1094_v53, 0.0  ;;  %1252 = vst [vmem:[%s1180_s5 + $0x60] sm:$0xff] (%p1772_p6), %v1251_v43 }
 0x13b   : > { %v1146_v48 = vpack.c.bf16 %v1125_v46, %v1124_v44  ;;  %v905_v49 = vpop.f32.mrf.mxu2  ;;  %v1253_v44 = vld [vmem:[%s2032_s29 + $0x38] sm:$0xff] (%p1772_p6)  ;;  %1256 = vst [vmem:[%s1180_s5 + $0x80] sm:$0xff] (%p1772_p6), %v1255_v45 }
 0x13c   : > { %v954_v50 = vpop.f32.mrf.mxu3  ;;  %v810_v51 = vpop.f32.mrf.mxu0  ;;  %v1257_v46 = vld [vmem:[%s2032_s29 + $0x48] sm:$0xff] (%p1772_p6)  ;;  %1254 = vst [vmem:[%s1180_s5 + $0x70] sm:$0xff] (%p1772_p6), %v1253_v44 }
 0x13d   : > { %1162 = vst [vmem:[%s2032_s29 + $0x50] sm:$0xff] %v1146_v48  ;;  %v955_v54 = vadd.f32 %v954_v50, %v905_v49  ;;  %v859_v56 = vpop.f32.mrf.mxu1 }
 0x13e   : > { %v860_v58 = vadd.f32 %v859_v56, %v810_v51  ;;  %1258 = vst [vmem:[%s1180_s5 + $0x90] sm:$0xff] (%p1772_p6), %v1257_v46 }
 0x13f   : > { %v1095_v57 = vadd.f32 %v2027_v55, %v955_v54 }
 0x140   : > { %v1096_v62 = vadd.f32 %v2024_v52, %v860_v58 }
 0x141   : > { %v1127_v60 = vmax.f32 %v1095_v57, 0.0 }
 0x142   : > { %v1128_v4 = vmax.f32 %v1096_v62, 0.0 }
 0x143   : > { %v1147_v61 = vpack.c.bf16 %v1127_v60, %v1126_v59  ;;  %v908_v63 = vpop.f32.mrf.mxu2 }
 0x144   : > { %v957_v0 = vpop.f32.mrf.mxu3  ;;  %v812_v1 = vpop.f32.mrf.mxu0  ;;  %v1259_v47 = vld [vmem:[%s2032_s29 + $0x50] sm:$0xff] (%p1772_p6) }
 0x145   : > { %1163 = vst [vmem:[%s2032_s29 + $0x58] sm:$0xff] %v1147_v61  ;;  %v958_v2 = vadd.f32 %v957_v0, %v908_v63  ;;  %v861_v3 = vpop.f32.mrf.mxu1 }
 0x146   : > { %v862_v7 = vadd.f32 %v861_v3, %v812_v1  ;;  %1260 = vst [vmem:[%s1180_s5 + $0xa0] sm:$0xff] (%p1772_p6), %v1259_v47 }
 0x147   : > { %v1097_v5 = vadd.f32 %v2027_v55, %v958_v2 }
 0x148   : > { %v1098_v12 = vadd.f32 %v2024_v52, %v862_v7 }
 0x149   : > { %v1129_v6 = vmax.f32 %v1097_v5, 0.0 }
 0x14a   : > { %v1130_v17 = vmax.f32 %v1098_v12, 0.0 }
 0x14b   : > { %v1148_v8 = vpack.c.bf16 %v1129_v6, %v1128_v4  ;;  %v910_v9 = vpop.f32.mrf.mxu2 }
 0x14c   : > { %v959_v10 = vpop.f32.mrf.mxu3  ;;  %v815_v11 = vpop.f32.mrf.mxu0  ;;  %v1261_v48 = vld [vmem:[%s2032_s29 + $0x58] sm:$0xff] (%p1772_p6) }
 0x14d   : > { %1164 = vst [vmem:[%s2032_s29 + $0x60] sm:$0xff] %v1148_v8  ;;  %v960_v13 = vadd.f32 %v959_v10, %v910_v9  ;;  %v864_v14 = vpop.f32.mrf.mxu1 }
 0x14e   : > { %v865_v16 = vadd.f32 %v864_v14, %v815_v11  ;;  %1262 = vst [vmem:[%s1180_s5 + $0xb0] sm:$0xff] (%p1772_p6), %v1261_v48 }
 0x14f   : > { %v1099_v15 = vadd.f32 %v2027_v55, %v960_v13 }
 0x150   : > { %v1100_v20 = vadd.f32 %v2024_v52, %v865_v16 }
 0x151   : > { %v1131_v18 = vmax.f32 %v1099_v15, 0.0 }
 0x152   : > { %v1132_v26 = vmax.f32 %v1100_v20, 0.0 }
 0x153   : > { %v1149_v19 = vpack.c.bf16 %v1131_v18, %v1130_v17  ;;  %v913_v21 = vpop.f32.mrf.mxu2 }
 0x154   : > { %v962_v22 = vpop.f32.mrf.mxu3  ;;  %v817_v24 = vpop.f32.mrf.mxu0  ;;  %v1263_v49 = vld [vmem:[%s2032_s29 + $0x60] sm:$0xff] (%p1772_p6) }
 0x155   : > { %1165 = vst [vmem:[%s2032_s29 + $0x68] sm:$0xff] %v1149_v19  ;;  %v963_v23 = vadd.f32 %v962_v22, %v913_v21  ;;  %v866_v25 = vpop.f32.mrf.mxu1 }
 0x156   : > { %v867_v29 = vadd.f32 %v866_v25, %v817_v24  ;;  %1264 = vst [vmem:[%s1180_s5 + $0xc0] sm:$0xff] (%p1772_p6), %v1263_v49 }
 0x157   : > { %v1101_v27 = vadd.f32 %v2027_v55, %v963_v23 }
 0x158   : > { %v1102_v33 = vadd.f32 %v2024_v52, %v867_v29  ;;  %v1239_v52 = vld [vmem:[%s2032_s29] sm:$0xff] (%p1772_p6) }
 0x159   : > { %v1133_v28 = vmax.f32 %v1101_v27, 0.0  ;;  %1240 = vst [vmem:[%s1180_s5] sm:$0xff] (%p1772_p6), %v1239_v52 }
 0x15a   : > { %v1134_v36 = vmax.f32 %v1102_v33, 0.0 }
 0x15b   : > { %v1150_v30 = vpack.c.bf16 %v1133_v28, %v1132_v26  ;;  %v915_v31 = vpop.f32.mrf.mxu2 }
 0x15c   : > { %v964_v32 = vpop.f32.mrf.mxu3  ;;  %v1265_v50 = vld [vmem:[%s2032_s29 + $0x68] sm:$0xff] (%p1772_p6) }
 0x15d   : > { %1166 = vst [vmem:[%s2032_s29 + $0x70] sm:$0xff] %v1150_v30  ;;  %v965_v34 = vadd.f32 %v964_v32, %v915_v31 }
 0x15e   : > { %1266 = vst [vmem:[%s1180_s5 + $0xd0] sm:$0xff] (%p1772_p6), %v1265_v50 }
 0x15f   : > { %v1103_v35 = vadd.f32 %v2027_v55, %v965_v34  ;;  %v1241_v55 = vld [vmem:[%s2032_s29 + $0x8] sm:$0xff] (%p1772_p6) }
 0x160   : > { %1242 = vst [vmem:[%s1180_s5 + $0x10] sm:$0xff] (%p1772_p6), %v1241_v55 }
 0x161   : > { %v1135_v37 = vmax.f32 %v1103_v35, 0.0  ;;  %1174 = sbr.rel (!%p1772_p6) target bundleno = 366 (0x16e), region = 82 }
 0x163   : > { %v1151_v38 = vpack.c.bf16 %v1135_v37, %v1134_v36 }
 0x164   : > { %v1267_v51 = vld [vmem:[%s2032_s29 + $0x70] sm:$0xff] (%p1772_p6) }
 0x165   : > { %1167 = vst [vmem:[%s2032_s29 + $0x78] sm:$0xff] %v1151_v38 }
 0x166   : > { %1268 = vst [vmem:[%s1180_s5 + $0xe0] sm:$0xff] %v1267_v51 }
 0x16c   : > { %v1269_v53 = vld [vmem:[%s2032_s29 + $0x78] sm:$0xff] }
 0x16d   : > { %1270 = vst [vmem:[%s1180_s5 + $0xf0] sm:$0xff] %v1269_v53 }
 0x16e PF: > { %s13_s16 = sadd.s32 1, %s1715_s16   ;;  %s2122_s12 = smov %s1703_s13 }
 0x16f   : > { %p10_p12 = scmp.ge.s32.totalorder %s13_s16, 4   ;;  %s2123_s13 = smov %s1777_s22 }
 0x170   : > { %s2124_s14 = smov %s1711_s15  ;;  %s2125_s15 = smov %s2127_s17 }
 0x171   :  { %12 = sbr.rel (!%p10_p12) target bundleno = 3 (0x3), region = 157 }

// kernel: sakiko_forward.7
= control target key start
LH: loop header
LB: loop body
LE: loop exit
PB: predicated region body
PF: predicated region fallthrough
CT: control target
= control target key end

     0   :  { %s2195_s1 = inlined_call_operand.vmem [shape: bf16[512,128], index: 1, kind: input, shape index: {}]   ;;  %s2196_s2 = inlined_call_operand.vmem [shape: f32[1,128], index: 2, kind: input, shape index: {}]   ;;  %s2197_s0 = inlined_call_operand.vmem [shape: bf16[128,512], index: 0, kind: input, shape index: {}]   ;;  %s2198_s3 = inlined_call_operand.vmem [shape: bf16[128,128], index: 3, kind: input, shape index: {}]   ;;  %s2199_s4 = inlined_call_operand.vmem [shape: f32[1,128], index: 4, kind: input, shape index: {}]   ;;  %s2200_s5 = inlined_call_operand.vmem [shape: bf16[128,128], index: 5, kind: input, shape index: {}]   ;;  %s2201_s6 = inlined_call_operand.vmem [shape: f32[1,128], index: 6, kind: input, shape index: {}]   ;;  %s2202_s7 = inlined_call_operand.vmem [shape: bf16[128,128], index: 7, kind: input, shape index: {}]   ;;  %s2203_s8 = inlined_call_operand.vmem [shape: f32[1,128], index: 8, kind: input, shape index: {}]   ;;  %s2204_s9 = inlined_call_operand.vmem [shape: f32[128,128], index: 9, kind: output, shape index: {}]  }
   0x1   :  { %v1514_v0 = vld [vmem:[%s2195_s1 + $0x38] sm:$0xff]  ;;  %v1513_v3 = vld [vmem:[%s2195_s1 + $0x30] sm:$0xff]  ;;  %v1512_v6 = vld [vmem:[%s2195_s1 + $0x28] sm:$0xff] }
   0x2   :  { %v1647_v1 = vld [vmem:[%s2195_s1 + $0xb8] sm:$0xff]  ;;  %484 = vmatpush.bf16.msra.mxu0 %v1514_v0  ;;  %1563 = vmatpush.bf16.msra.mxu3 %v1514_v0  ;;  %v1662_v4 = vld [vmem:[%s2195_s1 + $0xb0] sm:$0xff]  ;;  %v1677_v7 = vld [vmem:[%s2195_s1 + $0xa8] sm:$0xff] }
   0x3   :  { %v1652_v2 = vld [vmem:[%s2195_s1 + $0x78] sm:$0xff]  ;;  %1579 = vmatpush.bf16.msra.mxu2 %v1647_v1  ;;  %v1667_v5 = vld [vmem:[%s2195_s1 + $0x70] sm:$0xff]  ;;  %v1682_v8 = vld [vmem:[%s2195_s1 + $0x68] sm:$0xff] }
   0x4   :  { %1571 = vmatpush.bf16.msra.mxu1 %v1652_v2  ;;  %v1511_v9 = vld [vmem:[%s2195_s1 + $0x20] sm:$0xff]  ;;  %v1510_v12 = vld [vmem:[%s2195_s1 + $0x18] sm:$0xff]  ;;  %v1509_v15 = vld [vmem:[%s2195_s1 + $0x10] sm:$0xff] }
   0x5   :  { %v1692_v10 = vld [vmem:[%s2195_s1 + $0xa0] sm:$0xff]  ;;  %v1707_v13 = vld [vmem:[%s2195_s1 + $0x98] sm:$0xff]  ;;  %v1722_v16 = vld [vmem:[%s2195_s1 + $0x90] sm:$0xff] }
   0x6   :  { %485 = vmatpush.bf16.msra.mxu0 %v1513_v3  ;;  %1564 = vmatpush.bf16.msra.mxu3 %v1513_v3  ;;  %v1697_v11 = vld [vmem:[%s2195_s1 + $0x60] sm:$0xff]  ;;  %v1712_v14 = vld [vmem:[%s2195_s1 + $0x58] sm:$0xff]  ;;  %v1727_v17 = vld [vmem:[%s2195_s1 + $0x50] sm:$0xff] }
   0x7   :  { %1580 = vmatpush.bf16.msra.mxu2 %v1662_v4  ;;  %v1508_v18 = vld [vmem:[%s2195_s1 + $0x8] sm:$0xff]  ;;  %v1507_v21 = vld [vmem:[%s2195_s1] sm:$0xff]  ;;  %v1477_v23 = vld [vmem:[%s2197_s0 + $0xc] sm:$0xf0] }
   0x8   :  { %1572 = vmatpush.bf16.msra.mxu1 %v1667_v5  ;;  %v1737_v19 = vld [vmem:[%s2195_s1 + $0x88] sm:$0xff]  ;;  %v1125_v22 = vld [vmem:[%s2197_s0] sm:$0xf]  ;;  %v1485_v25 = vld [vmem:[%s2197_s0 + $0x4c] sm:$0xf0] }
   0x9   :  { %v1516_v20 = vld [vmem:[%s2195_s1 + $0x48] sm:$0xff]  ;;  %v1157_v24 = vld [vmem:[%s2197_s0 + $0x40] sm:$0xf]  ;;  %v1538_v26 = vld [vmem:[%s2195_s1 + $0xf8] sm:$0xff]  ;;  %v1126_v31 = vor.u32 %v1477_v23, %v1125_v22 }
   0xa   :  { %486 = vmatpush.bf16.msra.mxu0 %v1512_v6  ;;  %1565 = vmatpush.bf16.msra.mxu3 %v1512_v6  ;;  %v1764_v27 = vld [vmem:[%s2195_s1 + $0x80] sm:$0xff]  ;;  %v1165_v28 = vld [vmem:[%s2197_s0 + $0x48] sm:$0xf]  ;;  %v1486_v29 = vld [vmem:[%s2197_s0 + $0x54] sm:$0xf0]  ;;  %v1158_v32 = vor.u32 %v1485_v25, %v1157_v24 }
   0xb   :  { %1581 = vmatpush.bf16.msra.mxu2 %v1677_v7  ;;  %v1515_v30 = vld [vmem:[%s2195_s1 + $0x40] sm:$0xff]  ;;  %v1159_v34 = vld [vmem:[%s2197_s0 + $0x50] sm:$0xf0]  ;;  %v1166_v35 = vor.u32 %v1486_v29, %v1165_v28  ;;  %v1536_v38 = vld [vmem:[%s2195_s1 + $0xe8] sm:$0xff] }
   0xc   :  { %1573 = vmatpush.bf16.msra.mxu1 %v1682_v8  ;;  %v1483_v33 = vld [vmem:[%s2197_s0 + $0x44] sm:$0xf]  ;;  %v1537_v37 = vld [vmem:[%s2195_s1 + $0xf0] sm:$0xff]  ;;  %v1141_v40 = vld [vmem:[%s2197_s0 + $0x20] sm:$0xf] }
   0xd   :  { %v1162_v36 = vor.u32 %v1483_v33, %v1159_v34  ;;  %v1535_v39 = vld [vmem:[%s2195_s1 + $0xe0] sm:$0xff]  ;;  %v1481_v41 = vld [vmem:[%s2197_s0 + $0x2c] sm:$0xf0]  ;;  %v1181_v44 = vld [vmem:[%s2197_s0 + $0x68] sm:$0xf] }
   0xe   :  { %487 = vmatpush.bf16.msra.mxu0 %v1511_v9  ;;  %1566 = vmatpush.bf16.msra.mxu3 %v1511_v9  ;;  %v1173_v42 = vld [vmem:[%s2197_s0 + $0x60] sm:$0xf]  ;;  %v1489_v43 = vld [vmem:[%s2197_s0 + $0x6c] sm:$0xf0]  ;;  %v1490_v45 = vld [vmem:[%s2197_s0 + $0x74] sm:$0xf0]  ;;  %v1142_v46 = vor.u32 %v1481_v41, %v1141_v40 }
   0xf   :  { %1582 = vmatpush.bf16.msra.mxu2 %v1692_v10  ;;  %v1174_v47 = vor.u32 %v1489_v43, %v1173_v42  ;;  %v1487_v48 = vld [vmem:[%s2197_s0 + $0x64] sm:$0xf]  ;;  %v1175_v49 = vld [vmem:[%s2197_s0 + $0x70] sm:$0xf0]  ;;  %v1182_v50 = vor.u32 %v1490_v45, %v1181_v44  ;;  %v1534_v52 = vld [vmem:[%s2195_s1 + $0xd8] sm:$0xff] }
  0x10   :  { %1574 = vmatpush.bf16.msra.mxu1 %v1697_v11  ;;  %v1178_v51 = vor.u32 %v1487_v48, %v1175_v49  ;;  %v1533_v53 = vld [vmem:[%s2195_s1 + $0xd0] sm:$0xff]  ;;  %v1189_v54 = vld [vmem:[%s2197_s0 + $0x80] sm:$0xf]  ;;  %v1475_v56 = vld [vmem:[%s2197_s0 + $0x4] sm:$0xf] }
  0x11   :  { %v1493_v55 = vld [vmem:[%s2197_s0 + $0x8c] sm:$0xf0]  ;;  %v1127_v57 = vld [vmem:[%s2197_s0 + $0x10] sm:$0xf0]  ;;  %v1197_v58 = vld [vmem:[%s2197_s0 + $0x88] sm:$0xf] }
  0x12   :  { %488 = vmatpush.bf16.msra.mxu0 %v1510_v12  ;;  %1567 = vmatpush.bf16.msra.mxu3 %v1510_v12  ;;  %v1494_v59 = vld [vmem:[%s2197_s0 + $0x94] sm:$0xf0]  ;;  %v1190_v60 = vor.u32 %v1493_v55, %v1189_v54  ;;  %v1130_v61 = vor.u32 %v1475_v56, %v1127_v57  ;;  %v1491_v62 = vld [vmem:[%s2197_s0 + $0x84] sm:$0xf]  ;;  %v1191_v63 = vld [vmem:[%s2197_s0 + $0x90] sm:$0xf0] }
  0x13   :  { %1583 = vmatpush.bf16.msra.mxu2 %v1707_v13  ;;  %v1198_v0 = vor.u32 %v1494_v59, %v1197_v58  ;;  %v1205_v3 = vld [vmem:[%s2197_s0 + $0xa0] sm:$0xf]  ;;  %v1143_v6 = vld [vmem:[%s2197_s0 + $0x30] sm:$0xf0]  ;;  %v1499_v24 = vld [vmem:[%s2197_s0 + $0xc4] sm:$0xf] }
  0x14   :  { %1575 = vmatpush.bf16.msra.mxu1 %v1712_v14  ;;  %v1207_v12 = vld [vmem:[%s2197_s0 + $0xb0] sm:$0xf0]  ;;  %v1237_v28 = vld [vmem:[%s2197_s0 + $0xe0] sm:$0xf]  ;;  %v1505_v29 = vld [vmem:[%s2197_s0 + $0xec] sm:$0xf0] }
  0x15   :  { %v1223_v25 = vld [vmem:[%s2197_s0 + $0xd0] sm:$0xf0]  ;;  %v1506_v33 = vld [vmem:[%s2197_s0 + $0xf4] sm:$0xf0]  ;;  %v1238_v34 = vor.u32 %v1505_v29, %v1237_v28  ;;  %v1476_v40 = vld [vmem:[%s2197_s0 + $0xc] sm:$0xf] }
  0x16   :  { %489 = vmatpush.bf16.msra.mxu0 %v1509_v15  ;;  %1568 = vmatpush.bf16.msra.mxu3 %v1509_v15  ;;  %v1531_v15 = vld [vmem:[%s2195_s1 + $0xc0] sm:$0xff]  ;;  %v1135_v41 = vld [vmem:[%s2197_s0 + $0x18] sm:$0xf0]  ;;  %v1480_v43 = vld [vmem:[%s2197_s0 + $0x2c] sm:$0xf] }
  0x17   :  { %1584 = vmatpush.bf16.msra.mxu2 %v1722_v16  ;;  %v1138_v42 = vor.u32 %v1476_v40, %v1135_v41  ;;  %v1151_v44 = vld [vmem:[%s2197_s0 + $0x38] sm:$0xf0]  ;;  %v1492_v57 = vld [vmem:[%s2197_s0 + $0x8c] sm:$0xf]  ;;  %v2040_v29 = vld [vmem:[%s2196_s2] ss:$0 sm:$0xff] }
  0x18   :  { %1576 = vmatpush.bf16.msra.mxu1 %v1727_v17  ;;  %v1154_v45 = vor.u32 %v1480_v43, %v1151_v44  ;;  %v1199_v58 = vld [vmem:[%s2197_s0 + $0x98] sm:$0xf0] }
  0x1a   :  { %490 = vmatpush.bf16.msra.mxu0 %v1508_v18  ;;  %1569 = vmatpush.bf16.msra.mxu3 %v1508_v18  ;;  %v1133_v18 = vld [vmem:[%s2197_s0 + $0x8] sm:$0xf] }
  0x1b   :  { %1585 = vmatpush.bf16.msra.mxu2 %v1737_v19 }
  0x1c   :  { %1577 = vmatpush.bf16.msra.mxu1 %v1516_v20 }
  0x1e   :  { %491 = vmatpush.bf16.msra.mxu0 %v1507_v21  ;;  %1570 = vmatpush.bf16.msra.mxu3 %v1507_v21  ;;  %v1502_v21 = vld [vmem:[%s2197_s0 + $0xd4] sm:$0xf0] }
  0x1f   :  { %1586 = vmatpush.bf16.msra.mxu2 %v1764_v27 }
  0x20   :  { %1578 = vmatpush.bf16.msra.mxu1 %v1515_v30 }
  0x21   :  { %492 = vmatmul.bf16.vlgmr.msra.gmra.mxu0 %v1126_v31  ;;  %502 = vmatmul.bf16.vlgmr.msra.gmra.mxu3 %v1158_v32  ;;  %v1482_v31 = vld [vmem:[%s2197_s0 + $0x34] sm:$0xf0]  ;;  %v1245_v32 = vld [vmem:[%s2197_s0 + $0xe8] sm:$0xf] }
  0x22   :  { %631 = vmatpush.bf16.msrb.mxu3 %v1538_v26  ;;  %533 = vmatpush.bf16.msrb.mxu0 %v1652_v2  ;;  %v1532_v2 = vld [vmem:[%s2195_s1 + $0xc8] sm:$0xff] }
  0x23   :  { %600 = vmatmul.bf16.vlgmr.msra.gmra.mxu2 %v1166_v35  ;;  %551 = vmatmul.bf16.vlgmr.msra.gmra.mxu1 %v1162_v36  ;;  %v1503_v36 = vld [vmem:[%s2197_s0 + $0xe4] sm:$0xf] }
  0x26   :  { %534 = vmatpush.bf16.msrb.mxu0 %v1667_v5  ;;  %632 = vmatpush.bf16.msrb.mxu3 %v1537_v37  ;;  %v1479_v5 = vld [vmem:[%s2197_s0 + $0x24] sm:$0xf]  ;;  %v1239_v37 = vld [vmem:[%s2197_s0 + $0xf0] sm:$0xf0] }
  0x2a   :  { %535 = vmatpush.bf16.msrb.mxu0 %v1682_v8  ;;  %633 = vmatpush.bf16.msrb.mxu3 %v1536_v38  ;;  %v1498_v8 = vld [vmem:[%s2197_s0 + $0xb4] sm:$0xf0]  ;;  %v1246_v38 = vor.u32 %v1506_v33, %v1245_v32 }
  0x2e   :  { %536 = vmatpush.bf16.msrb.mxu0 %v1697_v11  ;;  %634 = vmatpush.bf16.msrb.mxu3 %v1535_v39  ;;  %v1495_v11 = vld [vmem:[%s2197_s0 + $0xa4] sm:$0xf]  ;;  %v1242_v39 = vor.u32 %v1503_v36, %v1239_v37 }
  0x31   :  { %497 = vmatmul.bf16.gmra.mxu0 %v1142_v46  ;;  %507 = vmatmul.bf16.gmra.mxu3 %v1174_v47  ;;  %v1484_v46 = vld [vmem:[%s2197_s0 + $0x4c] sm:$0xf]  ;;  %v1167_v47 = vld [vmem:[%s2197_s0 + $0x58] sm:$0xf0] }
  0x32   :  { %537 = vmatpush.bf16.msrb.mxu0 %v1712_v14  ;;  %635 = vmatpush.bf16.msrb.mxu3 %v1534_v52  ;;  %v1170_v48 = vor.u32 %v1484_v46, %v1167_v47  ;;  %v1183_v52 = vld [vmem:[%s2197_s0 + $0x78] sm:$0xf0] }
  0x33   :  { %605 = vmatmul.bf16.gmra.mxu2 %v1182_v50  ;;  %556 = vmatmul.bf16.gmra.mxu1 %v1178_v51  ;;  %v1488_v51 = vld [vmem:[%s2197_s0 + $0x6c] sm:$0xf] }
  0x34   :  { %v1186_v54 = vor.u32 %v1488_v51, %v1183_v52 }
  0x36   :  { %538 = vmatpush.bf16.msrb.mxu0 %v1727_v17  ;;  %636 = vmatpush.bf16.msrb.mxu3 %v1533_v53  ;;  %v1221_v17 = vld [vmem:[%s2197_s0 + $0xc0] sm:$0xf] }
  0x3a   :  { %539 = vmatpush.bf16.msrb.mxu0 %v1516_v20  ;;  %637 = vmatpush.bf16.msrb.mxu3 %v1532_v2  ;;  %v1478_v20 = vld [vmem:[%s2197_s0 + $0x14] sm:$0xf0] }
  0x3b   :  { %v1134_v23 = vor.u32 %v1478_v20, %v1133_v18  ;;  %v1541_v18 = vld [vmem:[%s2198_s3 + $0x10] sm:$0xff]  ;;  %v1540_v20 = vld [vmem:[%s2198_s3 + $0x8] sm:$0xff] }
  0x3e   :  { %540 = vmatpush.bf16.msrb.mxu0 %v1515_v30  ;;  %638 = vmatpush.bf16.msrb.mxu3 %v1531_v15  ;;  %v1149_v30 = vld [vmem:[%s2197_s0 + $0x28] sm:$0xf]  ;;  %v1542_v15 = vld [vmem:[%s2198_s3 + $0x18] sm:$0xff] }
  0x3f   :  { %v1150_v35 = vor.u32 %v1482_v31, %v1149_v30 }
  0x41   :  { %512 = vmatmul.bf16.gmra.mxu3 %v1190_v60  ;;  %541 = vmatmul.bf16.vlgmr.msrb.gmra.mxu0 %v1130_v61  ;;  %v1202_v60 = vor.u32 %v1492_v57, %v1199_v58 }
  0x42   :  { %582 = vmatpush.bf16.msra.mxu0 %v1647_v1  ;;  %v1194_v1 = vor.u32 %v1491_v62, %v1191_v63 }
  0x43   :  { %610 = vmatmul.bf16.gmra.mxu2 %v1198_v0  ;;  %v1496_v0 = vld [vmem:[%s2197_s0 + $0xac] sm:$0xf] }
  0x44   :  { %561 = vmatmul.bf16.gmra.mxu1 %v1194_v1  ;;  %v1215_v1 = vld [vmem:[%s2197_s0 + $0xb8] sm:$0xf0] }
  0x46   :  { %583 = vmatpush.bf16.msra.mxu0 %v1662_v4  ;;  %v1497_v4 = vld [vmem:[%s2197_s0 + $0xac] sm:$0xf0] }
  0x47   :  { %v1206_v9 = vor.u32 %v1497_v4, %v1205_v3  ;;  %v1218_v3 = vor.u32 %v1496_v0, %v1215_v1  ;;  %v1546_v4 = vld [vmem:[%s2198_s3 + $0x38] sm:$0xff] }
  0x4a   :  { %584 = vmatpush.bf16.msra.mxu0 %v1677_v7  ;;  %v1213_v7 = vld [vmem:[%s2197_s0 + $0xa8] sm:$0xf] }
  0x4b   :  { %v1214_v14 = vor.u32 %v1498_v8, %v1213_v7  ;;  %v1545_v7 = vld [vmem:[%s2198_s3 + $0x30] sm:$0xff]  ;;  %v1544_v8 = vld [vmem:[%s2198_s3 + $0x28] sm:$0xff] }
  0x4e   :  { %585 = vmatpush.bf16.msra.mxu0 %v1692_v10  ;;  %v1146_v10 = vor.u32 %v1479_v5, %v1143_v6 }
  0x51   :  { %517 = vmatmul.bf16.gmra.mxu3 %v1206_v9  ;;  %546 = vmatmul.bf16.gmra.mxu0 %v1146_v10  ;;  %v1500_v9 = vld [vmem:[%s2197_s0 + $0xcc] sm:$0xf]  ;;  %v1231_v10 = vld [vmem:[%s2197_s0 + $0xd8] sm:$0xf0] }
  0x52   :  { %586 = vmatpush.bf16.msra.mxu0 %v1707_v13  ;;  %v1210_v13 = vor.u32 %v1495_v11, %v1207_v12 }
  0x53   :  { %615 = vmatmul.bf16.gmra.mxu2 %v1214_v14  ;;  %v1234_v14 = vor.u32 %v1500_v9, %v1231_v10 }
  0x54   :  { %566 = vmatmul.bf16.gmra.mxu1 %v1210_v13  ;;  %v1543_v13 = vld [vmem:[%s2198_s3 + $0x20] sm:$0xff] }
  0x56   :  { %587 = vmatpush.bf16.msra.mxu0 %v1722_v16  ;;  %v1501_v16 = vld [vmem:[%s2197_s0 + $0xcc] sm:$0xf0] }
  0x57   :  { %v1222_v22 = vor.u32 %v1501_v16, %v1221_v17 }
  0x5a   :  { %588 = vmatpush.bf16.msra.mxu0 %v1737_v19  ;;  %v1229_v19 = vld [vmem:[%s2197_s0 + $0xc8] sm:$0xf] }
  0x5b   :  { %v1230_v26 = vor.u32 %v1502_v21, %v1229_v19  ;;  %v1504_v19 = vld [vmem:[%s2197_s0 + $0xec] sm:$0xf]  ;;  %v1247_v21 = vld [vmem:[%s2197_s0 + $0xf8] sm:$0xf0] }
  0x5e   :  { %589 = vmatpush.bf16.msra.mxu0 %v1764_v27  ;;  %v1226_v27 = vor.u32 %v1499_v24, %v1223_v25  ;;  %v1539_v24 = vld [vmem:[%s2198_s3] sm:$0xff] }
  0x61   :  { %522 = vmatmul.bf16.gmra.mxu3 %v1222_v22  ;;  %590 = vmatmul.bf16.vlgmr.msra.gmra.mxu0 %v1134_v23  ;;  %v1250_v23 = vor.u32 %v1504_v19, %v1247_v21 }
  0x62   :  { %772 = vmatpush.bf16.msrb.mxu0 %v1546_v4 }
  0x63   :  { %620 = vmatmul.bf16.gmra.mxu2 %v1230_v26 }
  0x64   :  { %571 = vmatmul.bf16.gmra.mxu1 %v1226_v27 }
  0x66   :  { %773 = vmatpush.bf16.msrb.mxu0 %v1545_v7 }
  0x6a   :  { %774 = vmatpush.bf16.msrb.mxu0 %v1544_v8 }
  0x6e   :  { %775 = vmatpush.bf16.msrb.mxu0 %v1543_v13 }
  0x71   :  { %527 = vmatmul.bf16.gmra.mxu3 %v1238_v34  ;;  %595 = vmatmul.bf16.gmra.mxu0 %v1150_v35 }
  0x72   :  { %776 = vmatpush.bf16.msrb.mxu0 %v1542_v15 }
  0x73   :  { %625 = vmatmul.bf16.gmra.mxu2 %v1246_v38 }
  0x74   :  { %576 = vmatmul.bf16.gmra.mxu1 %v1242_v39 }
  0x76   :  { %777 = vmatpush.bf16.msrb.mxu0 %v1541_v18 }
  0x7a   :  { %778 = vmatpush.bf16.msrb.mxu0 %v1540_v20 }
  0x7e   :  { %779 = vmatpush.bf16.msrb.mxu0 %v1539_v24 }
  0x81   :  { %639 = vmatmul.bf16.vlgmr.msrb.gmra.mxu3 %v1138_v42 }
  0x91   :  { %644 = vmatmul.bf16.gmra.mxu3 %v1154_v45 }
  0x9e   :  { %v493_v50 = vpop.f32.mrf.mxu0 }
  0x9f   :  { %v494_v30 = vadd.f32 %v2040_v29, %v493_v50 }
  0xa0   :  { %v552_v33 = vpop.f32.mrf.mxu1 }
  0xa1   :  { %649 = vmatmul.bf16.gmra.mxu3 %v1170_v48 }
  0xa4   :  { %v1955_v49 = vpop.f32.mrf.mxu3 }
  0xa5   :  { %v504_v9 = vadd.f32 %v2040_v29, %v1955_v49 }
  0xa6   :  { %v495_v55 = vpop.f32.mrf.mxu0  ;;  %v601_v38 = vpop.f32.mrf.mxu2 }
  0xa7   :  { %v496_v34 = vadd.f32 %v2040_v29, %v495_v55  ;;  %v553_v13 = vadd.f32 %v552_v33, %v504_v9 }
  0xa8   :  { %v554_v46 = vpop.f32.mrf.mxu1 }
  0xa9   :  { %v602_v20 = vadd.f32 %v601_v38, %v553_v13 }
  0xac   :  { %v1963_v53 = vpop.f32.mrf.mxu3 }
  0xad   :  { %v506_v10 = vadd.f32 %v2040_v29, %v1963_v53 }
  0xae   :  { %v1975_v61 = vpop.f32.mrf.mxu0  ;;  %v603_v50 = vpop.f32.mrf.mxu2 }
  0xaf   :  { %v499_v48 = vadd.f32 %v2040_v29, %v1975_v61  ;;  %v1554_v61 = vld [vmem:[%s2200_s5 + $0x38] sm:$0xff]  ;;  %v555_v15 = vadd.f32 %v554_v46, %v506_v10 }
  0xb0   :  { %913 = vmatpush.bf16.msrb.mxu1 %v1554_v61 }
  0xb1   :  { %654 = vmatmul.bf16.gmra.mxu3 %v1186_v54  ;;  %v604_v19 = vadd.f32 %v603_v50, %v555_v15 }
  0xb4   :  { %v1965_v56 = vpop.f32.mrf.mxu3 }
  0xb5   :  { %v509_v53 = vadd.f32 %v2040_v29, %v1965_v56 }
  0xb6   :  { %v1979_v63 = vpop.f32.mrf.mxu0 }
  0xb7   :  { %v501_v52 = vadd.f32 %v2040_v29, %v1979_v63 }
  0xbc   :  { %v1973_v59 = vpop.f32.mrf.mxu3 }
  0xbe   :  { %v542_v5 = vpop.f32.mrf.mxu0 }
  0xbf   :  { %v543_v35 = vadd.f32 %v542_v5, %v494_v30  ;;  %v606_v5 = vpop.f32.mrf.mxu2 }
  0xc1   :  { %659 = vmatmul.bf16.gmra.mxu3 %v1202_v60  ;;  %v557_v60 = vpop.f32.mrf.mxu1 }
  0xc4   :  { %v1977_v62 = vpop.f32.mrf.mxu3 }
  0xc6   :  { %v544_v11 = vpop.f32.mrf.mxu0 }
  0xc7   :  { %v545_v36 = vadd.f32 %v544_v11, %v496_v34  ;;  %v608_v18 = vpop.f32.mrf.mxu2  ;;  %v558_v34 = vadd.f32 %v557_v60, %v509_v53 }
  0xc9   :  { %v559_v11 = vpop.f32.mrf.mxu1  ;;  %v607_v38 = vadd.f32 %v606_v5, %v558_v34 }
  0xcc   :  { %v1987_v2 = vpop.f32.mrf.mxu3 }
  0xce   :  { %v547_v16 = vpop.f32.mrf.mxu0 }
  0xcf   :  { %v548_v54 = vadd.f32 %v547_v16, %v499_v48  ;;  %v1553_v16 = vld [vmem:[%s2200_s5 + $0x30] sm:$0xff]  ;;  %v1551_v48 = vld [vmem:[%s2200_s5 + $0x20] sm:$0xff] }
  0xd0   :  { %914 = vmatpush.bf16.msrb.mxu1 %v1553_v16 }
  0xd1   :  { %664 = vmatmul.bf16.gmra.mxu3 %v1218_v3  ;;  %v562_v24 = vpop.f32.mrf.mxu1 }
  0xd4   :  { %v1992_v6 = vpop.f32.mrf.mxu3 }
  0xd6   :  { %v549_v25 = vpop.f32.mrf.mxu0 }
  0xd7   :  { %v550_v57 = vadd.f32 %v549_v25, %v501_v52 }
  0xdc   :  { %v2006_v12 = vpop.f32.mrf.mxu3 }
  0xde   :  { %v591_v27 = vpop.f32.mrf.mxu0 }
  0xdf   :  { %v592_v37 = vadd.f32 %v591_v27, %v543_v35 }
  0xe1   :  { %669 = vmatmul.bf16.gmra.mxu3 %v1234_v14 }
  0xe4   :  { %v2014_v17 = vpop.f32.mrf.mxu3 }
  0xe6   :  { %v593_v31 = vpop.f32.mrf.mxu0 }
  0xe7   :  { %v594_v39 = vadd.f32 %v593_v31, %v545_v36  ;;  %v611_v31 = vpop.f32.mrf.mxu2  ;;  %v1552_v36 = vld [vmem:[%s2200_s5 + $0x28] sm:$0xff] }
  0xe8   :  { %915 = vmatpush.bf16.msrb.mxu1 %v1552_v36 }
  0xec   :  { %v2028_v22 = vpop.f32.mrf.mxu3  ;;  %916 = vmatpush.bf16.msrb.mxu1 %v1551_v48 }
  0xee   :  { %v596_v43 = vpop.f32.mrf.mxu0 }
  0xef   :  { %v597_v58 = vadd.f32 %v596_v43, %v548_v54 }
  0xf1   :  { %674 = vmatmul.bf16.gmra.mxu3 %v1250_v23 }
  0xf4   :  { %v2033_v26 = vpop.f32.mrf.mxu3 }
  0xf6   :  { %v598_v55 = vpop.f32.mrf.mxu0 }
  0xf7   :  { %v599_v0 = vadd.f32 %v598_v55, %v550_v57 }
  0xfc   :  { %v2035_v28 = vpop.f32.mrf.mxu3 }
 0x104   :  { %v640_v32 = vpop.f32.mrf.mxu3 }
 0x105   :  { %v641_v40 = vadd.f32 %v640_v32, %v592_v37  ;;  %v511_v32 = vadd.f32 %v2040_v29, %v1973_v59  ;;  %v564_v37 = vpop.f32.mrf.mxu1  ;;  %v514_v59 = vadd.f32 %v2040_v29, %v1977_v62 }
 0x107   :  { %v680_v44 = vmax.f32 %v641_v40, 0.0  ;;  %v560_v35 = vadd.f32 %v559_v11, %v511_v32  ;;  %v1549_v11 = vld [vmem:[%s2200_s5 + $0x10] sm:$0xff] }
 0x10c   :  { %v642_v41 = vpop.f32.mrf.mxu3 }
 0x10d   :  { %v643_v42 = vadd.f32 %v642_v41, %v594_v39  ;;  %v609_v39 = vadd.f32 %v608_v18, %v560_v35  ;;  %v613_v41 = vpop.f32.mrf.mxu2  ;;  %v567_v46 = vpop.f32.mrf.mxu1 }
 0x10f   :  { %v681_v45 = vmax.f32 %v643_v42, 0.0 }
 0x111   :  { %v696_v47 = vpack.c.bf16 %v681_v45, %v680_v44 }
 0x113   :  { %780 = vmatmul.bf16.vlgmr.msrb.gmra.mxu0 %v696_v47  ;;  %v516_v47 = vadd.f32 %v2040_v29, %v1987_v2  ;;  %v519_v2 = vadd.f32 %v2040_v29, %v1992_v6 }
 0x114   :  { %v645_v51 = vpop.f32.mrf.mxu3 }
 0x115   :  { %v646_v1 = vadd.f32 %v645_v51, %v597_v58  ;;  %v563_v51 = vadd.f32 %v562_v24, %v514_v59  ;;  %v616_v52 = vpop.f32.mrf.mxu2  ;;  %v565_v54 = vadd.f32 %v564_v37, %v516_v47  ;;  %v569_v60 = vpop.f32.mrf.mxu1  ;;  %v568_v9 = vadd.f32 %v567_v46, %v519_v2  ;;  %v1548_v24 = vld [vmem:[%s2200_s5 + $0x8] sm:$0xff] }
 0x117   :  { %v682_v7 = vmax.f32 %v646_v1, 0.0  ;;  %v612_v55 = vadd.f32 %v611_v31, %v563_v51  ;;  %v614_v57 = vadd.f32 %v613_v41, %v565_v54  ;;  %v1547_v41 = vld [vmem:[%s2200_s5] sm:$0xff] }
 0x11c   :  { %v647_v3 = vpop.f32.mrf.mxu3 }
 0x11d   :  { %v648_v4 = vadd.f32 %v647_v3, %v599_v0 }
 0x11f   :  { %v683_v8 = vmax.f32 %v648_v4, 0.0  ;;  %v618_v4 = vpop.f32.mrf.mxu2 }
 0x121   :  { %v697_v63 = vpack.c.bf16 %v683_v8, %v682_v7  ;;  %v1550_v7 = vld [vmem:[%s2200_s5 + $0x18] sm:$0xff]  ;;  %v521_v8 = vadd.f32 %v2040_v29, %v2006_v12 }
 0x122   :  { %917 = vmatpush.bf16.msrb.mxu1 %v1550_v7  ;;  %v1562_v7 = vld [vmem:[%s2202_s7 + $0x38] sm:$0xff] }
 0x123   :  { %785 = vmatmul.bf16.gmra.mxu0 %v697_v63  ;;  %v572_v63 = vpop.f32.mrf.mxu1  ;;  %v570_v10 = vadd.f32 %v569_v60, %v521_v8  ;;  %1054 = vmatpush.bf16.msrb.mxu2 %v1562_v7 }
 0x124   :  { %v650_v14 = vpop.f32.mrf.mxu3 }
 0x125   :  { %v651_v21 = vadd.f32 %v650_v14, %v602_v20  ;;  %v617_v14 = vadd.f32 %v616_v52, %v568_v9  ;;  %v619_v13 = vadd.f32 %v618_v4, %v570_v10  ;;  %v1561_v9 = vld [vmem:[%s2202_s7 + $0x30] sm:$0xff] }
 0x126   :  { %918 = vmatpush.bf16.msrb.mxu1 %v1549_v11 }
 0x127   :  { %v684_v25 = vmax.f32 %v651_v21, 0.0  ;;  %v621_v6 = vpop.f32.mrf.mxu2  ;;  %v524_v21 = vadd.f32 %v2040_v29, %v2014_v17  ;;  %1055 = vmatpush.bf16.msrb.mxu2 %v1561_v9 }
 0x129   :  { %v573_v53 = vadd.f32 %v572_v63, %v524_v21 }
 0x12a   :  { %919 = vmatpush.bf16.msrb.mxu1 %v1548_v24 }
 0x12b   :  { %v574_v12 = vpop.f32.mrf.mxu1  ;;  %v622_v31 = vadd.f32 %v621_v6, %v573_v53 }
 0x12c   :  { %v652_v49 = vpop.f32.mrf.mxu3 }
 0x12d   :  { %v653_v23 = vadd.f32 %v652_v49, %v604_v19 }
 0x12e   :  { %920 = vmatpush.bf16.msrb.mxu1 %v1547_v41 }
 0x12f   :  { %v685_v27 = vmax.f32 %v653_v23, 0.0  ;;  %v526_v23 = vadd.f32 %v2040_v29, %v2028_v22  ;;  %v529_v22 = vadd.f32 %v2040_v29, %v2033_v26 }
 0x131   :  { %v698_v30 = vpack.c.bf16 %v685_v27, %v684_v25  ;;  %v623_v25 = vpop.f32.mrf.mxu2 }
 0x133   :  { %790 = vmatmul.bf16.gmra.mxu0 %v698_v30  ;;  %v575_v30 = vadd.f32 %v574_v12, %v526_v23  ;;  %v577_v32 = vpop.f32.mrf.mxu1  ;;  %v1559_v23 = vld [vmem:[%s2202_s7 + $0x20] sm:$0xff] }
 0x134   :  { %v655_v33 = vpop.f32.mrf.mxu3 }
 0x135   :  { %v656_v40 = vadd.f32 %v655_v33, %v607_v38  ;;  %v624_v33 = vadd.f32 %v623_v25, %v575_v30 }
 0x137   :  { %v686_v43 = vmax.f32 %v656_v40, 0.0  ;;  %v531_v40 = vadd.f32 %v2040_v29, %v2035_v28  ;;  %v2099_v29 = vld [vmem:[%s2199_s4] ss:$0 sm:$0xff] }
 0x139   :  { %v626_v36 = vpop.f32.mrf.mxu2 }
 0x13c   :  { %v657_v56 = vpop.f32.mrf.mxu3 }
 0x13d   :  { %v658_v42 = vadd.f32 %v657_v56, %v609_v39  ;;  %v579_v56 = vpop.f32.mrf.mxu1 }
 0x13f   :  { %v687_v44 = vmax.f32 %v658_v42, 0.0 }
 0x141   :  { %v699_v45 = vpack.c.bf16 %v687_v44, %v686_v43  ;;  %v578_v43 = vadd.f32 %v577_v32, %v529_v22  ;;  %v580_v44 = vadd.f32 %v579_v56, %v531_v40  ;;  %v628_v59 = vpop.f32.mrf.mxu2  ;;  %v1556_v40 = vld [vmem:[%s2202_s7 + $0x8] sm:$0xff] }
 0x143   :  { %795 = vmatmul.bf16.gmra.mxu0 %v699_v45  ;;  %v627_v45 = vadd.f32 %v626_v36, %v578_v43  ;;  %v629_v46 = vadd.f32 %v628_v59, %v580_v44 }
 0x144   :  { %v660_v50 = vpop.f32.mrf.mxu3 }
 0x145   :  { %v661_v58 = vadd.f32 %v660_v50, %v612_v55 }
 0x147   :  { %v688_v1 = vmax.f32 %v661_v58, 0.0 }
 0x14c   :  { %v662_v62 = vpop.f32.mrf.mxu3 }
 0x14d   :  { %v663_v0 = vadd.f32 %v662_v62, %v614_v57 }
 0x14f   :  { %v689_v3 = vmax.f32 %v663_v0, 0.0 }
 0x151   :  { %v700_v5 = vpack.c.bf16 %v689_v3, %v688_v1 }
 0x153   :  { %800 = vmatmul.bf16.gmra.mxu0 %v700_v5 }
 0x154   :  { %v665_v61 = vpop.f32.mrf.mxu3 }
 0x155   :  { %v666_v15 = vadd.f32 %v665_v61, %v617_v14 }
 0x157   :  { %v690_v20 = vmax.f32 %v666_v15, 0.0 }
 0x15c   :  { %v667_v16 = vpop.f32.mrf.mxu3 }
 0x15d   :  { %v668_v18 = vadd.f32 %v667_v16, %v619_v13  ;;  %v1560_v16 = vld [vmem:[%s2202_s7 + $0x28] sm:$0xff] }
 0x15e   :  { %1056 = vmatpush.bf16.msrb.mxu2 %v1560_v16 }
 0x15f   :  { %v691_v19 = vmax.f32 %v668_v18, 0.0 }
 0x161   :  { %v701_v49 = vpack.c.bf16 %v691_v19, %v690_v20 }
 0x162   :  { %1057 = vmatpush.bf16.msrb.mxu2 %v1559_v23 }
 0x163   :  { %805 = vmatmul.bf16.gmra.mxu0 %v701_v49 }
 0x164   :  { %v670_v27 = vpop.f32.mrf.mxu3 }
 0x165   :  { %v671_v34 = vadd.f32 %v670_v27, %v622_v31 }
 0x167   :  { %v692_v37 = vmax.f32 %v671_v34, 0.0 }
 0x16c   :  { %v672_v35 = vpop.f32.mrf.mxu3 }
 0x16d   :  { %v673_v17 = vadd.f32 %v672_v35, %v624_v33  ;;  %v1558_v33 = vld [vmem:[%s2202_s7 + $0x18] sm:$0xff]  ;;  %v1557_v35 = vld [vmem:[%s2202_s7 + $0x10] sm:$0xff] }
 0x16e   :  { %1058 = vmatpush.bf16.msrb.mxu2 %v1558_v33 }
 0x16f   :  { %v693_v38 = vmax.f32 %v673_v17, 0.0 }
 0x171   :  { %v702_v39 = vpack.c.bf16 %v693_v38, %v692_v37 }
 0x172   :  { %1059 = vmatpush.bf16.msrb.mxu2 %v1557_v35 }
 0x173   :  { %810 = vmatmul.bf16.gmra.mxu0 %v702_v39 }
 0x174   :  { %v675_v42 = vpop.f32.mrf.mxu3 }
 0x175   :  { %v676_v47 = vadd.f32 %v675_v42, %v627_v45 }
 0x176   :  { %1060 = vmatpush.bf16.msrb.mxu2 %v1556_v40 }
 0x177   :  { %v694_v50 = vmax.f32 %v676_v47, 0.0 }
 0x17c   :  { %v677_v48 = vpop.f32.mrf.mxu3 }
 0x17d   :  { %v678_v26 = vadd.f32 %v677_v48, %v629_v46  ;;  %v1555_v46 = vld [vmem:[%s2202_s7] sm:$0xff] }
 0x17e   :  { %1061 = vmatpush.bf16.msrb.mxu2 %v1555_v46 }
 0x17f   :  { %v695_v51 = vmax.f32 %v678_v26, 0.0 }
 0x181   :  { %v703_v52 = vpack.c.bf16 %v695_v51, %v694_v50 }
 0x183   :  { %815 = vmatmul.bf16.gmra.mxu0 %v703_v52 }
 0x190   :  { %v781_v28 = vpop.f32.mrf.mxu0 }
 0x191   :  { %v782_v54 = vadd.f32 %v2099_v29, %v781_v28 }
 0x193   :  { %v821_v58 = vmax.f32 %v782_v54, 0.0 }
 0x198   :  { %v783_v55 = vpop.f32.mrf.mxu0 }
 0x199   :  { %v784_v57 = vadd.f32 %v2099_v29, %v783_v55  ;;  %v1589_v55 = vld [vmem:[%s2201_s6] ss:$0 sm:$0xff] }
 0x19b   :  { %v822_v60 = vmax.f32 %v784_v57, 0.0 }
 0x19d   :  { %v837_v62 = vpack.c.bf16 %v822_v60, %v821_v58 }
 0x19f   :  { %921 = vmatmul.bf16.vlgmr.msrb.gmra.mxu1 %v837_v62 }
 0x1a0   :  { %v786_v0 = vpop.f32.mrf.mxu0 }
 0x1a1   :  { %v787_v1 = vadd.f32 %v2099_v29, %v786_v0 }
 0x1a3   :  { %v823_v2 = vmax.f32 %v787_v1, 0.0 }
 0x1a8   :  { %v788_v3 = vpop.f32.mrf.mxu0 }
 0x1a9   :  { %v789_v4 = vadd.f32 %v2099_v29, %v788_v3 }
 0x1ab   :  { %v824_v5 = vmax.f32 %v789_v4, 0.0 }
 0x1ad   :  { %v838_v8 = vpack.c.bf16 %v824_v5, %v823_v2 }
 0x1af   :  { %926 = vmatmul.bf16.gmra.mxu1 %v838_v8 }
 0x1b0   :  { %v791_v61 = vpop.f32.mrf.mxu0 }
 0x1b1   :  { %v792_v63 = vadd.f32 %v2099_v29, %v791_v61 }
 0x1b3   :  { %v825_v14 = vmax.f32 %v792_v63, 0.0 }
 0x1b8   :  { %v793_v10 = vpop.f32.mrf.mxu0 }
 0x1b9   :  { %v794_v11 = vadd.f32 %v2099_v29, %v793_v10 }
 0x1bb   :  { %v826_v6 = vmax.f32 %v794_v11, 0.0 }
 0x1bd   :  { %v839_v13 = vpack.c.bf16 %v826_v6, %v825_v14 }
 0x1bf   :  { %931 = vmatmul.bf16.gmra.mxu1 %v839_v13 }
 0x1c0   :  { %v796_v15 = vpop.f32.mrf.mxu0 }
 0x1c1   :  { %v797_v18 = vadd.f32 %v2099_v29, %v796_v15 }
 0x1c3   :  { %v827_v12 = vmax.f32 %v797_v18, 0.0 }
 0x1c8   :  { %v798_v20 = vpop.f32.mrf.mxu0 }
 0x1c9   :  { %v799_v19 = vadd.f32 %v2099_v29, %v798_v20 }
 0x1cb   :  { %v828_v21 = vmax.f32 %v799_v19, 0.0 }
 0x1cd   :  { %v840_v49 = vpack.c.bf16 %v828_v21, %v827_v12 }
 0x1cf   :  { %936 = vmatmul.bf16.gmra.mxu1 %v840_v49 }
 0x1d0   :  { %v801_v24 = vpop.f32.mrf.mxu0 }
 0x1d1   :  { %v802_v25 = vadd.f32 %v2099_v29, %v801_v24 }
 0x1d3   :  { %v829_v30 = vmax.f32 %v802_v25, 0.0 }
 0x1d8   :  { %v803_v27 = vpop.f32.mrf.mxu0 }
 0x1d9   :  { %v804_v53 = vadd.f32 %v2099_v29, %v803_v27 }
 0x1db   :  { %v830_v31 = vmax.f32 %v804_v53, 0.0 }
 0x1dd   :  { %v841_v32 = vpack.c.bf16 %v830_v31, %v829_v30 }
 0x1df   :  { %941 = vmatmul.bf16.gmra.mxu1 %v841_v32 }
 0x1e0   :  { %v806_v34 = vpop.f32.mrf.mxu0 }
 0x1e1   :  { %v807_v17 = vadd.f32 %v2099_v29, %v806_v34 }
 0x1e3   :  { %v831_v38 = vmax.f32 %v807_v17, 0.0 }
 0x1e8   :  { %v808_v36 = vpop.f32.mrf.mxu0 }
 0x1e9   :  { %v809_v37 = vadd.f32 %v2099_v29, %v808_v36 }
 0x1eb   :  { %v832_v22 = vmax.f32 %v809_v37, 0.0 }
 0x1ed   :  { %v842_v39 = vpack.c.bf16 %v832_v22, %v831_v38 }
 0x1ef   :  { %946 = vmatmul.bf16.gmra.mxu1 %v842_v39 }
 0x1f0   :  { %v811_v41 = vpop.f32.mrf.mxu0 }
 0x1f1   :  { %v812_v56 = vadd.f32 %v2099_v29, %v811_v41 }
 0x1f3   :  { %v833_v44 = vmax.f32 %v812_v56, 0.0 }
 0x1f8   :  { %v813_v42 = vpop.f32.mrf.mxu0 }
 0x1f9   :  { %v814_v43 = vadd.f32 %v2099_v29, %v813_v42 }
 0x1fb   :  { %v834_v59 = vmax.f32 %v814_v43, 0.0 }
 0x1fd   :  { %v843_v45 = vpack.c.bf16 %v834_v59, %v833_v44 }
 0x1ff   :  { %951 = vmatmul.bf16.gmra.mxu1 %v843_v45 }
 0x200   :  { %v816_v47 = vpop.f32.mrf.mxu0 }
 0x201   :  { %v817_v48 = vadd.f32 %v2099_v29, %v816_v47  ;;  %v1590_v47 = vld [vmem:[%s2203_s8] ss:$0 sm:$0xff] }
 0x203   :  { %v835_v51 = vmax.f32 %v817_v48, 0.0 }
 0x208   :  { %v818_v26 = vpop.f32.mrf.mxu0 }
 0x209   :  { %v819_v50 = vadd.f32 %v2099_v29, %v818_v26 }
 0x20b   :  { %v836_v52 = vmax.f32 %v819_v50, 0.0 }
 0x20d   :  { %v844_v28 = vpack.c.bf16 %v836_v52, %v835_v51 }
 0x20f   :  { %956 = vmatmul.bf16.gmra.mxu1 %v844_v28 }
 0x21c   :  { %v922_v54 = vpop.f32.mrf.mxu1 }
 0x21d   :  { %v923_v57 = vadd.f32 %v1589_v55, %v922_v54 }
 0x21f   :  { %v962_v62 = vmax.f32 %v923_v57, 0.0 }
 0x224   :  { %v924_v58 = vpop.f32.mrf.mxu1 }
 0x225   :  { %v925_v60 = vadd.f32 %v1589_v55, %v924_v58 }
 0x227   :  { %v963_v0 = vmax.f32 %v925_v60, 0.0 }
 0x229   :  { %v978_v1 = vpack.c.bf16 %v963_v0, %v962_v62 }
 0x22b   :  { %1062 = vmatmul.bf16.vlgmr.msrb.gmra.mxu2 %v978_v1 }
 0x22c   :  { %v927_v3 = vpop.f32.mrf.mxu1 }
 0x22d   :  { %v928_v4 = vadd.f32 %v1589_v55, %v927_v3 }
 0x22f   :  { %v964_v5 = vmax.f32 %v928_v4, 0.0 }
 0x234   :  { %v929_v2 = vpop.f32.mrf.mxu1 }
 0x235   :  { %v930_v29 = vadd.f32 %v1589_v55, %v929_v2 }
 0x237   :  { %v965_v7 = vmax.f32 %v930_v29, 0.0 }
 0x239   :  { %v979_v8 = vpack.c.bf16 %v965_v7, %v964_v5 }
 0x23b   :  { %1067 = vmatmul.bf16.gmra.mxu2 %v979_v8 }
 0x23c   :  { %v932_v61 = vpop.f32.mrf.mxu1 }
 0x23d   :  { %v933_v9 = vadd.f32 %v1589_v55, %v932_v61 }
 0x23f   :  { %v966_v11 = vmax.f32 %v933_v9, 0.0 }
 0x244   :  { %v934_v63 = vpop.f32.mrf.mxu1 }
 0x245   :  { %v935_v10 = vadd.f32 %v1589_v55, %v934_v63 }
 0x247   :  { %v967_v14 = vmax.f32 %v935_v10, 0.0 }
 0x249   :  { %v980_v6 = vpack.c.bf16 %v967_v14, %v966_v11 }
 0x24b   :  { %1072 = vmatmul.bf16.gmra.mxu2 %v980_v6 }
 0x24c   :  { %v937_v13 = vpop.f32.mrf.mxu1 }
 0x24d   :  { %v938_v15 = vadd.f32 %v1589_v55, %v937_v13 }
 0x24f   :  { %v968_v20 = vmax.f32 %v938_v15, 0.0 }
 0x254   :  { %v939_v16 = vpop.f32.mrf.mxu1 }
 0x255   :  { %v940_v18 = vadd.f32 %v1589_v55, %v939_v16 }
 0x257   :  { %v969_v19 = vmax.f32 %v940_v18, 0.0 }
 0x259   :  { %v981_v12 = vpack.c.bf16 %v969_v19, %v968_v20 }
 0x25b   :  { %1077 = vmatmul.bf16.gmra.mxu2 %v981_v12 }
 0x25c   :  { %v942_v21 = vpop.f32.mrf.mxu1 }
 0x25d   :  { %v943_v49 = vadd.f32 %v1589_v55, %v942_v21 }
 0x25f   :  { %v970_v25 = vmax.f32 %v943_v49, 0.0 }
 0x264   :  { %v944_v23 = vpop.f32.mrf.mxu1 }
 0x265   :  { %v945_v24 = vadd.f32 %v1589_v55, %v944_v23 }
 0x267   :  { %v971_v27 = vmax.f32 %v945_v24, 0.0 }
 0x269   :  { %v982_v53 = vpack.c.bf16 %v971_v27, %v970_v25 }
 0x26b   :  { %1082 = vmatmul.bf16.gmra.mxu2 %v982_v53 }
 0x26c   :  { %v947_v30 = vpop.f32.mrf.mxu1 }
 0x26d   :  { %v948_v31 = vadd.f32 %v1589_v55, %v947_v30 }
 0x26f   :  { %v972_v34 = vmax.f32 %v948_v31, 0.0 }
 0x274   :  { %v949_v32 = vpop.f32.mrf.mxu1 }
 0x275   :  { %v950_v33 = vadd.f32 %v1589_v55, %v949_v32 }
 0x277   :  { %v973_v35 = vmax.f32 %v950_v33, 0.0 }
 0x279   :  { %v983_v17 = vpack.c.bf16 %v973_v35, %v972_v34 }
 0x27b   :  { %1087 = vmatmul.bf16.gmra.mxu2 %v983_v17 }
 0x27c   :  { %v952_v36 = vpop.f32.mrf.mxu1 }
 0x27d   :  { %v953_v37 = vadd.f32 %v1589_v55, %v952_v36 }
 0x27f   :  { %v974_v39 = vmax.f32 %v953_v37, 0.0 }
 0x284   :  { %v954_v38 = vpop.f32.mrf.mxu1 }
 0x285   :  { %v955_v22 = vadd.f32 %v1589_v55, %v954_v38 }
 0x287   :  { %v975_v40 = vmax.f32 %v955_v22, 0.0 }
 0x289   :  { %v984_v41 = vpack.c.bf16 %v975_v40, %v974_v39 }
 0x28b   :  { %1092 = vmatmul.bf16.gmra.mxu2 %v984_v41 }
 0x28c   :  { %v957_v56 = vpop.f32.mrf.mxu1 }
 0x28d   :  { %v958_v42 = vadd.f32 %v1589_v55, %v957_v56 }
 0x28f   :  { %v976_v59 = vmax.f32 %v958_v42, 0.0 }
 0x294   :  { %v959_v43 = vpop.f32.mrf.mxu1 }
 0x295   :  { %v960_v44 = vadd.f32 %v1589_v55, %v959_v43 }
 0x297   :  { %v977_v45 = vmax.f32 %v960_v44, 0.0 }
 0x299   :  { %v985_v46 = vpack.c.bf16 %v977_v45, %v976_v59 }
 0x29b   :  { %1097 = vmatmul.bf16.gmra.mxu2 %v985_v46 }
 0x2ae   :  { %v1063_v48 = vpop.f32.mrf.mxu2 }
 0x2af   :  { %v1064_v26 = vadd.f32 %v1590_v47, %v1063_v48 }
 0x2b1   :  { %1103 = vst [vmem:[%s2204_s9] sm:$0xff] %v1064_v26 }
 0x2b6   :  { %v1065_v50 = vpop.f32.mrf.mxu2 }
 0x2b7   :  { %v1066_v51 = vadd.f32 %v1590_v47, %v1065_v50 }
 0x2b9   :  { %1104 = vst [vmem:[%s2204_s9 + $0x8] sm:$0xff] %v1066_v51 }
 0x2be   :  { %v1068_v52 = vpop.f32.mrf.mxu2 }
 0x2bf   :  { %v1069_v28 = vadd.f32 %v1590_v47, %v1068_v52 }
 0x2c1   :  { %1105 = vst [vmem:[%s2204_s9 + $0x10] sm:$0xff] %v1069_v28 }
 0x2c6   :  { %v1070_v54 = vpop.f32.mrf.mxu2 }
 0x2c7   :  { %v1071_v55 = vadd.f32 %v1590_v47, %v1070_v54 }
 0x2c9   :  { %1106 = vst [vmem:[%s2204_s9 + $0x18] sm:$0xff] %v1071_v55 }
 0x2ce   :  { %v1073_v57 = vpop.f32.mrf.mxu2 }
 0x2cf   :  { %v1074_v58 = vadd.f32 %v1590_v47, %v1073_v57 }
 0x2d1   :  { %1107 = vst [vmem:[%s2204_s9 + $0x20] sm:$0xff] %v1074_v58 }
 0x2d6   :  { %v1075_v60 = vpop.f32.mrf.mxu2 }
 0x2d7   :  { %v1076_v62 = vadd.f32 %v1590_v47, %v1075_v60 }
 0x2d9   :  { %1108 = vst [vmem:[%s2204_s9 + $0x28] sm:$0xff] %v1076_v62 }
 0x2de   :  { %v1078_v0 = vpop.f32.mrf.mxu2 }
 0x2df   :  { %v1079_v1 = vadd.f32 %v1590_v47, %v1078_v0 }
 0x2e1   :  { %1109 = vst [vmem:[%s2204_s9 + $0x30] sm:$0xff] %v1079_v1 }
 0x2e6   :  { %v1080_v3 = vpop.f32.mrf.mxu2 }
 0x2e7   :  { %v1081_v4 = vadd.f32 %v1590_v47, %v1080_v3 }
 0x2e9   :  { %1110 = vst [vmem:[%s2204_s9 + $0x38] sm:$0xff] %v1081_v4 }
 0x2ee   :  { %v1083_v2 = vpop.f32.mrf.mxu2 }
 0x2ef   :  { %v1084_v29 = vadd.f32 %v1590_v47, %v1083_v2 }
 0x2f1   :  { %1111 = vst [vmem:[%s2204_s9 + $0x40] sm:$0xff] %v1084_v29 }
 0x2f6   :  { %v1085_v5 = vpop.f32.mrf.mxu2 }
 0x2f7   :  { %v1086_v7 = vadd.f32 %v1590_v47, %v1085_v5 }
 0x2f9   :  { %1112 = vst [vmem:[%s2204_s9 + $0x48] sm:$0xff] %v1086_v7 }
 0x2fe   :  { %v1088_v8 = vpop.f32.mrf.mxu2 }
 0x2ff   :  { %v1089_v61 = vadd.f32 %v1590_v47, %v1088_v8 }
 0x301   :  { %1113 = vst [vmem:[%s2204_s9 + $0x50] sm:$0xff] %v1089_v61 }
 0x306   :  { %v1090_v9 = vpop.f32.mrf.mxu2 }
 0x307   :  { %v1091_v63 = vadd.f32 %v1590_v47, %v1090_v9 }
 0x309   :  { %1114 = vst [vmem:[%s2204_s9 + $0x58] sm:$0xff] %v1091_v63 }
 0x30e   :  { %v1093_v10 = vpop.f32.mrf.mxu2 }
 0x30f   :  { %v1094_v11 = vadd.f32 %v1590_v47, %v1093_v10 }
 0x311   :  { %1115 = vst [vmem:[%s2204_s9 + $0x60] sm:$0xff] %v1094_v11 }
 0x316   :  { %v1095_v14 = vpop.f32.mrf.mxu2 }
 0x317   :  { %v1096_v6 = vadd.f32 %v1590_v47, %v1095_v14 }
 0x319   :  { %1116 = vst [vmem:[%s2204_s9 + $0x68] sm:$0xff] %v1096_v6 }
 0x31e   :  { %v1098_v13 = vpop.f32.mrf.mxu2 }
 0x31f   :  { %v1099_v15 = vadd.f32 %v1590_v47, %v1098_v13 }
 0x321   :  { %1117 = vst [vmem:[%s2204_s9 + $0x70] sm:$0xff] %v1099_v15 }
 0x326   :  { %v1100_v16 = vpop.f32.mrf.mxu2 }
 0x327   :  { %v1101_v18 = vadd.f32 %v1590_v47, %v1100_v16 }
 0x329   :  { %1118 = vst [vmem:[%s2204_s9 + $0x78] sm:$0xff] %v1101_v18 }

</bundles_post_ra>
